<compile_context>
chip_gen: v7x
topology: tpu7x:2x2x1
jax: 0.10.0
libtpu: 0.0.40
codegen_flags: <defaults>
</compile_context>

<pallas_src>
import functools

import jax
import jax.numpy as jnp
from jax.experimental import pallas as pl
from jax.experimental.pallas import tpu as pltpu


def _round_up(v, m):
    return ((v + m - 1) // m) * m


def _divisors_desc(v, step):
    return [d for d in range(step, v + 1, step) if v % d == 0][::-1]


_DEFAULT_VMEM_CAP = 64 * 1024 * 1024  # v7x per-core VMEM (smallest across v5e/v6e/v7x)


@functools.lru_cache(maxsize=1)
def _vmem_budget_bytes():
    """Per-generation VMEM budget with ~25% headroom (v5e/v6e ~96 MiB, v7x ~48 MiB)."""
    cap = None
    try:
        info = pltpu.get_tpu_info()
        cap = getattr(info, "vmem_capacity_bytes", None)
    except Exception:
        cap = None
    if not cap:
        cap = _DEFAULT_VMEM_CAP
    return int(cap) * 3 // 4


# --------------------------------------------------------------------------- #
# Kernels
# --------------------------------------------------------------------------- #
def _pool_fc_kernel(x_ref, w_ref, b_ref, o_ref, *, inv_hw, nk):
    """Global-avg-pool (over the trailing H*W lane axis) + fc, one grid step.

    x_ref: (tn, tk, HW) activations in native NC(HW) layout
    w_ref: (tk, tj)     fc weight slice (already transposed, class-padded)
    b_ref: (1, tj)      bias
    o_ref: (tn, tj)     f32 output block (doubles as the reduction accumulator)
    """
    # Pool in f32 on the otherwise-idle XLU, then cast the SMALL pooled tile to
    # the weight dtype (bf16 when available) so the MXU runs natively.
    pooled = jnp.sum(x_ref[...].astype(jnp.float32), axis=-1)   # (tn, tk) raw sums
    pooled = pooled.astype(w_ref.dtype)
    contrib = jnp.dot(pooled, w_ref[...], preferred_element_type=jnp.float32)

    if nk == 1:
        # Common case: whole reduction in one step -- no accumulator revisits.
        o_ref[...] = contrib * inv_hw + b_ref[...]
    else:
        k = pl.program_id(2)

        @pl.when(k == 0)
        def _init():
            o_ref[...] = jnp.zeros_like(o_ref)

        o_ref[...] += contrib

        @pl.when(k == nk - 1)
        def _finish():
            # sum-pool accumulated; apply the 1/(H*W) scale and bias once.
            o_ref[...] = o_ref[...] * inv_hw + b_ref[...]


def _fc_kernel(x_ref, w_ref, b_ref, o_ref, *, nk):
    """Flat path: x (tn, tk) @ W (tk, tj) + b, accumulating directly in o_ref."""
    x = x_ref[...]
    if x.dtype != w_ref.dtype:
        x = x.astype(w_ref.dtype)
    contrib = jnp.dot(x, w_ref[...], preferred_element_type=jnp.float32)

    if nk == 1:
        o_ref[...] = contrib + b_ref[...]
    else:
        k = pl.program_id(2)

        @pl.when(k == 0)
        def _init():
            # Fold the bias add into accumulator initialization.
            o_ref[...] = jnp.broadcast_to(b_ref[...], o_ref.shape)

        o_ref[...] += contrib


# --------------------------------------------------------------------------- #
# Tile selection
# --------------------------------------------------------------------------- #
def _channel_candidates(c):
    """(tk, c_eff) candidates, best first: no padding + single reduction step."""
    cands = [(c, c)]                                   # whole C in one step, no pad
    if c % 128 == 0:
        for d in _divisors_desc(c, 128):
            if d != c:
                cands.append((d, c))
    # Padded fallbacks (copy x along C) -- only for awkward / huge channel counts.
    for tk in (2048, 1024, 512, 256, 128):
        cands.append((tk, _round_up(c, tk)))
    return cands


def _batch_candidates(n, max_tile_n):
    cands = []
    if max_tile_n is None or n <= max_tile_n:
        cands.append((n, n))                            # single batch tile, no pad
    n_pad = _round_up(n, 8)
    cap = max(8, max_tile_n) if max_tile_n is not None else 512
    for tn in _divisors_desc(n_pad, 8):
        if tn <= cap and (tn, n_pad) not in cands:
            cands.append((tn, n_pad))
    if not cands:
        cands.append((8, n_pad))
    return cands


def _fits(tn, tk, hw, k_pad, x_item, w_item, nk, budget):
    x_bytes = 2 * tn * tk * hw * x_item                 # double-buffered activation block
    w_bytes = (1 if nk == 1 else 2) * tk * k_pad * w_item
    o_bytes = 2 * tn * k_pad * 4
    b_bytes = 2 * k_pad * 4
    slack = 2 * 1024 * 1024                             # compiler-internal scratch headroom
    return x_bytes + w_bytes + o_bytes + b_bytes + slack <= budget


def _select_tiles(n, c, hw, k_pad, x_item, w_item, budget, max_tile_n, max_tile_k):
    tk_cap = None if max_tile_k is None else max(128, max_tile_k)
    chan, seen = [], set()
    for tk, c_eff in _channel_candidates(c):
        if tk_cap is not None and tk > tk_cap:
            continue
        if (tk, c_eff) in seen:
            continue
        seen.add((tk, c_eff))
        nk = c_eff // tk
        pad_penalty = 4 if c_eff != c else 0            # padding C copies the activations
        chan.append((nk + pad_penalty, -tk, tk, c_eff, nk))
    chan.sort()
    batch = _batch_candidates(n, max_tile_n)
    # Prefer the fewest reduction steps (v5e: the accumulator RMW is the hot
    # store slot), then the largest batch tile that fits the VMEM budget.
    for _, _, tk, c_eff, nk in chan:
        for tn, n_eff in batch:
            if _fits(tn, tk, hw, k_pad, x_item, w_item, nk, budget):
                return tn, n_eff, tk, c_eff
    return 8, _round_up(n, 8), 128, _round_up(c, 128)   # last resort


def _block_spec(shape, index_map, *, single_buffered=False):
    """BlockSpec; single-buffer blocks whose index is constant over the grid."""
    if single_buffered:
        try:
            return pl.BlockSpec(shape, index_map, pipeline_mode=pl.Buffered(1))
        except Exception:  # older jax without pipeline_mode / Buffered
            pass
    return pl.BlockSpec(shape, index_map)


# --------------------------------------------------------------------------- #
# Forward
# --------------------------------------------------------------------------- #
def _cls_head_forward(x, w, b, *, num_classes, max_tile_n=None, max_tile_k=None):
    """x: (N, C, H*W) for the pooled path, or (N, C) for the flat path.

    w: (C, K_pad) weight (transposed, class-padded) in f32 or bf16; b: (1, K_pad) f32.
    Returns (N, num_classes) f32 scores.
    """
    pooled = x.ndim == 3
    if pooled:
        n, c, hw = x.shape
    else:
        n, c = x.shape
        hw = 1
    k_pad = w.shape[1]

    budget = _vmem_budget_bytes()
    x_item = jnp.dtype(x.dtype).itemsize
    w_item = jnp.dtype(w.dtype).itemsize
    tn, n_eff, tk, c_eff = _select_tiles(
        n, c, hw, k_pad, x_item, w_item, budget, max_tile_n, max_tile_k)

    # Pad batch / channel axes only when tiling actually needs it (the common
    # configurations -- single batch tile, tk == C -- touch x zero extra times).
    pad_n, pad_c = n_eff - n, c_eff - c
    if pad_n or pad_c:
        pad = ((0, pad_n), (0, pad_c)) + (((0, 0),) if pooled else ())
        x = jnp.pad(x, pad)
    if pad_c:
        w = jnp.pad(w, ((0, pad_c), (0, 0)))  # zero rows: padded channels contribute 0

    ni, nk = n_eff // tn, c_eff // tk
    # Split the class axis only when it gives v7x's second TensorCore work
    # (single batch tile) and costs nothing (nk == 1 => x block never re-fetched).
    nj = 2 if (ni == 1 and nk == 1 and k_pad % 256 == 0) else 1
    tj = k_pad // nj

    if pooled:
        x_spec = pl.BlockSpec((tn, tk, hw), lambda i, j, k: (i, k, 0))
        kernel = functools.partial(_pool_fc_kernel, inv_hw=1.0 / hw, nk=nk)
    else:
        x_spec = pl.BlockSpec((tn, tk), lambda i, j, k: (i, k))
        kernel = functools.partial(_fc_kernel, nk=nk)

    w_spec = _block_spec((tk, tj), lambda i, j, k: (k, j),
                         single_buffered=(nk == 1 and nj == 1))
    b_spec = _block_spec((1, tj), lambda i, j, k: (0, j),
                         single_buffered=(nj == 1))
    out_spec = pl.BlockSpec((tn, tj), lambda i, j, k: (i, j))

    out = pl.pallas_call(
        kernel,
        out_shape=jax.ShapeDtypeStruct((n_eff, k_pad), jnp.float32),
        grid_spec=pltpu.PrefetchScalarGridSpec(
            num_scalar_prefetch=0,
            grid=(ni, nj, nk),
            in_specs=[x_spec, w_spec, b_spec],
            out_specs=out_spec,
        ),
        compiler_params=pltpu.CompilerParams(
            dimension_semantics=("parallel", "parallel", "arbitrary"),
            vmem_limit_bytes=budget,
        ),
    )(x, w, b)
    return out[:n, :num_classes]


class ClsHead:
    """JAX/Pallas port of ClsHead: optional global average pool + one fc layer."""

    def __init__(self, with_avg_pool=False, in_channels=2048, num_classes=1000,
                 key=None, std=0.01, bias=0.0, max_tile_n=None, max_tile_k=None):
        self.with_avg_pool = with_avg_pool
        self.in_channels = in_channels
        self.num_classes = num_classes
        self.max_tile_n = max_tile_n
        self.max_tile_k = max_tile_k
        if key is None:
            key = jax.random.PRNGKey(0)
        # nn.Linear weight is (num_classes, in_channels);
        # init_weights(init_linear='normal', std=0.01, bias=0.0).
        self.weight = std * jax.random.normal(
            key, (num_classes, in_channels), dtype=jnp.float32)
        self.bias = jnp.full((num_classes,), float(bias), dtype=jnp.float32)
        # Transpose + class-pad ONCE; also keep a bf16 copy so bf16 activations get
        # a native bf16 MXU matmul and half the weight DMA / VMEM footprint.
        k_pad = _round_up(num_classes, 128)
        w_t = jnp.zeros((in_channels, k_pad), jnp.float32).at[
            :, :num_classes].set(self.weight.T)
        self._w_f32 = w_t
        self._w_bf16 = w_t.astype(jnp.bfloat16)
        self._b_pad = jnp.zeros((1, k_pad), jnp.float32).at[0, :num_classes].set(self.bias)
        # TODO(synk): loss()/compute_accuracy (cross-entropy, top-k) are training-time
        # utilities, not part of forward(), and are intentionally not ported.

    def __call__(self, x):
        assert isinstance(x, (tuple, list)) and len(x) == 1
        x = x[0]
        if self.with_avg_pool:
            assert x.ndim == 4, 'Tensor must has 4 dims, got: {}'.format(x.ndim)
            n, c, h, w = x.shape
            assert c == self.in_channels
            # NCHW -> (N, C, H*W) is a FREE reshape (contiguous trailing dims): no
            # transpose, no extra HBM pass. The kernel pools over the H*W lanes.
            x = x.reshape(n, c, h * w)
        else:
            x = x.reshape(x.shape[0], -1)
            assert x.shape[1] == self.in_channels
        w = self._w_bf16 if x.dtype == jnp.bfloat16 else self._w_f32
        cls_score = _cls_head_forward(
            x, w, self._b_pad, num_classes=self.num_classes,
            max_tile_n=self.max_tile_n, max_tile_k=self.max_tile_k)
        return [cls_score]


def _reference_forward(head, x, use_bf16_weight=False):
    """Pure-JAX reference (f32 compute; optionally bf16-rounded weight)."""
    x = x[0].astype(jnp.float32)
    if head.with_avg_pool:
        x = jnp.mean(x, axis=(2, 3))
    x = x.reshape(x.shape[0], -1)
    w = head.weight
    if use_bf16_weight:
        w = w.astype(jnp.bfloat16).astype(jnp.float32)
    return x @ w.T + head.bias


if __name__ == "__main__":
    key = jax.random.PRNGKey(0)
    k_x1, k_x2, k_x3, k_w1, k_w2, k_w3 = jax.random.split(key, 6)

    # Case 1: pooled path, f32 NCHW features, auto tiles (single grid step, no copies).
    N, C, H, W = 12, 256, 8, 8
    num_classes = 10
    x4 = jax.random.normal(k_x1, (N, C, H, W), dtype=jnp.float32)
    head_pool = ClsHead(with_avg_pool=True, in_channels=C, num_classes=num_classes,
                        key=k_w1, bias=0.1)
    out_pool = jax.block_until_ready(head_pool([x4])[0])
    ref_pool = _reference_forward(head_pool, [x4])
    assert out_pool.shape == (N, num_classes)
    assert jnp.allclose(out_pool, ref_pool, atol=1e-4, rtol=1e-4)

    # Case 1b: bf16 activations -> native bf16 MXU matmul (f32 accumulation).
    x4_bf16 = x4.astype(jnp.bfloat16)
    out_bf16 = jax.block_until_ready(head_pool([x4_bf16])[0])
    ref_bf16 = _reference_forward(head_pool, [x4_bf16], use_bf16_weight=True)
    assert jnp.allclose(out_bf16, ref_bf16, atol=5e-3, rtol=5e-2)

    # Case 2: pooled path with forced small tiles -> exercises batch tiling (with
    # batch padding), the multi-step reduction accumulate, and the finish scale.
    head_tiled = ClsHead(with_avg_pool=True, in_channels=C, num_classes=num_classes,
                         key=k_w1, bias=0.1, max_tile_n=8, max_tile_k=128)
    out_tiled = jax.block_until_ready(head_tiled([x4])[0])
    assert jnp.allclose(out_tiled, ref_pool, atol=1e-4, rtol=1e-4)

    # Case 3: flat path (with_avg_pool=False), whole problem in one grid point.
    x2 = jax.random.normal(k_x2, (N, C), dtype=jnp.float32)
    head_flat = ClsHead(with_avg_pool=False, in_channels=C, num_classes=num_classes,
                        key=k_w2, bias=0.1)
    out_flat = jax.block_until_ready(head_flat([x2])[0])
    ref_flat = _reference_forward(head_flat, [x2])
    assert out_flat.shape == (N, num_classes)
    assert jnp.allclose(out_flat, ref_flat, atol=1e-4, rtol=1e-4)

    # Case 4: flat path with num_classes a multiple of 256 -> exercises the
    # class-axis "parallel" split (keeps v7x's second TensorCore busy).
    Nc, Cc, ncls = 8, 128, 256
    x2b = jax.random.normal(k_x3, (Nc, Cc), dtype=jnp.float32)
    head_cols = ClsHead(with_avg_pool=False, in_channels=Cc, num_classes=ncls,
                        key=k_w3, bias=0.0)
    out_cols = jax.block_until_ready(head_cols([x2b])[0])
    ref_cols = _reference_forward(head_cols, [x2b])
    assert out_cols.shape == (Nc, ncls)
    assert jnp.allclose(out_cols, ref_cols, atol=1e-4, rtol=1e-4)

    print("KERNEL_OK")
</pallas_src>

<mosaic_0001>
module attributes {stable_mosaic.version = 11 : i64} {
  func.func @_pool_fc_kernel(%arg0: i32, %arg1: i32, %arg2: i32, %arg3: memref<12x256x64xf32, #tpu.memory_space<vmem>>, %arg4: memref<256x128xf32, #tpu.memory_space<vmem>>, %arg5: memref<1x128xf32, #tpu.memory_space<vmem>>, %arg6: memref<12x128xf32, #tpu.memory_space<vmem>>) attributes {dimension_semantics = [#tpu.dimension_semantics<parallel>, #tpu.dimension_semantics<parallel>, #tpu.dimension_semantics<arbitrary>], iteration_bounds = array<i64: 1, 1, 1>, scalar_prefetch = 0 : i64, scratch_operands = 0 : i64, tpu.core_type = #tpu.core_type<tc>, window_params = [{transform_indices = @transform_0, window_bounds = array<i64: 12, 256, 64>}, {pipeline_mode = #tpu.pipeline_mode<synchronous>, transform_indices = @transform_1, window_bounds = array<i64: 256, 128>}, {pipeline_mode = #tpu.pipeline_mode<synchronous>, transform_indices = @transform_2, window_bounds = array<i64: 1, 128>}, {transform_indices = @transform_3, window_bounds = array<i64: 12, 128>}]} {
    %c0 = arith.constant 0 : index
    %c0_0 = arith.constant 0 : index
    %c0_1 = arith.constant 0 : index
    %0 = vector.load %arg3[%c0, %c0_0, %c0_1] : memref<12x256x64xf32, #tpu.memory_space<vmem>>, vector<12x256x64xf32>
    %cst = arith.constant dense<0.000000e+00> : vector<12x256xf32>
    %1 = vector.multi_reduction <add>, %0, %cst [2] : vector<12x256x64xf32> to vector<12x256xf32>
    %c0_2 = arith.constant 0 : index
    %c0_3 = arith.constant 0 : index
    %2 = vector.load %arg4[%c0_2, %c0_3] : memref<256x128xf32, #tpu.memory_space<vmem>>, vector<256x128xf32>
    %cst_4 = arith.constant dense<0.000000e+00> : vector<12x128xf32>
    %3 = tpu.matmul %1, %2, %cst_4 {dimension_numbers = #tpu.dot_dimension_numbers<[1], [0], [0], [1], [0, 0, 1, 1], [], []>} : vector<12x256xf32>, vector<256x128xf32>, vector<12x128xf32> -> vector<12x128xf32>
    %cst_5 = arith.constant 1.562500e-02 : f32
    %4 = vector.broadcast %cst_5 : f32 to vector<12x128xf32>
    %5 = arith.mulf %3, %4 : vector<12x128xf32>
    %c0_6 = arith.constant 0 : index
    %c0_7 = arith.constant 0 : index
    %6 = vector.load %arg5[%c0_6, %c0_7] : memref<1x128xf32, #tpu.memory_space<vmem>>, vector<1x128xf32>
    %7 = vector.broadcast %6 : vector<1x128xf32> to vector<12x128xf32>
    %8 = arith.addf %5, %7 : vector<12x128xf32>
    %c0_8 = arith.constant 0 : index
    %c0_9 = arith.constant 0 : index
    %9 = vector.load %arg6[%c0_8, %c0_9] : memref<12x128xf32, #tpu.memory_space<vmem>>, vector<12x128xf32>
    tpu.vector_store %arg6[%c0_8, %c0_9], %8 {strides = array<i32>} : memref<12x128xf32, #tpu.memory_space<vmem>>, vector<12x128xf32>,
    return
  }
  func.func @transform_0(%arg0: i32, %arg1: i32, %arg2: i32) -> (i32, i32, i32) {
    %c0_i32 = arith.constant 0 : i32
    %c0_i32_0 = arith.constant 0 : i32
    return %arg0, %arg2, %c0_i32 : i32, i32, i32
  }
  func.func @transform_1(%arg0: i32, %arg1: i32, %arg2: i32) -> (i32, i32) {
    %c0_i32 = arith.constant 0 : i32
    return %arg2, %arg1 : i32, i32
  }
  func.func @transform_2(%arg0: i32, %arg1: i32, %arg2: i32) -> (i32, i32) {
    %c0_i32 = arith.constant 0 : i32
    %c0_i32_0 = arith.constant 0 : i32
    return %c0_i32, %arg1 : i32, i32
  }
  func.func @transform_3(%arg0: i32, %arg1: i32, %arg2: i32) -> (i32, i32) {
    %c0_i32 = arith.constant 0 : i32
    return %arg0, %arg1 : i32, i32
  }
}

</mosaic_0001>

<bundles_post_ra>
// kernel: tpu_custom_call.1
= control target key start
LH: loop header
LB: loop body
LE: loop exit
PB: predicated region body
PF: predicated region fallthrough
CT: control target
= control target key end

     0   :  { %vm399_vm0 = vcmask 523264   ;;  %s6797_s0 = inlined_call_operand.vmem [shape: f32[12,256,64], index: 0, kind: input, shape index: {}]   ;;  %s6798_s1 = inlined_call_operand.vmem [shape: f32[256,128], index: 1, kind: input, shape index: {}]   ;;  %s6799_s2 = inlined_call_operand.vmem [shape: f32[1,128], index: 2, kind: input, shape index: {}]   ;;  %s6800_s3 = inlined_call_operand.hbm [shape: f32[12,128], index: 3, kind: output, shape index: {}]  }
   0x1   :  { %v17_v0 = vld [vmem:[%s6797_s0 + $0x10] sm:$0xff]  ;;  %v15_v1 = vld [vmem:[%s6797_s0] sm:$0xff]  ;;  %v18_v2 = vld [vmem:[%s6797_s0 + $0x18] sm:$0xff] }
   0x2   :  { %v406_v3 = vsel %vm399_vm0, %v17_v0, 0.0  ;;  %v400_v4 = vsel %vm399_vm0, %v15_v1, 0.0  ;;  %v16_v5 = vld [vmem:[%s6797_s0 + $0x8] sm:$0xff]  ;;  %v409_v6 = vsel %vm399_vm0, %v18_v2, 0.0  ;;  %v19_v9 = vld [vmem:[%s6797_s0 + $0x20] sm:$0xff]  ;;  %v22_v12 = vld [vmem:[%s6797_s0 + $0x38] sm:$0xff] }
   0x3   :  { %407 = vadd.xlane.f32.xlu1 %v406_v3  ;;  %401 = vadd.xlane.f32.xlu0 %v400_v4  ;;  %v403_v7 = vsel %vm399_vm0, %v16_v5, 0.0  ;;  %v20_v8 = vld [vmem:[%s6797_s0 + $0x28] sm:$0xff]  ;;  %v412_v11 = vsel %vm399_vm0, %v19_v9, 0.0  ;;  %v21_v13 = vld [vmem:[%s6797_s0 + $0x30] sm:$0xff]  ;;  %v421_v14 = vsel %vm399_vm0, %v22_v12, 0.0  ;;  %v23_v17 = vld [vmem:[%s6797_s0 + $0x40] sm:$0xff] }
   0x4   :  { %v415_v10 = vsel %vm399_vm0, %v20_v8, 0.0  ;;  %v418_v15 = vsel %vm399_vm0, %v21_v13, 0.0  ;;  %v24_v16 = vld [vmem:[%s6797_s0 + $0x48] sm:$0xff]  ;;  %v424_v19 = vsel %vm399_vm0, %v23_v17, 0.0  ;;  %v26_v20 = vld [vmem:[%s6797_s0 + $0x58] sm:$0xff]  ;;  %v25_v21 = vld [vmem:[%s6797_s0 + $0x50] sm:$0xff] }
   0x5   :  { %v427_v18 = vsel %vm399_vm0, %v24_v16, 0.0  ;;  %v433_v22 = vsel %vm399_vm0, %v26_v20, 0.0  ;;  %v430_v23 = vsel %vm399_vm0, %v25_v21, 0.0  ;;  %v28_v24 = vld [vmem:[%s6797_s0 + $0x68] sm:$0xff]  ;;  %v27_v25 = vld [vmem:[%s6797_s0 + $0x60] sm:$0xff]  ;;  %v30_v28 = vld [vmem:[%s6797_s0 + $0x78] sm:$0xff] }
   0x6   :  { %v439_v26 = vsel %vm399_vm0, %v28_v24, 0.0  ;;  %v436_v27 = vsel %vm399_vm0, %v27_v25, 0.0  ;;  %v29_v29 = vld [vmem:[%s6797_s0 + $0x70] sm:$0xff]  ;;  %v445_v30 = vsel %vm399_vm0, %v30_v28, 0.0 }
   0x7   :  { %410 = vadd.xlane.f32.xlu1 %v409_v6  ;;  %404 = vadd.xlane.f32.xlu0 %v403_v7  ;;  %v442_v31 = vsel %vm399_vm0, %v29_v29, 0.0 }
   0xb   :  { %416 = vadd.xlane.f32.xlu1 %v415_v10  ;;  %413 = vadd.xlane.f32.xlu0 %v412_v11 }
   0xf   :  { %422 = vadd.xlane.f32.xlu1 %v421_v14  ;;  %419 = vadd.xlane.f32.xlu0 %v418_v15 }
  0x13   :  { %428 = vadd.xlane.f32.xlu1 %v427_v18  ;;  %425 = vadd.xlane.f32.xlu0 %v424_v19 }
  0x17   :  { %434 = vadd.xlane.f32.xlu1 %v433_v22  ;;  %431 = vadd.xlane.f32.xlu0 %v430_v23 }
  0x1b   :  { %440 = vadd.xlane.f32.xlu1 %v439_v26  ;;  %437 = vadd.xlane.f32.xlu0 %v436_v27 }
  0x1c   :  { %8 = vsyncpa [#allocation3], 0  ;;  %v32_v32 = vld [vmem:[%s6797_s0 + $0x88] sm:$0xff]  ;;  %v31_v33 = vld [vmem:[%s6797_s0 + $0x80] sm:$0xff]  ;;  %vm1979_vm1 = vcmask 130112   ;;  %vm1986_vm2 = vcmask 195712  }
  0x1d   :  { %v451_v34 = vsel %vm399_vm0, %v32_v32, 0.0  ;;  %v448_v35 = vsel %vm399_vm0, %v31_v33, 0.0  ;;  %v34_v36 = vld [vmem:[%s6797_s0 + $0x98] sm:$0xff]  ;;  %v33_v37 = vld [vmem:[%s6797_s0 + $0x90] sm:$0xff]  ;;  %v36_v40 = vld [vmem:[%s6797_s0 + $0xa8] sm:$0xff]  ;;  %vm1993_vm3 = vcmask 261312  }
  0x1e   :  { %v457_v38 = vsel %vm399_vm0, %v34_v36, 0.0  ;;  %v454_v39 = vsel %vm399_vm0, %v33_v37, 0.0  ;;  %v35_v41 = vld [vmem:[%s6797_s0 + $0xa0] sm:$0xff]  ;;  %v463_v42 = vsel %vm399_vm0, %v36_v40, 0.0  ;;  %v38_v44 = vld [vmem:[%s6797_s0 + $0xb8] sm:$0xff]  ;;  %v37_v45 = vld [vmem:[%s6797_s0 + $0xb0] sm:$0xff] }
  0x1f   :  { %446 = vadd.xlane.f32.xlu1 %v445_v30  ;;  %443 = vadd.xlane.f32.xlu0 %v442_v31  ;;  %v460_v43 = vsel %vm399_vm0, %v35_v41, 0.0  ;;  %v469_v46 = vsel %vm399_vm0, %v38_v44, 0.0  ;;  %v466_v47 = vsel %vm399_vm0, %v37_v45, 0.0  ;;  %v40_v48 = vld [vmem:[%s6797_s0 + $0xc8] sm:$0xff]  ;;  %v39_v49 = vld [vmem:[%s6797_s0 + $0xc0] sm:$0xff]  ;;  %v42_v52 = vld [vmem:[%s6797_s0 + $0xd8] sm:$0xff] }
  0x20   :  { %v475_v50 = vsel %vm399_vm0, %v40_v48, 0.0  ;;  %v472_v51 = vsel %vm399_vm0, %v39_v49, 0.0  ;;  %v41_v53 = vld [vmem:[%s6797_s0 + $0xd0] sm:$0xff]  ;;  %v481_v54 = vsel %vm399_vm0, %v42_v52, 0.0  ;;  %v44_v56 = vld [vmem:[%s6797_s0 + $0xe8] sm:$0xff]  ;;  %v43_v57 = vld [vmem:[%s6797_s0 + $0xe0] sm:$0xff] }
  0x21   :  { %v478_v55 = vsel %vm399_vm0, %v41_v53, 0.0  ;;  %v487_v58 = vsel %vm399_vm0, %v44_v56, 0.0  ;;  %v484_v59 = vsel %vm399_vm0, %v43_v57, 0.0  ;;  %v46_v60 = vld [vmem:[%s6797_s0 + $0xf8] sm:$0xff]  ;;  %v45_v61 = vld [vmem:[%s6797_s0 + $0xf0] sm:$0xff]  ;;  %v48_v0 = vld [vmem:[%s6797_s0 + $0x108] sm:$0xff] }
  0x22   :  { %v493_v62 = vsel %vm399_vm0, %v46_v60, 0.0  ;;  %v490_v63 = vsel %vm399_vm0, %v45_v61, 0.0  ;;  %v47_v1 = vld [vmem:[%s6797_s0 + $0x100] sm:$0xff]  ;;  %v499_v2 = vsel %vm399_vm0, %v48_v0, 0.0  ;;  %v50_v4 = vld [vmem:[%s6797_s0 + $0x118] sm:$0xff]  ;;  %v49_v5 = vld [vmem:[%s6797_s0 + $0x110] sm:$0xff] }
  0x23   :  { %452 = vadd.xlane.f32.xlu1 %v451_v34  ;;  %449 = vadd.xlane.f32.xlu0 %v448_v35  ;;  %v496_v3 = vsel %vm399_vm0, %v47_v1, 0.0  ;;  %v505_v6 = vsel %vm399_vm0, %v50_v4, 0.0  ;;  %v502_v7 = vsel %vm399_vm0, %v49_v5, 0.0  ;;  %v52_v8 = vld [vmem:[%s6797_s0 + $0x128] sm:$0xff]  ;;  %v51_v9 = vld [vmem:[%s6797_s0 + $0x120] sm:$0xff]  ;;  %v54_v12 = vld [vmem:[%s6797_s0 + $0x138] sm:$0xff] }
  0x24   :  { %v511_v10 = vsel %vm399_vm0, %v52_v8, 0.0  ;;  %v508_v11 = vsel %vm399_vm0, %v51_v9, 0.0  ;;  %v53_v13 = vld [vmem:[%s6797_s0 + $0x130] sm:$0xff]  ;;  %v517_v14 = vsel %vm399_vm0, %v54_v12, 0.0  ;;  %v56_v16 = vld [vmem:[%s6797_s0 + $0x148] sm:$0xff]  ;;  %v55_v17 = vld [vmem:[%s6797_s0 + $0x140] sm:$0xff] }
  0x25   :  { %v514_v15 = vsel %vm399_vm0, %v53_v13, 0.0  ;;  %v523_v18 = vsel %vm399_vm0, %v56_v16, 0.0  ;;  %v520_v19 = vsel %vm399_vm0, %v55_v17, 0.0  ;;  %v58_v20 = vld [vmem:[%s6797_s0 + $0x158] sm:$0xff]  ;;  %v57_v21 = vld [vmem:[%s6797_s0 + $0x150] sm:$0xff]  ;;  %v60_v24 = vld [vmem:[%s6797_s0 + $0x168] sm:$0xff] }
  0x26   :  { %v529_v22 = vsel %vm399_vm0, %v58_v20, 0.0  ;;  %v526_v23 = vsel %vm399_vm0, %v57_v21, 0.0  ;;  %v59_v25 = vld [vmem:[%s6797_s0 + $0x160] sm:$0xff]  ;;  %v535_v26 = vsel %vm399_vm0, %v60_v24, 0.0  ;;  %v62_v28 = vld [vmem:[%s6797_s0 + $0x178] sm:$0xff]  ;;  %v61_v29 = vld [vmem:[%s6797_s0 + $0x170] sm:$0xff] }
  0x27   :  { %458 = vadd.xlane.f32.xlu1 %v457_v38  ;;  %455 = vadd.xlane.f32.xlu0 %v454_v39  ;;  %v532_v27 = vsel %vm399_vm0, %v59_v25, 0.0  ;;  %v541_v30 = vsel %vm399_vm0, %v62_v28, 0.0  ;;  %v538_v31 = vsel %vm399_vm0, %v61_v29, 0.0  ;;  %v64_v32 = vld [vmem:[%s6797_s0 + $0x188] sm:$0xff]  ;;  %v63_v33 = vld [vmem:[%s6797_s0 + $0x180] sm:$0xff]  ;;  %v66_v36 = vld [vmem:[%s6797_s0 + $0x198] sm:$0xff] }
  0x28   :  { %v547_v34 = vsel %vm399_vm0, %v64_v32, 0.0  ;;  %v544_v35 = vsel %vm399_vm0, %v63_v33, 0.0  ;;  %v65_v37 = vld [vmem:[%s6797_s0 + $0x190] sm:$0xff]  ;;  %v553_v38 = vsel %vm399_vm0, %v66_v36, 0.0  ;;  %v68_v40 = vld [vmem:[%s6797_s0 + $0x1a8] sm:$0xff]  ;;  %v67_v41 = vld [vmem:[%s6797_s0 + $0x1a0] sm:$0xff] }
  0x29   :  { %v550_v39 = vsel %vm399_vm0, %v65_v37, 0.0  ;;  %v70_v44 = vld [vmem:[%s6797_s0 + $0x1b8] sm:$0xff]  ;;  %v69_v45 = vld [vmem:[%s6797_s0 + $0x1b0] sm:$0xff]  ;;  %v72_v48 = vld [vmem:[%s6797_s0 + $0x1c8] sm:$0xff]  ;;  %vm2000_vm4 = vcmask 326912   ;;  %vm2007_vm5 = vcmask 392512  }
  0x2a   :  { %v71_v49 = vld [vmem:[%s6797_s0 + $0x1c0] sm:$0xff]  ;;  %v74_v52 = vld [vmem:[%s6797_s0 + $0x1d8] sm:$0xff]  ;;  %v73_v53 = vld [vmem:[%s6797_s0 + $0x1d0] sm:$0xff]  ;;  %vm2014_vm6 = vcmask 458112   ;;  %vm2021_vm7 = vcmask 523712   ;;  %vm2028_vm8 = vcmask 589312  }
  0x2b   :  { %464 = vadd.xlane.f32.xlu1 %v463_v42  ;;  %461 = vadd.xlane.f32.xlu0 %v460_v43  ;;  %v559_v42 = vsel %vm399_vm0, %v68_v40, 0.0  ;;  %v556_v43 = vsel %vm399_vm0, %v67_v41, 0.0  ;;  %v76_v56 = vld [vmem:[%s6797_s0 + $0x1e8] sm:$0xff]  ;;  %v75_v57 = vld [vmem:[%s6797_s0 + $0x1e0] sm:$0xff]  ;;  %v78_v60 = vld [vmem:[%s6797_s0 + $0x1f8] sm:$0xff]  ;;  %vm2035_vm9 = vcmask 654912  }
  0x2c   :  { %v77_v61 = vld [vmem:[%s6797_s0 + $0x1f0] sm:$0xff]  ;;  %v80_v0 = vld [vmem:[%s6797_s0 + $0x208] sm:$0xff]  ;;  %v79_v1 = vld [vmem:[%s6797_s0 + $0x200] sm:$0xff]  ;;  %vm6802_vm10 = vcmask 720512   ;;  %vm2049_vm11 = vcmask 786112   ;;  %vm6801_vm12 = vcmask 851712  }
  0x2d   :  { %v82_v4 = vld [vmem:[%s6797_s0 + $0x218] sm:$0xff]  ;;  %v81_v5 = vld [vmem:[%s6797_s0 + $0x210] sm:$0xff]  ;;  %v84_v8 = vld [vmem:[%s6797_s0 + $0x228] sm:$0xff]  ;;  %vm2063_vm13 = vcmask 917312   ;;  %vm2070_vm14 = vcmask 982912   ;;  %vm2077_vm15 = vcmask 1048512  }
  0x2e   :  { %v83_v9 = vld [vmem:[%s6797_s0 + $0x220] sm:$0xff]  ;;  %v86_v13 = vld [vmem:[%s6797_s0 + $0x238] sm:$0xff]  ;;  %v92_v36 = vld [vmem:[%s6797_s0 + $0x268] sm:$0xff] }
  0x2f   :  { %470 = vadd.xlane.f32.xlu1 %v469_v46  ;;  %467 = vadd.xlane.f32.xlu0 %v466_v47  ;;  %v565_v46 = vsel %vm399_vm0, %v70_v44, 0.0  ;;  %v562_v47 = vsel %vm399_vm0, %v69_v45, 0.0  ;;  %v604_v12 = vsel %vm399_vm0, %v83_v9, 0.0  ;;  %v613_v16 = vsel %vm399_vm0, %v86_v13, 0.0  ;;  %v87_v20 = vld [vmem:[%s6797_s0 + $0x240] sm:$0xff] }
  0x30   :  { %v91_v41 = vld [vmem:[%s6797_s0 + $0x260] sm:$0xff] }
  0x31   :  { %v95_v9 = vld [vmem:[%s6797_s0 + $0x280] sm:$0xff] }
  0x33   :  { %476 = vadd.xlane.f32.xlu1 %v475_v50  ;;  %473 = vadd.xlane.f32.xlu0 %v472_v51  ;;  %v571_v50 = vsel %vm399_vm0, %v72_v48, 0.0  ;;  %v568_v51 = vsel %vm399_vm0, %v71_v49, 0.0  ;;  %v631_v49 = vsel %vm399_vm0, %v92_v36, 0.0 }
  0x37   :  { %482 = vadd.xlane.f32.xlu1 %v481_v54  ;;  %479 = vadd.xlane.f32.xlu0 %v478_v55  ;;  %v577_v54 = vsel %vm399_vm0, %v74_v52, 0.0  ;;  %v574_v55 = vsel %vm399_vm0, %v73_v53, 0.0  ;;  %v628_v52 = vsel %vm399_vm0, %v91_v41, 0.0 }
  0x3b   :  { %488 = vadd.xlane.f32.xlu1 %v487_v58  ;;  %485 = vadd.xlane.f32.xlu0 %v484_v59  ;;  %v583_v58 = vsel %vm399_vm0, %v76_v56, 0.0  ;;  %v580_v59 = vsel %vm399_vm0, %v75_v57, 0.0 }
  0x3f   :  { %494 = vadd.xlane.f32.xlu1 %v493_v62  ;;  %491 = vadd.xlane.f32.xlu0 %v490_v63  ;;  %v589_v62 = vsel %vm399_vm0, %v78_v60, 0.0  ;;  %v586_v63 = vsel %vm399_vm0, %v77_v61, 0.0 }
  0x43   :  { %500 = vadd.xlane.f32.xlu1 %v499_v2  ;;  %497 = vadd.xlane.f32.xlu0 %v496_v3  ;;  %v595_v2 = vsel %vm399_vm0, %v80_v0, 0.0  ;;  %v592_v3 = vsel %vm399_vm0, %v79_v1, 0.0 }
  0x47   :  { %506 = vadd.xlane.f32.xlu1 %v505_v6  ;;  %503 = vadd.xlane.f32.xlu0 %v502_v7  ;;  %v601_v6 = vsel %vm399_vm0, %v82_v4, 0.0  ;;  %v598_v7 = vsel %vm399_vm0, %v81_v5, 0.0 }
  0x4b   :  { %512 = vadd.xlane.f32.xlu1 %v511_v10  ;;  %509 = vadd.xlane.f32.xlu0 %v508_v11  ;;  %v1968_v10 = vlaneseq  ;;  %v607_v11 = vsel %vm399_vm0, %v84_v8, 0.0  ;;  %v96_v8 = vld [vmem:[%s6797_s0 + $0x288] sm:$0xff] }
  0x4f   :  { %518 = vadd.xlane.f32.xlu1 %v517_v14  ;;  %515 = vadd.xlane.f32.xlu0 %v514_v15  ;;  %v85_v14 = vld [vmem:[%s6797_s0 + $0x230] sm:$0xff]  ;;  %v4454_v15 = vand.u32 127, %v1968_v10 }
  0x50   :  { %v610_v17 = vsel %vm399_vm0, %v85_v14, 0.0 }
  0x51   :  { %v1974_v21 = vadd.s32 4294967288, %v4454_v15  ;;  %v2002_v32 = vadd.s32 4294967256, %v4454_v15  ;;  %v1995_v33 = vadd.s32 4294967264, %v4454_v15  ;;  %v2030_v60 = vadd.s32 4294967224, %v4454_v15 }
  0x52   :  { %v2023_v0 = vadd.s32 4294967232, %v4454_v15  ;;  %v2037_v14 = vadd.s32 4294967216, %v4454_v15 }
  0x53   :  { %524 = vadd.xlane.f32.xlu1 %v523_v18  ;;  %521 = vadd.xlane.f32.xlu0 %v520_v19  ;;  %v4458_v18 = vshrl.u32 %v1968_v10, 7  ;;  %v88_v19 = vld [vmem:[%s6797_s0 + $0x248] sm:$0xff]  ;;  %v2044_v10 = vadd.s32 4294967208, %v4454_v15 }
  0x55   :  { %v4473_v28 = vsub.s32 %v4454_v15, %v4458_v18  ;;  %v4476_v29 = vsub.s32 %v1974_v21, %v4458_v18  ;;  %v4550_v13 = vsub.s32 %v2023_v0, %v4458_v18 }
  0x57   :  { %530 = vadd.xlane.f32.xlu1 %v529_v22  ;;  %527 = vadd.xlane.f32.xlu0 %v526_v23  ;;  %v1981_v22 = vadd.s32 4294967280, %v4454_v15  ;;  %v1988_v23 = vadd.s32 4294967272, %v4454_v15 }
  0x5b   :  { %536 = vadd.xlane.f32.xlu1 %v535_v26  ;;  %533 = vadd.xlane.f32.xlu0 %v532_v27  ;;  %v619_v26 = vsel %vm399_vm0, %v88_v19, 0.0  ;;  %v616_v27 = vsel %vm399_vm0, %v87_v20, 0.0  ;;  %v640_v19 = vsel %vm399_vm0, %v95_v9, 0.0  ;;  %v103_v9 = vld [vmem:[%s6797_s0 + $0x2c0] sm:$0xff] }
  0x5f   :  { %542 = vadd.xlane.f32.xlu1 %v541_v30  ;;  %539 = vadd.xlane.f32.xlu0 %v538_v31  ;;  %v90_v30 = vld [vmem:[%s6797_s0 + $0x258] sm:$0xff]  ;;  %v89_v31 = vld [vmem:[%s6797_s0 + $0x250] sm:$0xff] }
  0x60   :  { %v622_v40 = vsel %vm399_vm0, %v89_v31, 0.0  ;;  %v4570_v31 = vsub.s32 %v2037_v14, %v4458_v18 }
  0x63   :  { %548 = vadd.xlane.f32.xlu1 %v547_v34  ;;  %545 = vadd.xlane.f32.xlu0 %v544_v35  ;;  %v4487_v34 = vsub.s32 %v1981_v22, %v4458_v18  ;;  %v4490_v35 = vsub.s32 %v1988_v23, %v4458_v18  ;;  %v4558_v23 = vsub.s32 %v2044_v10, %v4458_v18 }
  0x67   :  { %554 = vadd.xlane.f32.xlu1 %v553_v38  ;;  %551 = vadd.xlane.f32.xlu0 %v550_v39  ;;  %v625_v39 = vsel %vm399_vm0, %v90_v30, 0.0 }
  0x6b   :  { %560 = vadd.xlane.f32.xlu1 %v559_v42  ;;  %557 = vadd.xlane.f32.xlu0 %v556_v43  ;;  %v2016_v42 = vadd.s32 4294967240, %v4454_v15  ;;  %v2009_v43 = vadd.s32 4294967248, %v4454_v15 }
  0x6d   :  { %v4517_v56 = vsub.s32 %v2016_v42, %v4458_v18  ;;  %v4520_v57 = vsub.s32 %v2009_v43, %v4458_v18  ;;  %v2072_v42 = vadd.s32 4294967176, %v4454_v15 }
  0x6f   :  { %566 = vadd.xlane.f32.xlu1 %v565_v46  ;;  %563 = vadd.xlane.f32.xlu0 %v562_v47  ;;  %v4505_v46 = vsub.s32 %v2002_v32, %v4458_v18  ;;  %v4508_v47 = vsub.s32 %v1995_v33, %v4458_v18  ;;  %v2051_v32 = vadd.s32 4294967200, %v4454_v15 }
  0x73   :  { %572 = vadd.xlane.f32.xlu1 %v571_v50  ;;  %569 = vadd.xlane.f32.xlu0 %v568_v51 }
  0x77   :  { %578 = vadd.xlane.f32.xlu1 %v577_v54  ;;  %575 = vadd.xlane.f32.xlu0 %v574_v55 }
  0x7b   :  { %584 = vadd.xlane.f32.xlu1 %v583_v58  ;;  %581 = vadd.xlane.f32.xlu0 %v580_v59  ;;  %v94_v58 = vld [vmem:[%s6797_s0 + $0x278] sm:$0xff]  ;;  %v93_v59 = vld [vmem:[%s6797_s0 + $0x270] sm:$0xff] }
  0x7f   :  { %590 = vadd.xlane.f32.xlu1 %v589_v62  ;;  %587 = vadd.xlane.f32.xlu0 %v586_v63 }
  0x83   :  { %596 = vadd.xlane.f32.xlu1 %v595_v2  ;;  %593 = vadd.xlane.f32.xlu0 %v592_v3  ;;  %v637_v2 = vsel %vm399_vm0, %v94_v58, 0.0  ;;  %v634_v3 = vsel %vm399_vm0, %v93_v59, 0.0  ;;  %v4598_v59 = vsub.s32 %v2072_v42, %v4458_v18 }
  0x87   :  { %602 = vadd.xlane.f32.xlu1 %v601_v6  ;;  %599 = vadd.xlane.f32.xlu0 %v598_v7  ;;  %v4538_v7 = vsub.s32 %v2030_v60, %v4458_v18 }
  0x8b   :  { %608 = vadd.xlane.f32.xlu1 %v607_v11  ;;  %605 = vadd.xlane.f32.xlu0 %v604_v12 }
  0x8f   :  { %614 = vadd.xlane.f32.xlu1 %v613_v16  ;;  %611 = vadd.xlane.f32.xlu0 %v610_v17  ;;  %v643_v17 = vsel %vm399_vm0, %v96_v8, 0.0  ;;  %v104_v8 = vld [vmem:[%s6797_s0 + $0x2c8] sm:$0xff] }
  0x90   :  { %v408_v24 = vpop.xlane.xlu1 %407  ;;  %v402_v25 = vpop.xlane.xlu0 %401 }
  0x91   :  { %v1973_v44 = vrot.slane %v402_v25, %v4473_v28  ;;  %v1985_v48 = vrot.slane %v408_v24, %v4487_v34  ;;  %v98_v24 = vld [vmem:[%s6797_s0 + $0x298] sm:$0xff]  ;;  %v97_v25 = vld [vmem:[%s6797_s0 + $0x290] sm:$0xff] }
  0x92   :  { %v649_v36 = vsel %vm399_vm0, %v98_v24, 0.0 }
  0x93   :  { %620 = vadd.xlane.f32.xlu1 %v619_v26  ;;  %617 = vadd.xlane.f32.xlu0 %v616_v27  ;;  %v2058_v26 = vadd.s32 4294967192, %v4454_v15 }
  0x94   :  { %v411_v37 = vpop.xlane.xlu1 %410  ;;  %v405_v38 = vpop.xlane.xlu0 %404 }
  0x95   :  { %v1978_v45 = vrot.slane %v405_v38, %v4476_v29  ;;  %v1992_v50 = vrot.slane %v411_v37, %v4490_v35  ;;  %v646_v37 = vsel %vm399_vm0, %v97_v25, 0.0  ;;  %v4578_v41 = vsub.s32 %v2058_v26, %v4458_v18 }
  0x97   :  { %v1980_v51 = vsel %vm1979_vm1, %v1978_v45, %v1973_v44  ;;  %626 = vadd.xlane.f32.xlu1 %v625_v39  ;;  %623 = vadd.xlane.f32.xlu0 %v622_v40  ;;  %v4584_v45 = vsub.s32 %v2051_v32, %v4458_v18 }
  0x98   :  { %v1987_v53 = vsel %vm1986_vm2, %v1985_v48, %v1980_v51  ;;  %v417_v54 = vpop.xlane.xlu1 %416  ;;  %v414_v55 = vpop.xlane.xlu0 %413  ;;  %v100_v48 = vld [vmem:[%s6797_s0 + $0x2a8] sm:$0xff] }
  0x99   :  { %v2006_v61 = vrot.slane %v417_v54, %v4505_v46  ;;  %v1994_v62 = vsel %vm1993_vm3, %v1992_v50, %v1987_v53  ;;  %v1999_v63 = vrot.slane %v414_v55, %v4508_v47  ;;  %v2065_v50 = vadd.s32 4294967184, %v4454_v15 }
  0x9a   :  { %v655_v55 = vsel %vm399_vm0, %v100_v48, 0.0 }
  0x9b   :  { %v2001_v1 = vsel %vm2000_vm4, %v1999_v63, %v1994_v62  ;;  %632 = vadd.xlane.f32.xlu1 %v631_v49  ;;  %629 = vadd.xlane.f32.xlu0 %v628_v52  ;;  %v99_v49 = vld [vmem:[%s6797_s0 + $0x2a0] sm:$0xff]  ;;  %v102_v62 = vld [vmem:[%s6797_s0 + $0x2b8] sm:$0xff]  ;;  %v101_v63 = vld [vmem:[%s6797_s0 + $0x2b0] sm:$0xff] }
  0x9c   :  { %v423_v4 = vpop.xlane.xlu1 %422  ;;  %v2008_v5 = vsel %vm2007_vm5, %v2006_v61, %v2001_v1  ;;  %v420_v6 = vpop.xlane.xlu0 %419  ;;  %v652_v58 = vsel %vm399_vm0, %v99_v49, 0.0  ;;  %v4603_v61 = vsub.s32 %v2065_v50, %v4458_v18  ;;  %v661_v18 = vsel %vm399_vm0, %v102_v62, 0.0  ;;  %v110_v50 = vld [vmem:[%s6797_s0 + $0x2f8] sm:$0xff] }
  0x9d   :  { %v2020_v11 = vrot.slane %v423_v4, %v4517_v56  ;;  %v2013_v12 = vrot.slane %v420_v6, %v4520_v57  ;;  %v658_v4 = vsel %vm399_vm0, %v101_v63, 0.0  ;;  %v112_v63 = vld [vmem:[%s6797_s0 + $0x308] sm:$0xff] }
  0x9f   :  { %v2015_v16 = vsel %vm2014_vm6, %v2013_v12, %v2008_v5  ;;  %638 = vadd.xlane.f32.xlu1 %v637_v2  ;;  %635 = vadd.xlane.f32.xlu0 %v634_v3 }
  0xa0   :  { %v429_v20 = vpop.xlane.xlu1 %428  ;;  %v2022_v21 = vsel %vm2021_vm7, %v2020_v11, %v2015_v16  ;;  %v426_v22 = vpop.xlane.xlu0 %425  ;;  %v667_v16 = vsel %vm399_vm0, %v104_v8, 0.0 }
  0xa1   :  { %v2034_v27 = vrot.slane %v429_v20, %v4538_v7  ;;  %v2027_v30 = vrot.slane %v426_v22, %v4550_v13  ;;  %v105_v22 = vld [vmem:[%s6797_s0 + $0x2d0] sm:$0xff] }
  0xa3   :  { %v2029_v33 = vsel %vm2028_vm8, %v2027_v30, %v2022_v21  ;;  %644 = vadd.xlane.f32.xlu1 %v643_v17  ;;  %641 = vadd.xlane.f32.xlu0 %v640_v19  ;;  %v664_v17 = vsel %vm399_vm0, %v103_v9, 0.0  ;;  %v106_v21 = vld [vmem:[%s6797_s0 + $0x2d8] sm:$0xff]  ;;  %v670_v30 = vsel %vm399_vm0, %v105_v22, 0.0 }
  0xa4   :  { %v435_v38 = vpop.xlane.xlu1 %434  ;;  %v2036_v39 = vsel %vm2035_vm9, %v2034_v27, %v2029_v33  ;;  %v432_v40 = vpop.xlane.xlu0 %431  ;;  %v673_v27 = vsel %vm399_vm0, %v106_v21, 0.0  ;;  %v114_v9 = vld [vmem:[%s6797_s0 + $0x318] sm:$0xff] }
  0xa5   :  { %v2048_v43 = vrot.slane %v435_v38, %v4558_v23  ;;  %v2041_v44 = vrot.slane %v432_v40, %v4570_v31 }
  0xa7   :  { %v2043_v51 = vsel %vm6802_vm10, %v2041_v44, %v2036_v39  ;;  %650 = vadd.xlane.f32.xlu1 %v649_v36  ;;  %647 = vadd.xlane.f32.xlu0 %v646_v37  ;;  %v108_v36 = vld [vmem:[%s6797_s0 + $0x2e8] sm:$0xff]  ;;  %v107_v37 = vld [vmem:[%s6797_s0 + $0x2e0] sm:$0xff] }
  0xa8   :  { %v441_v52 = vpop.xlane.xlu1 %440  ;;  %v2050_v53 = vsel %vm2049_vm11, %v2048_v43, %v2043_v51  ;;  %v438_v54 = vpop.xlane.xlu0 %437  ;;  %v679_v43 = vsel %vm399_vm0, %v108_v36, 0.0  ;;  %v676_v44 = vsel %vm399_vm0, %v107_v37, 0.0  ;;  %v109_v51 = vld [vmem:[%s6797_s0 + $0x2f0] sm:$0xff] }
  0xa9   :  { %v2062_v60 = vrot.slane %v441_v52, %v4578_v41  ;;  %v2055_v15 = vrot.slane %v438_v54, %v4584_v45 }
  0xab   :  { %v2057_v0 = vsel %vm6801_vm12, %v2055_v15, %v2050_v53  ;;  %656 = vadd.xlane.f32.xlu1 %v655_v55  ;;  %653 = vadd.xlane.f32.xlu0 %v652_v58  ;;  %v685_v58 = vsel %vm399_vm0, %v110_v50, 0.0 }
  0xac   :  { %v447_v1 = vpop.xlane.xlu1 %446  ;;  %v2064_v2 = vsel %vm2063_vm13, %v2062_v60, %v2057_v0  ;;  %v444_v3 = vpop.xlane.xlu0 %443  ;;  %v682_v60 = vsel %vm399_vm0, %v109_v51, 0.0  ;;  %v111_v0 = vld [vmem:[%s6797_s0 + $0x300] sm:$0xff] }
  0xad   :  { %v2076_v5 = vrot.slane %v447_v1, %v4598_v59  ;;  %v2069_v6 = vrot.slane %v444_v3, %v4603_v61 }
  0xaf   :  { %v2071_v10 = vsel %vm2070_vm14, %v2069_v6, %v2064_v2  ;;  %662 = vadd.xlane.f32.xlu1 %v661_v18  ;;  %659 = vadd.xlane.f32.xlu0 %v658_v4  ;;  %v691_v4 = vsel %vm399_vm0, %v112_v63, 0.0 }
  0xb0   :  { %v4625_v11 = vsel %vm2077_vm15, %v2076_v5, %v2071_v10  ;;  %v453_v12 = vpop.xlane.xlu1 %452  ;;  %v450_v14 = vpop.xlane.xlu0 %449  ;;  %v688_v5 = vsel %vm399_vm0, %v111_v0, 0.0  ;;  %v113_v10 = vld [vmem:[%s6797_s0 + $0x310] sm:$0xff] }
  0xb1   :  { %v2086_v19 = vrot.slane %v453_v12, %v4476_v29  ;;  %v2082_v20 = vrot.slane %v450_v14, %v4473_v28 }
  0xb3   :  { %v2087_v24 = vsel %vm1979_vm1, %v2086_v19, %v2082_v20  ;;  %668 = vadd.xlane.f32.xlu1 %v667_v16  ;;  %665 = vadd.xlane.f32.xlu0 %v664_v17  ;;  %v697_v19 = vsel %vm399_vm0, %v114_v9, 0.0  ;;  %v694_v20 = vsel %vm399_vm0, %v113_v10, 0.0 }
  0xb4   :  { %v459_v25 = vpop.xlane.xlu1 %458  ;;  %v456_v26 = vpop.xlane.xlu0 %455 }
  0xb5   :  { %v2096_v32 = vrot.slane %v459_v25, %v4490_v35  ;;  %v2091_v33 = vrot.slane %v456_v26, %v4487_v34  ;;  %v115_v25 = vld [vmem:[%s6797_s0 + $0x320] sm:$0xff] }
  0xb6   :  { %v700_v36 = vsel %vm399_vm0, %v115_v25, 0.0 }
  0xb7   :  { %v2092_v38 = vsel %vm1986_vm2, %v2091_v33, %v2087_v24  ;;  %674 = vadd.xlane.f32.xlu1 %v673_v27  ;;  %671 = vadd.xlane.f32.xlu0 %v670_v30  ;;  %v116_v24 = vld [vmem:[%s6797_s0 + $0x328] sm:$0xff] }
  0xb8   :  { %v465_v39 = vpop.xlane.xlu1 %464  ;;  %v2097_v40 = vsel %vm1993_vm3, %v2096_v32, %v2092_v38  ;;  %v462_v42 = vpop.xlane.xlu0 %461  ;;  %v703_v33 = vsel %vm399_vm0, %v116_v24, 0.0 }
  0xb9   :  { %v2106_v48 = vrot.slane %v465_v39, %v4505_v46  ;;  %v2101_v49 = vrot.slane %v462_v42, %v4508_v47  ;;  %v118_v39 = vld [vmem:[%s6797_s0 + $0x338] sm:$0xff] }
  0xbb   :  { %v2102_v52 = vsel %vm2000_vm4, %v2101_v49, %v2097_v40  ;;  %680 = vadd.xlane.f32.xlu1 %v679_v43  ;;  %677 = vadd.xlane.f32.xlu0 %v676_v44  ;;  %v117_v40 = vld [vmem:[%s6797_s0 + $0x330] sm:$0xff]  ;;  %v709_v49 = vsel %vm399_vm0, %v118_v39, 0.0 }
  0xbc   :  { %v471_v53 = vpop.xlane.xlu1 %470  ;;  %v2107_v54 = vsel %vm2007_vm5, %v2106_v48, %v2102_v52  ;;  %v468_v55 = vpop.xlane.xlu0 %467  ;;  %v706_v50 = vsel %vm399_vm0, %v117_v40, 0.0 }
  0xbd   :  { %v2116_v15 = vrot.slane %v471_v53, %v4517_v56  ;;  %v2111_v62 = vrot.slane %v468_v55, %v4520_v57  ;;  %v120_v53 = vld [vmem:[%s6797_s0 + $0x348] sm:$0xff] }
  0xbf   :  { %v2112_v1 = vsel %vm2014_vm6, %v2111_v62, %v2107_v54  ;;  %686 = vadd.xlane.f32.xlu1 %v685_v58  ;;  %683 = vadd.xlane.f32.xlu0 %v682_v60  ;;  %v119_v54 = vld [vmem:[%s6797_s0 + $0x340] sm:$0xff]  ;;  %v715_v62 = vsel %vm399_vm0, %v120_v53, 0.0 }
  0xc0   :  { %v477_v2 = vpop.xlane.xlu1 %476  ;;  %v2117_v3 = vsel %vm2021_vm7, %v2116_v15, %v2112_v1  ;;  %v474_v18 = vpop.xlane.xlu0 %473  ;;  %v712_v63 = vsel %vm399_vm0, %v119_v54, 0.0 }
  0xc1   :  { %v2126_v6 = vrot.slane %v477_v2, %v4538_v7  ;;  %v2121_v8 = vrot.slane %v474_v18, %v4550_v13  ;;  %v122_v2 = vld [vmem:[%s6797_s0 + $0x358] sm:$0xff] }
  0xc3   :  { %v2122_v12 = vsel %vm2028_vm8, %v2121_v8, %v2117_v3  ;;  %692 = vadd.xlane.f32.xlu1 %v691_v4  ;;  %689 = vadd.xlane.f32.xlu0 %v688_v5  ;;  %v121_v3 = vld [vmem:[%s6797_s0 + $0x350] sm:$0xff] }
  0xc4   :  { %v483_v14 = vpop.xlane.xlu1 %482  ;;  %v2127_v16 = vsel %vm2035_vm9, %v2126_v6, %v2122_v12  ;;  %v480_v17 = vpop.xlane.xlu0 %479  ;;  %v721_v6 = vsel %vm399_vm0, %v122_v2, 0.0  ;;  %v718_v8 = vsel %vm399_vm0, %v121_v3, 0.0  ;;  %v124_v12 = vld [vmem:[%s6797_s0 + $0x368] sm:$0xff] }
  0xc5   :  { %v2136_v21 = vrot.slane %v483_v14, %v4558_v23  ;;  %v2131_v22 = vrot.slane %v480_v17, %v4570_v31  ;;  %v123_v14 = vld [vmem:[%s6797_s0 + $0x360] sm:$0xff] }
  0xc7   :  { %v2132_v26 = vsel %vm6802_vm10, %v2131_v22, %v2127_v16  ;;  %698 = vadd.xlane.f32.xlu1 %v697_v19  ;;  %695 = vadd.xlane.f32.xlu0 %v694_v20  ;;  %v724_v22 = vsel %vm399_vm0, %v123_v14, 0.0 }
  0xc8   :  { %v489_v27 = vpop.xlane.xlu1 %488  ;;  %v2137_v30 = vsel %vm2049_vm11, %v2136_v21, %v2132_v26  ;;  %v486_v32 = vpop.xlane.xlu0 %485  ;;  %v727_v21 = vsel %vm399_vm0, %v124_v12, 0.0  ;;  %v126_v26 = vld [vmem:[%s6797_s0 + $0x378] sm:$0xff] }
  0xc9   :  { %v2146_v37 = vrot.slane %v489_v27, %v4578_v41  ;;  %v2141_v38 = vrot.slane %v486_v32, %v4584_v45  ;;  %v125_v27 = vld [vmem:[%s6797_s0 + $0x370] sm:$0xff] }
  0xcb   :  { %v2142_v42 = vsel %vm6801_vm12, %v2141_v38, %v2137_v30  ;;  %704 = vadd.xlane.f32.xlu1 %v703_v33  ;;  %701 = vadd.xlane.f32.xlu0 %v700_v36  ;;  %v730_v38 = vsel %vm399_vm0, %v125_v27, 0.0 }
  0xcc   :  { %v495_v43 = vpop.xlane.xlu1 %494  ;;  %v2147_v44 = vsel %vm2063_vm13, %v2146_v37, %v2142_v42  ;;  %v492_v48 = vpop.xlane.xlu0 %491  ;;  %v733_v37 = vsel %vm399_vm0, %v126_v26, 0.0  ;;  %v128_v42 = vld [vmem:[%s6797_s0 + $0x388] sm:$0xff] }
  0xcd   :  { %v2156_v51 = vrot.slane %v495_v43, %v4598_v59  ;;  %v2151_v52 = vrot.slane %v492_v48, %v4603_v61  ;;  %v127_v43 = vld [vmem:[%s6797_s0 + $0x380] sm:$0xff] }
  0xcf   :  { %v2152_v55 = vsel %vm2070_vm14, %v2151_v52, %v2147_v44  ;;  %710 = vadd.xlane.f32.xlu1 %v709_v49  ;;  %707 = vadd.xlane.f32.xlu0 %v706_v50  ;;  %v736_v52 = vsel %vm399_vm0, %v127_v43, 0.0 }
  0xd0   :  { %v4722_v58 = vsel %vm2077_vm15, %v2156_v51, %v2152_v55  ;;  %v501_v60 = vpop.xlane.xlu1 %500  ;;  %v498_v15 = vpop.xlane.xlu0 %497  ;;  %v739_v51 = vsel %vm399_vm0, %v128_v42, 0.0  ;;  %v130_v55 = vld [vmem:[%s6797_s0 + $0x398] sm:$0xff] }
  0xd1   :  { %v2165_v0 = vrot.slane %v501_v60, %v4476_v29  ;;  %v2161_v1 = vrot.slane %v498_v15, %v4473_v28  ;;  %v129_v60 = vld [vmem:[%s6797_s0 + $0x390] sm:$0xff] }
  0xd2   :  { %v742_v2 = vsel %vm399_vm0, %v129_v60, 0.0 }
  0xd3   :  { %v2166_v18 = vsel %vm1979_vm1, %v2165_v0, %v2161_v1  ;;  %716 = vadd.xlane.f32.xlu1 %v715_v62  ;;  %713 = vadd.xlane.f32.xlu0 %v712_v63  ;;  %v745_v1 = vsel %vm399_vm0, %v130_v55, 0.0 }
  0xd4   :  { %v507_v4 = vpop.xlane.xlu1 %506  ;;  %v504_v5 = vpop.xlane.xlu0 %503 }
  0xd5   :  { %v2175_v9 = vrot.slane %v507_v4, %v4490_v35  ;;  %v2170_v10 = vrot.slane %v504_v5, %v4487_v34  ;;  %v132_v4 = vld [vmem:[%s6797_s0 + $0x3a8] sm:$0xff]  ;;  %v131_v5 = vld [vmem:[%s6797_s0 + $0x3a0] sm:$0xff] }
  0xd6   :  { %v751_v12 = vsel %vm399_vm0, %v132_v4, 0.0  ;;  %v748_v14 = vsel %vm399_vm0, %v131_v5, 0.0 }
  0xd7   :  { %v2171_v16 = vsel %vm1986_vm2, %v2170_v10, %v2166_v18  ;;  %722 = vadd.xlane.f32.xlu1 %v721_v6  ;;  %719 = vadd.xlane.f32.xlu0 %v718_v8 }
  0xd8   :  { %v513_v17 = vpop.xlane.xlu1 %512  ;;  %v2176_v19 = vsel %vm1993_vm3, %v2175_v9, %v2171_v16  ;;  %v510_v20 = vpop.xlane.xlu0 %509 }
  0xd9   :  { %v2185_v24 = vrot.slane %v513_v17, %v4505_v46  ;;  %v2180_v25 = vrot.slane %v510_v20, %v4508_v47  ;;  %v133_v20 = vld [vmem:[%s6797_s0 + $0x3b0] sm:$0xff] }
  0xda   :  { %v754_v27 = vsel %vm399_vm0, %v133_v20, 0.0 }
  0xdb   :  { %v2181_v30 = vsel %vm2000_vm4, %v2180_v25, %v2176_v19  ;;  %728 = vadd.xlane.f32.xlu1 %v727_v21  ;;  %725 = vadd.xlane.f32.xlu0 %v724_v22  ;;  %v134_v19 = vld [vmem:[%s6797_s0 + $0x3b8] sm:$0xff] }
  0xdc   :  { %v519_v32 = vpop.xlane.xlu1 %518  ;;  %v2186_v33 = vsel %vm2007_vm5, %v2185_v24, %v2181_v30  ;;  %v516_v36 = vpop.xlane.xlu0 %515  ;;  %v757_v26 = vsel %vm399_vm0, %v134_v19, 0.0 }
  0xdd   :  { %v2195_v39 = vrot.slane %v519_v32, %v4517_v56  ;;  %v2190_v40 = vrot.slane %v516_v36, %v4520_v57  ;;  %v135_v36 = vld [vmem:[%s6797_s0 + $0x3c0] sm:$0xff] }
  0xde   :  { %v760_v43 = vsel %vm399_vm0, %v135_v36, 0.0 }
  0xdf   :  { %v2191_v44 = vsel %vm2014_vm6, %v2190_v40, %v2186_v33  ;;  %734 = vadd.xlane.f32.xlu1 %v733_v37  ;;  %731 = vadd.xlane.f32.xlu0 %v730_v38  ;;  %v136_v33 = vld [vmem:[%s6797_s0 + $0x3c8] sm:$0xff] }
  0xe0   :  { %v525_v48 = vpop.xlane.xlu1 %524  ;;  %v2196_v49 = vsel %vm2021_vm7, %v2195_v39, %v2191_v44  ;;  %v522_v50 = vpop.xlane.xlu0 %521  ;;  %v763_v42 = vsel %vm399_vm0, %v136_v33, 0.0 }
  0xe1   :  { %v2205_v53 = vrot.slane %v525_v48, %v4538_v7  ;;  %v2200_v54 = vrot.slane %v522_v50, %v4550_v13  ;;  %v138_v50 = vld [vmem:[%s6797_s0 + $0x3d8] sm:$0xff] }
  0xe3   :  { %v2201_v15 = vsel %vm2028_vm8, %v2200_v54, %v2196_v49  ;;  %740 = vadd.xlane.f32.xlu1 %v739_v51  ;;  %737 = vadd.xlane.f32.xlu0 %v736_v52  ;;  %v137_v51 = vld [vmem:[%s6797_s0 + $0x3d0] sm:$0xff] }
  0xe4   :  { %v531_v62 = vpop.xlane.xlu1 %530  ;;  %v2206_v63 = vsel %vm2035_vm9, %v2205_v53, %v2201_v15  ;;  %v528_v0 = vpop.xlane.xlu0 %527  ;;  %v766_v55 = vsel %vm399_vm0, %v137_v51, 0.0 }
  0xe5   :  { %v2215_v3 = vrot.slane %v531_v62, %v4558_v23  ;;  %v2210_v18 = vrot.slane %v528_v0, %v4570_v31  ;;  %v140_v62 = vld [vmem:[%s6797_s0 + $0x3e8] sm:$0xff] }
  0xe7   :  { %v2211_v6 = vsel %vm6802_vm10, %v2210_v18, %v2206_v63  ;;  %746 = vadd.xlane.f32.xlu1 %v745_v1  ;;  %743 = vadd.xlane.f32.xlu0 %v742_v2  ;;  %v139_v63 = vld [vmem:[%s6797_s0 + $0x3e0] sm:$0xff]  ;;  %v775_v18 = vsel %vm399_vm0, %v140_v62, 0.0 }
  0xe8   :  { %v537_v8 = vpop.xlane.xlu1 %536  ;;  %v2216_v9 = vsel %vm2049_vm11, %v2215_v3, %v2211_v6  ;;  %v534_v10 = vpop.xlane.xlu0 %533  ;;  %v772_v4 = vsel %vm399_vm0, %v139_v63, 0.0 }
  0xe9   :  { %v2225_v16 = vrot.slane %v537_v8, %v4578_v41  ;;  %v2220_v17 = vrot.slane %v534_v10, %v4584_v45  ;;  %v142_v8 = vld [vmem:[%s6797_s0 + $0x3f8] sm:$0xff] }
  0xeb   :  { %v2221_v21 = vsel %vm6801_vm12, %v2220_v17, %v2216_v9  ;;  %752 = vadd.xlane.f32.xlu1 %v751_v12  ;;  %749 = vadd.xlane.f32.xlu0 %v748_v14  ;;  %vm6803_vm12 = vcmask 1041409   ;;  %v141_v9 = vld [vmem:[%s6797_s0 + $0x3f0] sm:$0xff]  ;;  %v781_v17 = vsel %vm399_vm0, %v142_v8, 0.0 }
  0xec   :  { %v543_v22 = vpop.xlane.xlu1 %542  ;;  %v2226_v24 = vsel %vm2063_vm13, %v2225_v16, %v2221_v21  ;;  %v540_v25 = vpop.xlane.xlu0 %539  ;;  %v778_v19 = vsel %vm399_vm0, %v141_v9, 0.0 }
  0xed   :  { %v2235_v30 = vrot.slane %v543_v22, %v4598_v59  ;;  %v2230_v32 = vrot.slane %v540_v25, %v4603_v61  ;;  %v144_v22 = vld [vmem:[%s6797_s0 + $0x408] sm:$0xff] }
  0xef   :  { %v2231_v37 = vsel %vm2070_vm14, %v2230_v32, %v2226_v24  ;;  %758 = vadd.xlane.f32.xlu1 %v757_v26  ;;  %755 = vadd.xlane.f32.xlu0 %v754_v27  ;;  %v143_v24 = vld [vmem:[%s6797_s0 + $0x400] sm:$0xff]  ;;  %v787_v32 = vsel %vm399_vm0, %v144_v22, 0.0 }
  0xf0   :  { %v2236_v38 = vsel %vm2077_vm15, %v2235_v30, %v2231_v37  ;;  %v549_v39 = vpop.xlane.xlu1 %548  ;;  %v546_v40 = vpop.xlane.xlu0 %545  ;;  %v784_v33 = vsel %vm399_vm0, %v143_v24, 0.0 }
  0xf1   :  { %v4823_v44 = vsel %vm6803_vm12, %v2236_v38, %v4625_v11  ;;  %v2244_v48 = vrot.slane %v549_v39, %v4476_v29  ;;  %v2240_v49 = vrot.slane %v546_v40, %v4473_v28  ;;  %v769_v11 = vsel %vm399_vm0, %v138_v50, 0.0  ;;  %v146_v38 = vld [vmem:[%s6797_s0 + $0x418] sm:$0xff]  ;;  %v145_v39 = vld [vmem:[%s6797_s0 + $0x410] sm:$0xff] }
  0xf2   :  { %v790_v50 = vsel %vm399_vm0, %v145_v39, 0.0 }
  0xf3   :  { %v2245_v52 = vsel %vm1979_vm1, %v2244_v48, %v2240_v49  ;;  %764 = vadd.xlane.f32.xlu1 %v763_v42  ;;  %761 = vadd.xlane.f32.xlu0 %v760_v43  ;;  %v793_v49 = vsel %vm399_vm0, %v146_v38, 0.0 }
  0xf4   :  { %v555_v53 = vpop.xlane.xlu1 %554  ;;  %v552_v54 = vpop.xlane.xlu0 %551 }
  0xf5   :  { %v2254_v60 = vrot.slane %v555_v53, %v4490_v35  ;;  %v2249_v15 = vrot.slane %v552_v54, %v4487_v34  ;;  %v148_v53 = vld [vmem:[%s6797_s0 + $0x428] sm:$0xff]  ;;  %v147_v54 = vld [vmem:[%s6797_s0 + $0x420] sm:$0xff] }
  0xf6   :  { %v799_v62 = vsel %vm399_vm0, %v148_v53, 0.0  ;;  %v796_v63 = vsel %vm399_vm0, %v147_v54, 0.0 }
  0xf7   :  { %v2250_v0 = vsel %vm1986_vm2, %v2249_v15, %v2245_v52  ;;  %770 = vadd.xlane.f32.xlu1 %v769_v11  ;;  %767 = vadd.xlane.f32.xlu0 %v766_v55 }
  0xf8   :  { %v561_v1 = vpop.xlane.xlu1 %560  ;;  %v2255_v2 = vsel %vm1993_vm3, %v2254_v60, %v2250_v0  ;;  %v558_v3 = vpop.xlane.xlu0 %557 }
  0xf9   :  { %v2264_v5 = vrot.slane %v561_v1, %v4505_v46  ;;  %v2259_v6 = vrot.slane %v558_v3, %v4508_v47  ;;  %v149_v3 = vld [vmem:[%s6797_s0 + $0x430] sm:$0xff] }
  0xfa   :  { %v802_v9 = vsel %vm399_vm0, %v149_v3, 0.0 }
  0xfb   :  { %v2260_v10 = vsel %vm2000_vm4, %v2259_v6, %v2255_v2  ;;  %776 = vadd.xlane.f32.xlu1 %v775_v18  ;;  %773 = vadd.xlane.f32.xlu0 %v772_v4  ;;  %v150_v2 = vld [vmem:[%s6797_s0 + $0x438] sm:$0xff] }
  0xfc   :  { %v567_v12 = vpop.xlane.xlu1 %566  ;;  %v2265_v14 = vsel %vm2007_vm5, %v2264_v5, %v2260_v10  ;;  %v564_v16 = vpop.xlane.xlu0 %563  ;;  %v805_v8 = vsel %vm399_vm0, %v150_v2, 0.0 }
  0xfd   :  { %v2274_v20 = vrot.slane %v567_v12, %v4517_v56  ;;  %v2269_v21 = vrot.slane %v564_v16, %v4520_v57  ;;  %v151_v16 = vld [vmem:[%s6797_s0 + $0x440] sm:$0xff] }
  0xfe   :  { %v808_v24 = vsel %vm399_vm0, %v151_v16, 0.0 }
  0xff   :  { %v2270_v25 = vsel %vm2014_vm6, %v2269_v21, %v2265_v14  ;;  %782 = vadd.xlane.f32.xlu1 %v781_v17  ;;  %779 = vadd.xlane.f32.xlu0 %v778_v19  ;;  %v152_v14 = vld [vmem:[%s6797_s0 + $0x448] sm:$0xff] }
 0x100   :  { %v573_v26 = vpop.xlane.xlu1 %572  ;;  %v2275_v27 = vsel %vm2021_vm7, %v2274_v20, %v2270_v25  ;;  %v570_v30 = vpop.xlane.xlu0 %569  ;;  %v811_v22 = vsel %vm399_vm0, %v152_v14, 0.0 }
 0x101   :  { %v2284_v36 = vrot.slane %v573_v26, %v4538_v7  ;;  %v2279_v37 = vrot.slane %v570_v30, %v4550_v13  ;;  %v154_v30 = vld [vmem:[%s6797_s0 + $0x458] sm:$0xff] }
 0x103   :  { %v2280_v40 = vsel %vm2028_vm8, %v2279_v37, %v2275_v27  ;;  %788 = vadd.xlane.f32.xlu1 %v787_v32  ;;  %785 = vadd.xlane.f32.xlu0 %v784_v33  ;;  %v153_v32 = vld [vmem:[%s6797_s0 + $0x450] sm:$0xff] }
 0x104   :  { %v579_v42 = vpop.xlane.xlu1 %578  ;;  %v2285_v43 = vsel %vm2035_vm9, %v2284_v36, %v2280_v40  ;;  %v576_v48 = vpop.xlane.xlu0 %575  ;;  %v814_v38 = vsel %vm399_vm0, %v153_v32, 0.0 }
 0x105   :  { %v2294_v51 = vrot.slane %v579_v42, %v4558_v23  ;;  %v2289_v52 = vrot.slane %v576_v48, %v4570_v31  ;;  %v156_v42 = vld [vmem:[%s6797_s0 + $0x468] sm:$0xff] }
 0x107   :  { %v2290_v11 = vsel %vm6802_vm10, %v2289_v52, %v2285_v43  ;;  %794 = vadd.xlane.f32.xlu1 %v793_v49  ;;  %791 = vadd.xlane.f32.xlu0 %v790_v50  ;;  %vm6806_vm10 = vcmask 851712   ;;  %v155_v43 = vld [vmem:[%s6797_s0 + $0x460] sm:$0xff]  ;;  %v823_v52 = vsel %vm399_vm0, %v156_v42, 0.0 }
 0x108   :  { %v585_v55 = vpop.xlane.xlu1 %584  ;;  %v2295_v60 = vsel %vm2049_vm11, %v2294_v51, %v2290_v11  ;;  %v582_v15 = vpop.xlane.xlu0 %581  ;;  %v820_v53 = vsel %vm399_vm0, %v155_v43, 0.0 }
 0x109   :  { %v2304_v0 = vrot.slane %v585_v55, %v4578_v41  ;;  %v2299_v1 = vrot.slane %v582_v15, %v4584_v45  ;;  %v158_v55 = vld [vmem:[%s6797_s0 + $0x478] sm:$0xff] }
 0x10b   :  { %v2300_v18 = vsel %vm6806_vm10, %v2299_v1, %v2295_v60  ;;  %800 = vadd.xlane.f32.xlu1 %v799_v62  ;;  %797 = vadd.xlane.f32.xlu0 %v796_v63  ;;  %v157_v60 = vld [vmem:[%s6797_s0 + $0x470] sm:$0xff]  ;;  %v829_v1 = vsel %vm399_vm0, %v158_v55, 0.0  ;;  %vm6807_vm10 = vcmask 720512  }
 0x10c   :  { %v591_v4 = vpop.xlane.xlu1 %590  ;;  %v2305_v5 = vsel %vm2063_vm13, %v2304_v0, %v2300_v18  ;;  %v588_v6 = vpop.xlane.xlu0 %587  ;;  %v826_v2 = vsel %vm399_vm0, %v157_v60, 0.0 }
 0x10d   :  { %v2314_v10 = vrot.slane %v591_v4, %v4598_v59  ;;  %v2309_v12 = vrot.slane %v588_v6, %v4603_v61  ;;  %v160_v4 = vld [vmem:[%s6797_s0 + $0x488] sm:$0xff] }
 0x10f   :  { %v2310_v17 = vsel %vm2070_vm14, %v2309_v12, %v2305_v5  ;;  %806 = vadd.xlane.f32.xlu1 %v805_v8  ;;  %803 = vadd.xlane.f32.xlu0 %v802_v9  ;;  %v159_v5 = vld [vmem:[%s6797_s0 + $0x480] sm:$0xff]  ;;  %v835_v12 = vsel %vm399_vm0, %v160_v4, 0.0 }
 0x110   :  { %v2315_v19 = vsel %vm2077_vm15, %v2314_v10, %v2310_v17  ;;  %v597_v20 = vpop.xlane.xlu1 %596  ;;  %v594_v21 = vpop.xlane.xlu0 %593  ;;  %v832_v14 = vsel %vm399_vm0, %v159_v5, 0.0 }
 0x111   :  { %v4922_v25 = vsel %vm6803_vm12, %v2315_v19, %v4722_v58  ;;  %v2323_v26 = vrot.slane %v597_v20, %v4476_v29  ;;  %v2319_v27 = vrot.slane %v594_v21, %v4473_v28  ;;  %v817_v58 = vsel %vm399_vm0, %v154_v30, 0.0  ;;  %v162_v19 = vld [vmem:[%s6797_s0 + $0x498] sm:$0xff]  ;;  %v161_v20 = vld [vmem:[%s6797_s0 + $0x490] sm:$0xff] }
 0x112   :  { %v838_v30 = vsel %vm399_vm0, %v161_v20, 0.0  ;;  %vm6809_vm12 = vcmask 720512  }
 0x113   :  { %v2324_v33 = vsel %vm1979_vm1, %v2323_v26, %v2319_v27  ;;  %812 = vadd.xlane.f32.xlu1 %v811_v22  ;;  %809 = vadd.xlane.f32.xlu0 %v808_v24  ;;  %v841_v27 = vsel %vm399_vm0, %v162_v19, 0.0 }
 0x114   :  { %v603_v36 = vpop.xlane.xlu1 %602  ;;  %v600_v37 = vpop.xlane.xlu0 %599 }
 0x115   :  { %v2333_v39 = vrot.slane %v603_v36, %v4490_v35  ;;  %v2328_v40 = vrot.slane %v600_v37, %v4487_v34  ;;  %v164_v36 = vld [vmem:[%s6797_s0 + $0x4a8] sm:$0xff]  ;;  %v163_v37 = vld [vmem:[%s6797_s0 + $0x4a0] sm:$0xff] }
 0x116   :  { %v847_v42 = vsel %vm399_vm0, %v164_v36, 0.0  ;;  %v844_v43 = vsel %vm399_vm0, %v163_v37, 0.0 }
 0x117   :  { %v2329_v48 = vsel %vm1986_vm2, %v2328_v40, %v2324_v33  ;;  %818 = vadd.xlane.f32.xlu1 %v817_v58  ;;  %815 = vadd.xlane.f32.xlu0 %v814_v38 }
 0x118   :  { %v609_v49 = vpop.xlane.xlu1 %608  ;;  %v2334_v50 = vsel %vm1993_vm3, %v2333_v39, %v2329_v48  ;;  %v606_v51 = vpop.xlane.xlu0 %605 }
 0x119   :  { %v2343_v54 = vrot.slane %v609_v49, %v4505_v46  ;;  %v2338_v11 = vrot.slane %v606_v51, %v4508_v47  ;;  %v165_v51 = vld [vmem:[%s6797_s0 + $0x4b0] sm:$0xff] }
 0x11a   :  { %v850_v60 = vsel %vm399_vm0, %v165_v51, 0.0 }
 0x11b   :  { %v2339_v15 = vsel %vm2000_vm4, %v2338_v11, %v2334_v50  ;;  %824 = vadd.xlane.f32.xlu1 %v823_v52  ;;  %821 = vadd.xlane.f32.xlu0 %v820_v53  ;;  %v166_v50 = vld [vmem:[%s6797_s0 + $0x4b8] sm:$0xff] }
 0x11c   :  { %v615_v62 = vpop.xlane.xlu1 %614  ;;  %v2344_v63 = vsel %vm2007_vm5, %v2343_v54, %v2339_v15  ;;  %v612_v0 = vpop.xlane.xlu0 %611  ;;  %v853_v55 = vsel %vm399_vm0, %v166_v50, 0.0 }
 0x11d   :  { %v2353_v3 = vrot.slane %v615_v62, %v4517_v56  ;;  %v2348_v18 = vrot.slane %v612_v0, %v4520_v57  ;;  %v167_v0 = vld [vmem:[%s6797_s0 + $0x4c0] sm:$0xff] }
 0x11e   :  { %v856_v5 = vsel %vm399_vm0, %v167_v0, 0.0 }
 0x11f   :  { %v2349_v6 = vsel %vm2014_vm6, %v2348_v18, %v2344_v63  ;;  %830 = vadd.xlane.f32.xlu1 %v829_v1  ;;  %827 = vadd.xlane.f32.xlu0 %v826_v2  ;;  %v168_v63 = vld [vmem:[%s6797_s0 + $0x4c8] sm:$0xff] }
 0x120   :  { %v621_v8 = vpop.xlane.xlu1 %620  ;;  %v2354_v9 = vsel %vm2021_vm7, %v2353_v3, %v2349_v6  ;;  %v618_v10 = vpop.xlane.xlu0 %617  ;;  %v859_v4 = vsel %vm399_vm0, %v168_v63, 0.0 }
 0x121   :  { %v2363_v16 = vrot.slane %v621_v8, %v4538_v7  ;;  %v2358_v17 = vrot.slane %v618_v10, %v4550_v13  ;;  %v170_v10 = vld [vmem:[%s6797_s0 + $0x4d8] sm:$0xff] }
 0x123   :  { %v2359_v21 = vsel %vm2028_vm8, %v2358_v17, %v2354_v9  ;;  %836 = vadd.xlane.f32.xlu1 %v835_v12  ;;  %833 = vadd.xlane.f32.xlu0 %v832_v14  ;;  %v169_v12 = vld [vmem:[%s6797_s0 + $0x4d0] sm:$0xff] }
 0x124   :  { %v627_v22 = vpop.xlane.xlu1 %626  ;;  %v2364_v24 = vsel %vm2035_vm9, %v2363_v16, %v2359_v21  ;;  %v624_v26 = vpop.xlane.xlu0 %623  ;;  %v862_v19 = vsel %vm399_vm0, %v169_v12, 0.0 }
 0x125   :  { %v2373_v32 = vrot.slane %v627_v22, %v4558_v23  ;;  %v2368_v33 = vrot.slane %v624_v26, %v4570_v31  ;;  %v172_v22 = vld [vmem:[%s6797_s0 + $0x4e8] sm:$0xff] }
 0x127   :  { %v2369_v58 = vsel %vm6807_vm10, %v2368_v33, %v2364_v24  ;;  %842 = vadd.xlane.f32.xlu1 %v841_v27  ;;  %839 = vadd.xlane.f32.xlu0 %v838_v30  ;;  %vm6808_vm10 = vcmask 851712   ;;  %v171_v24 = vld [vmem:[%s6797_s0 + $0x4e0] sm:$0xff]  ;;  %v871_v33 = vsel %vm399_vm0, %v172_v22, 0.0 }
 0x128   :  { %v633_v38 = vpop.xlane.xlu1 %632  ;;  %v2374_v39 = vsel %vm2049_vm11, %v2373_v32, %v2369_v58  ;;  %v630_v40 = vpop.xlane.xlu0 %629  ;;  %v868_v36 = vsel %vm399_vm0, %v171_v24, 0.0 }
 0x129   :  { %v2383_v48 = vrot.slane %v633_v38, %v4578_v41  ;;  %v2378_v49 = vrot.slane %v630_v40, %v4584_v45  ;;  %v174_v38 = vld [vmem:[%s6797_s0 + $0x4f8] sm:$0xff] }
 0x12b   :  { %v2379_v52 = vsel %vm6808_vm10, %v2378_v49, %v2374_v39  ;;  %848 = vadd.xlane.f32.xlu1 %v847_v42  ;;  %845 = vadd.xlane.f32.xlu0 %v844_v43  ;;  %vm6804_vm10 = vcmask 1042434   ;;  %v173_v39 = vld [vmem:[%s6797_s0 + $0x4f0] sm:$0xff]  ;;  %v877_v49 = vsel %vm399_vm0, %v174_v38, 0.0 }
 0x12c   :  { %v639_v53 = vpop.xlane.xlu1 %638  ;;  %v2384_v54 = vsel %vm2063_vm13, %v2383_v48, %v2379_v52  ;;  %v636_v11 = vpop.xlane.xlu0 %635  ;;  %v874_v50 = vsel %vm399_vm0, %v173_v39, 0.0 }
 0x12d   :  { %v2393_v15 = vrot.slane %v639_v53, %v4598_v59  ;;  %v2388_v62 = vrot.slane %v636_v11, %v4603_v61  ;;  %v176_v53 = vld [vmem:[%s6797_s0 + $0x508] sm:$0xff] }
 0x12f   :  { %v2389_v1 = vsel %vm2070_vm14, %v2388_v62, %v2384_v54  ;;  %854 = vadd.xlane.f32.xlu1 %v853_v55  ;;  %851 = vadd.xlane.f32.xlu0 %v850_v60  ;;  %v175_v54 = vld [vmem:[%s6797_s0 + $0x500] sm:$0xff]  ;;  %v883_v62 = vsel %vm399_vm0, %v176_v53, 0.0 }
 0x130   :  { %v2394_v2 = vsel %vm2077_vm15, %v2393_v15, %v2389_v1  ;;  %v645_v3 = vpop.xlane.xlu1 %644  ;;  %v642_v18 = vpop.xlane.xlu0 %641  ;;  %v880_v63 = vsel %vm399_vm0, %v175_v54, 0.0 }
 0x131   :  { %v5021_v6 = vsel %vm6804_vm10, %v2394_v2, %v4823_v44  ;;  %v2402_v8 = vrot.slane %v645_v3, %v4476_v29  ;;  %v2398_v9 = vrot.slane %v642_v18, %v4473_v28  ;;  %v865_v44 = vsel %vm399_vm0, %v170_v10, 0.0  ;;  %v178_v2 = vld [vmem:[%s6797_s0 + $0x518] sm:$0xff]  ;;  %v177_v3 = vld [vmem:[%s6797_s0 + $0x510] sm:$0xff] }
 0x132   :  { %v886_v10 = vsel %vm399_vm0, %v177_v3, 0.0 }
 0x133   :  { %v2403_v14 = vsel %vm1979_vm1, %v2402_v8, %v2398_v9  ;;  %860 = vadd.xlane.f32.xlu1 %v859_v4  ;;  %857 = vadd.xlane.f32.xlu0 %v856_v5  ;;  %v889_v9 = vsel %vm399_vm0, %v178_v2, 0.0 }
 0x134   :  { %v651_v16 = vpop.xlane.xlu1 %650  ;;  %v648_v17 = vpop.xlane.xlu0 %647 }
 0x135   :  { %v2412_v20 = vrot.slane %v651_v16, %v4490_v35  ;;  %v2407_v21 = vrot.slane %v648_v17, %v4487_v34  ;;  %v180_v16 = vld [vmem:[%s6797_s0 + $0x528] sm:$0xff]  ;;  %v179_v17 = vld [vmem:[%s6797_s0 + $0x520] sm:$0xff] }
 0x136   :  { %v895_v22 = vsel %vm399_vm0, %v180_v16, 0.0  ;;  %v892_v24 = vsel %vm399_vm0, %v179_v17, 0.0 }
 0x137   :  { %v2408_v26 = vsel %vm1986_vm2, %v2407_v21, %v2403_v14  ;;  %866 = vadd.xlane.f32.xlu1 %v865_v44  ;;  %863 = vadd.xlane.f32.xlu0 %v862_v19 }
 0x138   :  { %v657_v27 = vpop.xlane.xlu1 %656  ;;  %v2413_v30 = vsel %vm1993_vm3, %v2412_v20, %v2408_v26  ;;  %v654_v32 = vpop.xlane.xlu0 %653 }
 0x139   :  { %v2422_v37 = vrot.slane %v657_v27, %v4505_v46  ;;  %v2417_v58 = vrot.slane %v654_v32, %v4508_v47  ;;  %v181_v32 = vld [vmem:[%s6797_s0 + $0x530] sm:$0xff] }
 0x13a   :  { %v898_v39 = vsel %vm399_vm0, %v181_v32, 0.0 }
 0x13b   :  { %v2418_v40 = vsel %vm2000_vm4, %v2417_v58, %v2413_v30  ;;  %872 = vadd.xlane.f32.xlu1 %v871_v33  ;;  %869 = vadd.xlane.f32.xlu0 %v868_v36  ;;  %v182_v30 = vld [vmem:[%s6797_s0 + $0x538] sm:$0xff] }
 0x13c   :  { %v663_v42 = vpop.xlane.xlu1 %662  ;;  %v2423_v43 = vsel %vm2007_vm5, %v2422_v37, %v2418_v40  ;;  %v660_v48 = vpop.xlane.xlu0 %659  ;;  %v901_v38 = vsel %vm399_vm0, %v182_v30, 0.0 }
 0x13d   :  { %v2432_v51 = vrot.slane %v663_v42, %v4517_v56  ;;  %v2427_v52 = vrot.slane %v660_v48, %v4520_v57  ;;  %v183_v48 = vld [vmem:[%s6797_s0 + $0x540] sm:$0xff] }
 0x13e   :  { %v904_v54 = vsel %vm399_vm0, %v183_v48, 0.0 }
 0x13f   :  { %v2428_v11 = vsel %vm2014_vm6, %v2427_v52, %v2423_v43  ;;  %878 = vadd.xlane.f32.xlu1 %v877_v49  ;;  %875 = vadd.xlane.f32.xlu0 %v874_v50  ;;  %v184_v43 = vld [vmem:[%s6797_s0 + $0x548] sm:$0xff] }
 0x140   :  { %v669_v55 = vpop.xlane.xlu1 %668  ;;  %v2433_v60 = vsel %vm2021_vm7, %v2432_v51, %v2428_v11  ;;  %v666_v15 = vpop.xlane.xlu0 %665  ;;  %v907_v53 = vsel %vm399_vm0, %v184_v43, 0.0 }
 0x141   :  { %v2442_v0 = vrot.slane %v669_v55, %v4538_v7  ;;  %v2437_v1 = vrot.slane %v666_v15, %v4550_v13  ;;  %v186_v15 = vld [vmem:[%s6797_s0 + $0x558] sm:$0xff] }
 0x143   :  { %v2438_v18 = vsel %vm2028_vm8, %v2437_v1, %v2433_v60  ;;  %884 = vadd.xlane.f32.xlu1 %v883_v62  ;;  %881 = vadd.xlane.f32.xlu0 %v880_v63  ;;  %v185_v62 = vld [vmem:[%s6797_s0 + $0x550] sm:$0xff] }
 0x144   :  { %v675_v4 = vpop.xlane.xlu1 %674  ;;  %v2443_v5 = vsel %vm2035_vm9, %v2442_v0, %v2438_v18  ;;  %v672_v8 = vpop.xlane.xlu0 %671  ;;  %v910_v2 = vsel %vm399_vm0, %v185_v62, 0.0 }
 0x145   :  { %v2452_v12 = vrot.slane %v675_v4, %v4558_v23  ;;  %v2447_v14 = vrot.slane %v672_v8, %v4570_v31  ;;  %v188_v4 = vld [vmem:[%s6797_s0 + $0x568] sm:$0xff] }
 0x147   :  { %v2448_v44 = vsel %vm6809_vm12, %v2447_v14, %v2443_v5  ;;  %890 = vadd.xlane.f32.xlu1 %v889_v9  ;;  %887 = vadd.xlane.f32.xlu0 %v886_v10  ;;  %vm6810_vm12 = vcmask 851712   ;;  %v187_v5 = vld [vmem:[%s6797_s0 + $0x560] sm:$0xff]  ;;  %v919_v14 = vsel %vm399_vm0, %v188_v4, 0.0 }
 0x148   :  { %v681_v19 = vpop.xlane.xlu1 %680  ;;  %v2453_v20 = vsel %vm2049_vm11, %v2452_v12, %v2448_v44  ;;  %v678_v21 = vpop.xlane.xlu0 %677  ;;  %v916_v16 = vsel %vm399_vm0, %v187_v5, 0.0 }
 0x149   :  { %v2462_v26 = vrot.slane %v681_v19, %v4578_v41  ;;  %v2457_v27 = vrot.slane %v678_v21, %v4584_v45  ;;  %v190_v19 = vld [vmem:[%s6797_s0 + $0x578] sm:$0xff] }
 0x14b   :  { %v2458_v33 = vsel %vm6810_vm12, %v2457_v27, %v2453_v20  ;;  %896 = vadd.xlane.f32.xlu1 %v895_v22  ;;  %893 = vadd.xlane.f32.xlu0 %v892_v24  ;;  %v189_v20 = vld [vmem:[%s6797_s0 + $0x570] sm:$0xff]  ;;  %v925_v27 = vsel %vm399_vm0, %v190_v19, 0.0  ;;  %vm6811_vm12 = vcmask 720512  }
 0x14c   :  { %v687_v36 = vpop.xlane.xlu1 %686  ;;  %v2463_v37 = vsel %vm2063_vm13, %v2462_v26, %v2458_v33  ;;  %v684_v58 = vpop.xlane.xlu0 %683  ;;  %v922_v30 = vsel %vm399_vm0, %v189_v20, 0.0 }
 0x14d   :  { %v2472_v40 = vrot.slane %v687_v36, %v4598_v59  ;;  %v2467_v42 = vrot.slane %v684_v58, %v4603_v61  ;;  %v192_v36 = vld [vmem:[%s6797_s0 + $0x588] sm:$0xff] }
 0x14f   :  { %v2468_v49 = vsel %vm2070_vm14, %v2467_v42, %v2463_v37  ;;  %902 = vadd.xlane.f32.xlu1 %v901_v38  ;;  %899 = vadd.xlane.f32.xlu0 %v898_v39  ;;  %v191_v37 = vld [vmem:[%s6797_s0 + $0x580] sm:$0xff]  ;;  %v931_v42 = vsel %vm399_vm0, %v192_v36, 0.0 }
 0x150   :  { %v2473_v50 = vsel %vm2077_vm15, %v2472_v40, %v2468_v49  ;;  %v693_v51 = vpop.xlane.xlu1 %692  ;;  %v690_v52 = vpop.xlane.xlu0 %689  ;;  %v928_v43 = vsel %vm399_vm0, %v191_v37, 0.0 }
 0x151   :  { %v5120_v11 = vsel %vm6804_vm10, %v2473_v50, %v4922_v25  ;;  %v2481_v55 = vrot.slane %v693_v51, %v4476_v29  ;;  %v2477_v60 = vrot.slane %v690_v52, %v4473_v28  ;;  %v913_v25 = vsel %vm399_vm0, %v186_v15, 0.0  ;;  %v194_v50 = vld [vmem:[%s6797_s0 + $0x598] sm:$0xff]  ;;  %v193_v51 = vld [vmem:[%s6797_s0 + $0x590] sm:$0xff] }
 0x152   :  { %v934_v15 = vsel %vm399_vm0, %v193_v51, 0.0  ;;  %vm6813_vm10 = vcmask 720512  }
 0x153   :  { %v2482_v63 = vsel %vm1979_vm1, %v2481_v55, %v2477_v60  ;;  %908 = vadd.xlane.f32.xlu1 %v907_v53  ;;  %905 = vadd.xlane.f32.xlu0 %v904_v54  ;;  %v937_v60 = vsel %vm399_vm0, %v194_v50, 0.0 }
 0x154   :  { %v699_v0 = vpop.xlane.xlu1 %698  ;;  %v696_v1 = vpop.xlane.xlu0 %695 }
 0x155   :  { %v2491_v3 = vrot.slane %v699_v0, %v4490_v35  ;;  %v2486_v18 = vrot.slane %v696_v1, %v4487_v34  ;;  %v196_v0 = vld [vmem:[%s6797_s0 + $0x5a8] sm:$0xff]  ;;  %v195_v1 = vld [vmem:[%s6797_s0 + $0x5a0] sm:$0xff] }
 0x156   :  { %v943_v4 = vsel %vm399_vm0, %v196_v0, 0.0  ;;  %v940_v5 = vsel %vm399_vm0, %v195_v1, 0.0 }
 0x157   :  { %v2487_v8 = vsel %vm1986_vm2, %v2486_v18, %v2482_v63  ;;  %914 = vadd.xlane.f32.xlu1 %v913_v25  ;;  %911 = vadd.xlane.f32.xlu0 %v910_v2 }
 0x158   :  { %v705_v9 = vpop.xlane.xlu1 %704  ;;  %v2492_v10 = vsel %vm1993_vm3, %v2491_v3, %v2487_v8  ;;  %v702_v12 = vpop.xlane.xlu0 %701 }
 0x159   :  { %v2501_v17 = vrot.slane %v705_v9, %v4505_v46  ;;  %v2496_v44 = vrot.slane %v702_v12, %v4508_v47  ;;  %v197_v12 = vld [vmem:[%s6797_s0 + $0x5b0] sm:$0xff] }
 0x15a   :  { %v946_v20 = vsel %vm399_vm0, %v197_v12, 0.0 }
 0x15b   :  { %v2497_v21 = vsel %vm2000_vm4, %v2496_v44, %v2492_v10  ;;  %920 = vadd.xlane.f32.xlu1 %v919_v14  ;;  %917 = vadd.xlane.f32.xlu0 %v916_v16  ;;  %v198_v10 = vld [vmem:[%s6797_s0 + $0x5b8] sm:$0xff] }
 0x15c   :  { %v711_v22 = vpop.xlane.xlu1 %710  ;;  %v2502_v24 = vsel %vm2007_vm5, %v2501_v17, %v2497_v21  ;;  %v708_v26 = vpop.xlane.xlu0 %707  ;;  %v949_v19 = vsel %vm399_vm0, %v198_v10, 0.0 }
 0x15d   :  { %v2511_v32 = vrot.slane %v711_v22, %v4517_v56  ;;  %v2506_v33 = vrot.slane %v708_v26, %v4520_v57  ;;  %v199_v26 = vld [vmem:[%s6797_s0 + $0x5c0] sm:$0xff] }
 0x15e   :  { %v952_v37 = vsel %vm399_vm0, %v199_v26, 0.0 }
 0x15f   :  { %v2507_v58 = vsel %vm2014_vm6, %v2506_v33, %v2502_v24  ;;  %926 = vadd.xlane.f32.xlu1 %v925_v27  ;;  %923 = vadd.xlane.f32.xlu0 %v922_v30  ;;  %v200_v24 = vld [vmem:[%s6797_s0 + $0x5c8] sm:$0xff] }
 0x160   :  { %v717_v38 = vpop.xlane.xlu1 %716  ;;  %v2512_v39 = vsel %vm2021_vm7, %v2511_v32, %v2507_v58  ;;  %v714_v40 = vpop.xlane.xlu0 %713  ;;  %v955_v36 = vsel %vm399_vm0, %v200_v24, 0.0 }
 0x161   :  { %v2521_v48 = vrot.slane %v717_v38, %v4538_v7  ;;  %v2516_v49 = vrot.slane %v714_v40, %v4550_v13  ;;  %v201_v40 = vld [vmem:[%s6797_s0 + $0x5d0] sm:$0xff] }
 0x162   :  { %v958_v51 = vsel %vm399_vm0, %v201_v40, 0.0 }
 0x163   :  { %v2517_v52 = vsel %vm2028_vm8, %v2516_v49, %v2512_v39  ;;  %932 = vadd.xlane.f32.xlu1 %v931_v42  ;;  %929 = vadd.xlane.f32.xlu0 %v928_v43  ;;  %v202_v39 = vld [vmem:[%s6797_s0 + $0x5d8] sm:$0xff] }
 0x164   :  { %v723_v53 = vpop.xlane.xlu1 %722  ;;  %v2522_v54 = vsel %vm2035_vm9, %v2521_v48, %v2517_v52  ;;  %v720_v55 = vpop.xlane.xlu0 %719  ;;  %v961_v50 = vsel %vm399_vm0, %v202_v39, 0.0 }
 0x165   :  { %v2531_v62 = vrot.slane %v723_v53, %v4558_v23  ;;  %v2526_v63 = vrot.slane %v720_v55, %v4570_v31 }
 0x167   :  { %v2527_v25 = vsel %vm6811_vm12, %v2526_v63, %v2522_v54  ;;  %938 = vadd.xlane.f32.xlu1 %v937_v60  ;;  %935 = vadd.xlane.f32.xlu0 %v934_v15  ;;  %vm6812_vm12 = vcmask 851712   ;;  %v204_v54 = vld [vmem:[%s6797_s0 + $0x5e8] sm:$0xff] }
 0x168   :  { %v729_v2 = vpop.xlane.xlu1 %728  ;;  %v2532_v3 = vsel %vm2049_vm11, %v2531_v62, %v2527_v25  ;;  %v726_v18 = vpop.xlane.xlu0 %725  ;;  %v967_v63 = vsel %vm399_vm0, %v204_v54, 0.0 }
 0x169   :  { %v2541_v8 = vrot.slane %v729_v2, %v4578_v41  ;;  %v2536_v9 = vrot.slane %v726_v18, %v4584_v45  ;;  %v206_v2 = vld [vmem:[%s6797_s0 + $0x5f8] sm:$0xff] }
 0x16b   :  { %v2537_v14 = vsel %vm6812_vm12, %v2536_v9, %v2532_v3  ;;  %944 = vadd.xlane.f32.xlu1 %v943_v4  ;;  %941 = vadd.xlane.f32.xlu0 %v940_v5  ;;  %vm6805_vm12 = vcmask 1043459   ;;  %v205_v3 = vld [vmem:[%s6797_s0 + $0x5f0] sm:$0xff]  ;;  %v973_v9 = vsel %vm399_vm0, %v206_v2, 0.0 }
 0x16c   :  { %v735_v16 = vpop.xlane.xlu1 %734  ;;  %v2542_v17 = vsel %vm2063_vm13, %v2541_v8, %v2537_v14  ;;  %v732_v44 = vpop.xlane.xlu0 %731  ;;  %v970_v10 = vsel %vm399_vm0, %v205_v3, 0.0 }
 0x16d   :  { %v2551_v21 = vrot.slane %v735_v16, %v4598_v59  ;;  %v2546_v22 = vrot.slane %v732_v44, %v4603_v61  ;;  %v208_v16 = vld [vmem:[%s6797_s0 + $0x608] sm:$0xff] }
 0x16f   :  { %v2547_v27 = vsel %vm2070_vm14, %v2546_v22, %v2542_v17  ;;  %950 = vadd.xlane.f32.xlu1 %v949_v19  ;;  %947 = vadd.xlane.f32.xlu0 %v946_v20  ;;  %v207_v17 = vld [vmem:[%s6797_s0 + $0x600] sm:$0xff]  ;;  %v979_v22 = vsel %vm399_vm0, %v208_v16, 0.0 }
 0x170   :  { %v2552_v30 = vsel %vm2077_vm15, %v2551_v21, %v2547_v27  ;;  %v741_v32 = vpop.xlane.xlu1 %740  ;;  %v738_v33 = vpop.xlane.xlu0 %737  ;;  %v976_v24 = vsel %vm399_vm0, %v207_v17, 0.0 }
 0x171   :  { %v2560_v58 = vrot.slane %v741_v32, %v4476_v29  ;;  %v2556_v38 = vrot.slane %v738_v33, %v4473_v28  ;;  %v5227_v42 = vsel %vm6805_vm12, %v2552_v30, %v5021_v6  ;;  %v203_v6 = vld [vmem:[%s6797_s0 + $0x5e0] sm:$0xff]  ;;  %v210_v30 = vld [vmem:[%s6797_s0 + $0x618] sm:$0xff]  ;;  %v209_v32 = vld [vmem:[%s6797_s0 + $0x610] sm:$0xff] }
 0x172   :  { %v964_v0 = vsel %vm399_vm0, %v203_v6, 0.0  ;;  %v982_v39 = vsel %vm399_vm0, %v209_v32, 0.0 }
 0x173   :  { %v2561_v43 = vsel %vm1979_vm1, %v2560_v58, %v2556_v38  ;;  %956 = vadd.xlane.f32.xlu1 %v955_v36  ;;  %953 = vadd.xlane.f32.xlu0 %v952_v37  ;;  %v985_v38 = vsel %vm399_vm0, %v210_v30, 0.0 }
 0x174   :  { %v747_v48 = vpop.xlane.xlu1 %746  ;;  %v744_v49 = vpop.xlane.xlu0 %743 }
 0x175   :  { %v2570_v52 = vrot.slane %v747_v48, %v4490_v35  ;;  %v2565_v53 = vrot.slane %v744_v49, %v4487_v34  ;;  %v212_v48 = vld [vmem:[%s6797_s0 + $0x628] sm:$0xff]  ;;  %v211_v49 = vld [vmem:[%s6797_s0 + $0x620] sm:$0xff] }
 0x176   :  { %v991_v54 = vsel %vm399_vm0, %v212_v48, 0.0  ;;  %v988_v6 = vsel %vm399_vm0, %v211_v49, 0.0 }
 0x177   :  { %v2566_v55 = vsel %vm1986_vm2, %v2565_v53, %v2561_v43  ;;  %962 = vadd.xlane.f32.xlu1 %v961_v50  ;;  %959 = vadd.xlane.f32.xlu0 %v958_v51 }
 0x178   :  { %v753_v60 = vpop.xlane.xlu1 %752  ;;  %v2571_v15 = vsel %vm1993_vm3, %v2570_v52, %v2566_v55  ;;  %v750_v62 = vpop.xlane.xlu0 %749 }
 0x179   :  { %v2580_v1 = vrot.slane %v753_v60, %v4505_v46  ;;  %v2575_v25 = vrot.slane %v750_v62, %v4508_v47  ;;  %v213_v62 = vld [vmem:[%s6797_s0 + $0x630] sm:$0xff] }
 0x17a   :  { %v994_v3 = vsel %vm399_vm0, %v213_v62, 0.0 }
 0x17b   :  { %v2576_v18 = vsel %vm2000_vm4, %v2575_v25, %v2571_v15  ;;  %968 = vadd.xlane.f32.xlu1 %v967_v63  ;;  %965 = vadd.xlane.f32.xlu0 %v964_v0  ;;  %v214_v15 = vld [vmem:[%s6797_s0 + $0x638] sm:$0xff] }
 0x17c   :  { %v759_v4 = vpop.xlane.xlu1 %758  ;;  %v2581_v5 = vsel %vm2007_vm5, %v2580_v1, %v2576_v18  ;;  %v756_v8 = vpop.xlane.xlu0 %755  ;;  %v997_v2 = vsel %vm399_vm0, %v214_v15, 0.0 }
 0x17d   :  { %v2590_v12 = vrot.slane %v759_v4, %v4517_v56  ;;  %v2585_v14 = vrot.slane %v756_v8, %v4520_v57  ;;  %v215_v8 = vld [vmem:[%s6797_s0 + $0x640] sm:$0xff] }
 0x17e   :  { %v1000_v17 = vsel %vm399_vm0, %v215_v8, 0.0 }
 0x17f   :  { %v2586_v44 = vsel %vm2014_vm6, %v2585_v14, %v2581_v5  ;;  %974 = vadd.xlane.f32.xlu1 %v973_v9  ;;  %971 = vadd.xlane.f32.xlu0 %v970_v10  ;;  %v216_v5 = vld [vmem:[%s6797_s0 + $0x648] sm:$0xff] }
 0x180   :  { %v765_v19 = vpop.xlane.xlu1 %764  ;;  %v2591_v20 = vsel %vm2021_vm7, %v2590_v12, %v2586_v44  ;;  %v762_v21 = vpop.xlane.xlu0 %761  ;;  %v1003_v16 = vsel %vm399_vm0, %v216_v5, 0.0 }
 0x181   :  { %v2600_v26 = vrot.slane %v765_v19, %v4538_v7  ;;  %v2595_v27 = vrot.slane %v762_v21, %v4550_v13  ;;  %v217_v21 = vld [vmem:[%s6797_s0 + $0x650] sm:$0xff] }
 0x182   :  { %v1006_v32 = vsel %vm399_vm0, %v217_v21, 0.0 }
 0x183   :  { %v2596_v33 = vsel %vm2028_vm8, %v2595_v27, %v2591_v20  ;;  %980 = vadd.xlane.f32.xlu1 %v979_v22  ;;  %977 = vadd.xlane.f32.xlu0 %v976_v24  ;;  %v218_v20 = vld [vmem:[%s6797_s0 + $0x658] sm:$0xff] }
 0x184   :  { %v771_v36 = vpop.xlane.xlu1 %770  ;;  %v2601_v37 = vsel %vm2035_vm9, %v2600_v26, %v2596_v33  ;;  %v768_v58 = vpop.xlane.xlu0 %767  ;;  %v1009_v30 = vsel %vm399_vm0, %v218_v20, 0.0 }
 0x185   :  { %v2610_v40 = vrot.slane %v771_v36, %v4558_v23  ;;  %v2605_v43 = vrot.slane %v768_v58, %v4570_v31 }
 0x187   :  { %v2606_v50 = vsel %vm6813_vm10, %v2605_v43, %v2601_v37  ;;  %986 = vadd.xlane.f32.xlu1 %v985_v38  ;;  %983 = vadd.xlane.f32.xlu0 %v982_v39  ;;  %vm6814_vm10 = vcmask 851712   ;;  %v220_v37 = vld [vmem:[%s6797_s0 + $0x668] sm:$0xff] }
 0x188   :  { %v777_v51 = vpop.xlane.xlu1 %776  ;;  %v2611_v52 = vsel %vm2049_vm11, %v2610_v40, %v2606_v50  ;;  %v774_v53 = vpop.xlane.xlu0 %773  ;;  %v1015_v43 = vsel %vm399_vm0, %v220_v37, 0.0 }
 0x189   :  { %v2620_v55 = vrot.slane %v777_v51, %v4578_v41  ;;  %v2615_v60 = vrot.slane %v774_v53, %v4584_v45  ;;  %v222_v51 = vld [vmem:[%s6797_s0 + $0x678] sm:$0xff] }
 0x18b   :  { %v2616_v63 = vsel %vm6814_vm10, %v2615_v60, %v2611_v52  ;;  %992 = vadd.xlane.f32.xlu1 %v991_v54  ;;  %989 = vadd.xlane.f32.xlu0 %v988_v6  ;;  %v221_v52 = vld [vmem:[%s6797_s0 + $0x670] sm:$0xff]  ;;  %v1021_v60 = vsel %vm399_vm0, %v222_v51, 0.0  ;;  %vm6815_vm10 = vcmask 720512  }
 0x18c   :  { %v783_v0 = vpop.xlane.xlu1 %782  ;;  %v2621_v1 = vsel %vm2063_vm13, %v2620_v55, %v2616_v63  ;;  %v780_v25 = vpop.xlane.xlu0 %779  ;;  %v1018_v15 = vsel %vm399_vm0, %v221_v52, 0.0 }
 0x18d   :  { %v2630_v18 = vrot.slane %v783_v0, %v4598_v59  ;;  %v2625_v4 = vrot.slane %v780_v25, %v4603_v61  ;;  %v224_v0 = vld [vmem:[%s6797_s0 + $0x688] sm:$0xff] }
 0x18f   :  { %v2626_v9 = vsel %vm2070_vm14, %v2625_v4, %v2621_v1  ;;  %998 = vadd.xlane.f32.xlu1 %v997_v2  ;;  %995 = vadd.xlane.f32.xlu0 %v994_v3  ;;  %v223_v1 = vld [vmem:[%s6797_s0 + $0x680] sm:$0xff]  ;;  %v1027_v4 = vsel %vm399_vm0, %v224_v0, 0.0 }
 0x190   :  { %v2631_v10 = vsel %vm2077_vm15, %v2630_v18, %v2626_v9  ;;  %v789_v12 = vpop.xlane.xlu1 %788  ;;  %v786_v14 = vpop.xlane.xlu0 %785  ;;  %v1024_v5 = vsel %vm399_vm0, %v223_v1, 0.0 }
 0x191   :  { %v2639_v44 = vrot.slane %v789_v12, %v4476_v29  ;;  %v2635_v19 = vrot.slane %v786_v14, %v4473_v28  ;;  %v5326_v22 = vsel %vm6805_vm12, %v2631_v10, %v5120_v11  ;;  %v219_v11 = vld [vmem:[%s6797_s0 + $0x660] sm:$0xff]  ;;  %v226_v10 = vld [vmem:[%s6797_s0 + $0x698] sm:$0xff]  ;;  %v225_v12 = vld [vmem:[%s6797_s0 + $0x690] sm:$0xff]  ;;  %vm6817_vm12 = vcmask 720512  }
 0x192   :  { %v1012_v48 = vsel %vm399_vm0, %v219_v11, 0.0  ;;  %v1030_v20 = vsel %vm399_vm0, %v225_v12, 0.0 }
 0x193   :  { %v2640_v24 = vsel %vm1979_vm1, %v2639_v44, %v2635_v19  ;;  %1004 = vadd.xlane.f32.xlu1 %v1003_v16  ;;  %1001 = vadd.xlane.f32.xlu0 %v1000_v17  ;;  %v1033_v19 = vsel %vm399_vm0, %v226_v10, 0.0 }
 0x194   :  { %v795_v26 = vpop.xlane.xlu1 %794  ;;  %v792_v27 = vpop.xlane.xlu0 %791 }
 0x195   :  { %v2649_v33 = vrot.slane %v795_v26, %v4490_v35  ;;  %v2644_v36 = vrot.slane %v792_v27, %v4487_v34  ;;  %v228_v26 = vld [vmem:[%s6797_s0 + $0x6a8] sm:$0xff]  ;;  %v227_v27 = vld [vmem:[%s6797_s0 + $0x6a0] sm:$0xff] }
 0x196   :  { %v1039_v37 = vsel %vm399_vm0, %v228_v26, 0.0  ;;  %v1036_v11 = vsel %vm399_vm0, %v227_v27, 0.0 }
 0x197   :  { %v2645_v58 = vsel %vm1986_vm2, %v2644_v36, %v2640_v24  ;;  %1010 = vadd.xlane.f32.xlu1 %v1009_v30  ;;  %1007 = vadd.xlane.f32.xlu0 %v1006_v32 }
 0x198   :  { %v801_v38 = vpop.xlane.xlu1 %800  ;;  %v2650_v39 = vsel %vm1993_vm3, %v2649_v33, %v2645_v58  ;;  %v798_v40 = vpop.xlane.xlu0 %797 }
 0x199   :  { %v2659_v49 = vrot.slane %v801_v38, %v4505_v46  ;;  %v2654_v50 = vrot.slane %v798_v40, %v4508_v47  ;;  %v229_v40 = vld [vmem:[%s6797_s0 + $0x6b0] sm:$0xff] }
 0x19a   :  { %v1042_v52 = vsel %vm399_vm0, %v229_v40, 0.0 }
 0x19b   :  { %v2655_v53 = vsel %vm2000_vm4, %v2654_v50, %v2650_v39  ;;  %1016 = vadd.xlane.f32.xlu1 %v1015_v43  ;;  %1013 = vadd.xlane.f32.xlu0 %v1012_v48  ;;  %v230_v39 = vld [vmem:[%s6797_s0 + $0x6b8] sm:$0xff] }
 0x19c   :  { %v807_v54 = vpop.xlane.xlu1 %806  ;;  %v2660_v6 = vsel %vm2007_vm5, %v2659_v49, %v2655_v53  ;;  %v804_v55 = vpop.xlane.xlu0 %803  ;;  %v1045_v51 = vsel %vm399_vm0, %v230_v39, 0.0 }
 0x19d   :  { %v2669_v62 = vrot.slane %v807_v54, %v4517_v56  ;;  %v2664_v63 = vrot.slane %v804_v55, %v4520_v57  ;;  %v231_v55 = vld [vmem:[%s6797_s0 + $0x6c0] sm:$0xff] }
 0x19e   :  { %v1048_v1 = vsel %vm399_vm0, %v231_v55, 0.0 }
 0x19f   :  { %v2665_v25 = vsel %vm2014_vm6, %v2664_v63, %v2660_v6  ;;  %1022 = vadd.xlane.f32.xlu1 %v1021_v60  ;;  %1019 = vadd.xlane.f32.xlu0 %v1018_v15  ;;  %v232_v6 = vld [vmem:[%s6797_s0 + $0x6c8] sm:$0xff] }
 0x1a0   :  { %v813_v2 = vpop.xlane.xlu1 %812  ;;  %v2670_v3 = vsel %vm2021_vm7, %v2669_v62, %v2665_v25  ;;  %v810_v18 = vpop.xlane.xlu0 %809  ;;  %v1051_v0 = vsel %vm399_vm0, %v232_v6, 0.0 }
 0x1a1   :  { %v2679_v8 = vrot.slane %v813_v2, %v4538_v7  ;;  %v2674_v9 = vrot.slane %v810_v18, %v4550_v13  ;;  %v233_v18 = vld [vmem:[%s6797_s0 + $0x6d0] sm:$0xff] }
 0x1a2   :  { %v1054_v12 = vsel %vm399_vm0, %v233_v18, 0.0 }
 0x1a3   :  { %v2675_v14 = vsel %vm2028_vm8, %v2674_v9, %v2670_v3  ;;  %1028 = vadd.xlane.f32.xlu1 %v1027_v4  ;;  %1025 = vadd.xlane.f32.xlu0 %v1024_v5  ;;  %v234_v3 = vld [vmem:[%s6797_s0 + $0x6d8] sm:$0xff] }
 0x1a4   :  { %v819_v16 = vpop.xlane.xlu1 %818  ;;  %v2680_v17 = vsel %vm2035_vm9, %v2679_v8, %v2675_v14  ;;  %v816_v44 = vpop.xlane.xlu0 %815  ;;  %v1057_v10 = vsel %vm399_vm0, %v234_v3, 0.0 }
 0x1a5   :  { %v2689_v21 = vrot.slane %v819_v16, %v4558_v23  ;;  %v2684_v24 = vrot.slane %v816_v44, %v4570_v31 }
 0x1a7   :  { %v2685_v30 = vsel %vm6815_vm10, %v2684_v24, %v2680_v17  ;;  %1034 = vadd.xlane.f32.xlu1 %v1033_v19  ;;  %1031 = vadd.xlane.f32.xlu0 %v1030_v20  ;;  %vm6816_vm10 = vcmask 851712   ;;  %v236_v17 = vld [vmem:[%s6797_s0 + $0x6e8] sm:$0xff] }
 0x1a8   :  { %v825_v32 = vpop.xlane.xlu1 %824  ;;  %v2690_v33 = vsel %vm2049_vm11, %v2689_v21, %v2685_v30  ;;  %v822_v36 = vpop.xlane.xlu0 %821  ;;  %v1063_v24 = vsel %vm399_vm0, %v236_v17, 0.0 }
 0x1a9   :  { %v2699_v58 = vrot.slane %v825_v32, %v4578_v41  ;;  %v2694_v38 = vrot.slane %v822_v36, %v4584_v45  ;;  %v238_v32 = vld [vmem:[%s6797_s0 + $0x6f8] sm:$0xff] }
 0x1ab   :  { %v2695_v43 = vsel %vm6816_vm10, %v2694_v38, %v2690_v33  ;;  %1040 = vadd.xlane.f32.xlu1 %v1039_v37  ;;  %1037 = vadd.xlane.f32.xlu0 %v1036_v11  ;;  %vm3902_vm10 = vcmask 1044484   ;;  %v237_v33 = vld [vmem:[%s6797_s0 + $0x6f0] sm:$0xff]  ;;  %v1069_v38 = vsel %vm399_vm0, %v238_v32, 0.0 }
 0x1ac   :  { %v831_v48 = vpop.xlane.xlu1 %830  ;;  %v2700_v49 = vsel %vm2063_vm13, %v2699_v58, %v2695_v43  ;;  %v828_v50 = vpop.xlane.xlu0 %827  ;;  %v1066_v39 = vsel %vm399_vm0, %v237_v33, 0.0 }
 0x1ad   :  { %v2709_v53 = vrot.slane %v831_v48, %v4598_v59  ;;  %v2704_v54 = vrot.slane %v828_v50, %v4603_v61  ;;  %v240_v48 = vld [vmem:[%s6797_s0 + $0x708] sm:$0xff] }
 0x1af   :  { %v2705_v60 = vsel %vm2070_vm14, %v2704_v54, %v2700_v49  ;;  %1046 = vadd.xlane.f32.xlu1 %v1045_v51  ;;  %1043 = vadd.xlane.f32.xlu0 %v1042_v52  ;;  %v239_v49 = vld [vmem:[%s6797_s0 + $0x700] sm:$0xff]  ;;  %v1075_v54 = vsel %vm399_vm0, %v240_v48, 0.0 }
 0x1b0   :  { %v2710_v15 = vsel %vm2077_vm15, %v2709_v53, %v2705_v60  ;;  %v837_v62 = vpop.xlane.xlu1 %836  ;;  %v834_v63 = vpop.xlane.xlu0 %833  ;;  %v1072_v6 = vsel %vm399_vm0, %v239_v49, 0.0 }
 0x1b1   :  { %v2718_v25 = vrot.slane %v837_v62, %v4476_v29  ;;  %v2714_v2 = vrot.slane %v834_v63, %v4473_v28  ;;  %v5425_v4 = vsel %vm3902_vm10, %v2710_v15, %v5227_v42  ;;  %v235_v42 = vld [vmem:[%s6797_s0 + $0x6e0] sm:$0xff]  ;;  %v242_v15 = vld [vmem:[%s6797_s0 + $0x718] sm:$0xff]  ;;  %v241_v62 = vld [vmem:[%s6797_s0 + $0x710] sm:$0xff] }
 0x1b2   :  { %v1060_v26 = vsel %vm399_vm0, %v235_v42, 0.0  ;;  %v1078_v3 = vsel %vm399_vm0, %v241_v62, 0.0 }
 0x1b3   :  { %v2719_v5 = vsel %vm1979_vm1, %v2718_v25, %v2714_v2  ;;  %1052 = vadd.xlane.f32.xlu1 %v1051_v0  ;;  %1049 = vadd.xlane.f32.xlu0 %v1048_v1  ;;  %v1081_v2 = vsel %vm399_vm0, %v242_v15, 0.0 }
 0x1b4   :  { %v843_v8 = vpop.xlane.xlu1 %842  ;;  %v840_v9 = vpop.xlane.xlu0 %839 }
 0x1b5   :  { %v2728_v14 = vrot.slane %v843_v8, %v4490_v35  ;;  %v2723_v16 = vrot.slane %v840_v9, %v4487_v34  ;;  %v288_v8 = vld [vmem:[%s6797_s0 + $0x888] sm:$0xff]  ;;  %v287_v9 = vld [vmem:[%s6797_s0 + $0x880] sm:$0xff] }
 0x1b6   :  { %v1219_v17 = vsel %vm399_vm0, %v288_v8, 0.0  ;;  %v1216_v42 = vsel %vm399_vm0, %v287_v9, 0.0 }
 0x1b7   :  { %v2724_v44 = vsel %vm1986_vm2, %v2723_v16, %v2719_v5  ;;  %1058 = vadd.xlane.f32.xlu1 %v1057_v10  ;;  %1055 = vadd.xlane.f32.xlu0 %v1054_v12 }
 0x1b8   :  { %v849_v19 = vpop.xlane.xlu1 %848  ;;  %v2729_v20 = vsel %vm1993_vm3, %v2728_v14, %v2724_v44  ;;  %v846_v21 = vpop.xlane.xlu0 %845 }
 0x1b9   :  { %v2738_v27 = vrot.slane %v849_v19, %v4505_v46  ;;  %v2733_v30 = vrot.slane %v846_v21, %v4508_v47  ;;  %v319_v21 = vld [vmem:[%s6797_s0 + $0x980] sm:$0xff] }
 0x1ba   :  { %v1312_v33 = vsel %vm399_vm0, %v319_v21, 0.0 }
 0x1bb   :  { %v2734_v36 = vsel %vm2000_vm4, %v2733_v30, %v2729_v20  ;;  %1064 = vadd.xlane.f32.xlu1 %v1063_v24  ;;  %1061 = vadd.xlane.f32.xlu0 %v1060_v26  ;;  %v320_v20 = vld [vmem:[%s6797_s0 + $0x988] sm:$0xff] }
 0x1bc   :  { %v855_v37 = vpop.xlane.xlu1 %854  ;;  %v2739_v11 = vsel %vm2007_vm5, %v2738_v27, %v2734_v36  ;;  %v852_v58 = vpop.xlane.xlu0 %851  ;;  %v1315_v32 = vsel %vm399_vm0, %v320_v20, 0.0 }
 0x1bd   :  { %v2748_v40 = vrot.slane %v855_v37, %v4517_v56  ;;  %v2743_v43 = vrot.slane %v852_v58, %v4520_v57  ;;  %v271_v58 = vld [vmem:[%s6797_s0 + $0x800] sm:$0xff] }
 0x1be   :  { %v1168_v49 = vsel %vm399_vm0, %v271_v58, 0.0 }
 0x1bf   :  { %v2744_v50 = vsel %vm2014_vm6, %v2743_v43, %v2739_v11  ;;  %1070 = vadd.xlane.f32.xlu1 %v1069_v38  ;;  %1067 = vadd.xlane.f32.xlu0 %v1066_v39  ;;  %v272_v11 = vld [vmem:[%s6797_s0 + $0x808] sm:$0xff] }
 0x1c0   :  { %v861_v51 = vpop.xlane.xlu1 %860  ;;  %v2749_v52 = vsel %vm2021_vm7, %v2748_v40, %v2744_v50  ;;  %v858_v53 = vpop.xlane.xlu0 %857  ;;  %v1171_v48 = vsel %vm399_vm0, %v272_v11, 0.0 }
 0x1c1   :  { %v2758_v55 = vrot.slane %v861_v51, %v4538_v7  ;;  %v2753_v60 = vrot.slane %v858_v53, %v4550_v13  ;;  %v289_v53 = vld [vmem:[%s6797_s0 + $0x890] sm:$0xff] }
 0x1c2   :  { %v1222_v62 = vsel %vm399_vm0, %v289_v53, 0.0 }
 0x1c3   :  { %v2754_v63 = vsel %vm2028_vm8, %v2753_v60, %v2749_v52  ;;  %1076 = vadd.xlane.f32.xlu1 %v1075_v54  ;;  %1073 = vadd.xlane.f32.xlu0 %v1072_v6  ;;  %v303_v52 = vld [vmem:[%s6797_s0 + $0x900] sm:$0xff] }
 0x1c4   :  { %v867_v0 = vpop.xlane.xlu1 %866  ;;  %v2759_v1 = vsel %vm2035_vm9, %v2758_v55, %v2754_v63  ;;  %v864_v25 = vpop.xlane.xlu0 %863  ;;  %v1264_v15 = vsel %vm399_vm0, %v303_v52, 0.0 }
 0x1c5   :  { %v2768_v18 = vrot.slane %v867_v0, %v4558_v23  ;;  %v2763_v5 = vrot.slane %v864_v25, %v4570_v31 }
 0x1c7   :  { %v2764_v10 = vsel %vm6817_vm12, %v2763_v5, %v2759_v1  ;;  %1082 = vadd.xlane.f32.xlu1 %v1081_v2  ;;  %1079 = vadd.xlane.f32.xlu0 %v1078_v3  ;;  %vm6818_vm12 = vcmask 851712   ;;  %v321_v1 = vld [vmem:[%s6797_s0 + $0x990] sm:$0xff] }
 0x1c8   :  { %v873_v12 = vpop.xlane.xlu1 %872  ;;  %v2769_v14 = vsel %vm2049_vm11, %v2768_v18, %v2764_v10  ;;  %v870_v16 = vpop.xlane.xlu0 %869  ;;  %v1318_v5 = vsel %vm399_vm0, %v321_v1, 0.0 }
 0x1c9   :  { %v2778_v44 = vrot.slane %v873_v12, %v4578_v41  ;;  %v2773_v19 = vrot.slane %v870_v16, %v4584_v45  ;;  %v352_v12 = vld [vmem:[%s6797_s0 + $0xa88] sm:$0xff] }
 0x1cb   :  { %v2774_v24 = vsel %vm6818_vm12, %v2773_v19, %v2769_v14  ;;  %1220 = vadd.xlane.f32.xlu1 %v1219_v17  ;;  %1217 = vadd.xlane.f32.xlu0 %v1216_v42  ;;  %v351_v14 = vld [vmem:[%s6797_s0 + $0xa80] sm:$0xff]  ;;  %v1411_v19 = vsel %vm399_vm0, %v352_v12, 0.0 }
 0x1cc   :  { %v879_v26 = vpop.xlane.xlu1 %878  ;;  %v2779_v27 = vsel %vm2063_vm13, %v2778_v44, %v2774_v24  ;;  %v876_v30 = vpop.xlane.xlu0 %875  ;;  %v1408_v20 = vsel %vm399_vm0, %v351_v14, 0.0 }
 0x1cd   :  { %v2788_v36 = vrot.slane %v879_v26, %v4598_v59  ;;  %v2783_v37 = vrot.slane %v876_v30, %v4603_v61  ;;  %v256_v26 = vld [vmem:[%s6797_s0 + $0x788] sm:$0xff] }
 0x1cf   :  { %v2784_v38 = vsel %vm2070_vm14, %v2783_v37, %v2779_v27  ;;  %1316 = vadd.xlane.f32.xlu1 %v1315_v32  ;;  %1313 = vadd.xlane.f32.xlu0 %v1312_v33  ;;  %v255_v27 = vld [vmem:[%s6797_s0 + $0x780] sm:$0xff]  ;;  %v1123_v37 = vsel %vm399_vm0, %v256_v26, 0.0 }
 0x1d0   :  { %v2789_v39 = vsel %vm2077_vm15, %v2788_v36, %v2784_v38  ;;  %v885_v40 = vpop.xlane.xlu1 %884  ;;  %v882_v43 = vpop.xlane.xlu0 %881  ;;  %v1120_v11 = vsel %vm399_vm0, %v255_v27, 0.0 }
 0x1d1   :  { %v2797_v50 = vrot.slane %v885_v40, %v4476_v29  ;;  %v2793_v51 = vrot.slane %v882_v43, %v4473_v28  ;;  %v5524_v54 = vsel %vm3902_vm10, %v2789_v39, %v5326_v22  ;;  %v304_v22 = vld [vmem:[%s6797_s0 + $0x908] sm:$0xff]  ;;  %v290_v39 = vld [vmem:[%s6797_s0 + $0x898] sm:$0xff]  ;;  %v273_v40 = vld [vmem:[%s6797_s0 + $0x810] sm:$0xff]  ;;  %vm6819_vm10 = vcmask 720512  }
 0x1d2   :  { %v1267_v8 = vsel %vm399_vm0, %v304_v22, 0.0  ;;  %v1174_v52 = vsel %vm399_vm0, %v273_v40, 0.0 }
 0x1d3   :  { %v2798_v6 = vsel %vm1979_vm1, %v2797_v50, %v2793_v51  ;;  %1172 = vadd.xlane.f32.xlu1 %v1171_v48  ;;  %1169 = vadd.xlane.f32.xlu0 %v1168_v49  ;;  %v1225_v51 = vsel %vm399_vm0, %v290_v39, 0.0 }
 0x1d4   :  { %v891_v55 = vpop.xlane.xlu1 %890  ;;  %v888_v60 = vpop.xlane.xlu0 %887 }
 0x1d5   :  { %v2807_v63 = vrot.slane %v891_v55, %v4490_v35  ;;  %v2802_v0 = vrot.slane %v888_v60, %v4487_v34  ;;  %v322_v55 = vld [vmem:[%s6797_s0 + $0x998] sm:$0xff]  ;;  %v305_v60 = vld [vmem:[%s6797_s0 + $0x910] sm:$0xff] }
 0x1d6   :  { %v1321_v1 = vsel %vm399_vm0, %v322_v55, 0.0  ;;  %v1270_v22 = vsel %vm399_vm0, %v305_v60, 0.0 }
 0x1d7   :  { %v2803_v25 = vsel %vm1986_vm2, %v2802_v0, %v2798_v6  ;;  %1265 = vadd.xlane.f32.xlu1 %v1264_v15  ;;  %1223 = vadd.xlane.f32.xlu0 %v1222_v62 }
 0x1d8   :  { %v897_v2 = vpop.xlane.xlu1 %896  ;;  %v2808_v3 = vsel %vm1993_vm3, %v2807_v63, %v2803_v25  ;;  %v894_v18 = vpop.xlane.xlu0 %893 }
 0x1d9   :  { %v2817_v9 = vrot.slane %v897_v2, %v4505_v46  ;;  %v2812_v10 = vrot.slane %v894_v18, %v4508_v47  ;;  %v335_v18 = vld [vmem:[%s6797_s0 + $0xa00] sm:$0xff] }
 0x1da   :  { %v1360_v14 = vsel %vm399_vm0, %v335_v18, 0.0 }
 0x1db   :  { %v2813_v16 = vsel %vm2000_vm4, %v2812_v10, %v2808_v3  ;;  %1319 = vadd.xlane.f32.xlu1 %v1318_v5  ;;  %1268 = vadd.xlane.f32.xlu0 %v1267_v8  ;;  %v336_v3 = vld [vmem:[%s6797_s0 + $0xa08] sm:$0xff] }
 0x1dc   :  { %v903_v17 = vpop.xlane.xlu1 %902  ;;  %v2818_v42 = vsel %vm2007_vm5, %v2817_v9, %v2813_v16  ;;  %v900_v44 = vpop.xlane.xlu0 %899  ;;  %v1363_v12 = vsel %vm399_vm0, %v336_v3, 0.0 }
 0x1dd   :  { %v2827_v21 = vrot.slane %v903_v17, %v4517_v56  ;;  %v2822_v24 = vrot.slane %v900_v44, %v4520_v57  ;;  %v353_v44 = vld [vmem:[%s6797_s0 + $0xa90] sm:$0xff] }
 0x1de   :  { %v1414_v26 = vsel %vm399_vm0, %v353_v44, 0.0 }
 0x1df   :  { %v2823_v30 = vsel %vm2014_vm6, %v2822_v24, %v2818_v42  ;;  %1412 = vadd.xlane.f32.xlu1 %v1411_v19  ;;  %1409 = vadd.xlane.f32.xlu0 %v1408_v20  ;;  %v383_v42 = vld [vmem:[%s6797_s0 + $0xb80] sm:$0xff] }
 0x1e0   :  { %v909_v32 = vpop.xlane.xlu1 %908  ;;  %v2828_v33 = vsel %vm2021_vm7, %v2827_v21, %v2823_v30  ;;  %v906_v36 = vpop.xlane.xlu0 %905  ;;  %v1504_v24 = vsel %vm399_vm0, %v383_v42, 0.0 }
 0x1e1   :  { %v2837_v58 = vrot.slane %v909_v32, %v4538_v7  ;;  %v2832_v38 = vrot.slane %v906_v36, %v4550_v13  ;;  %v384_v36 = vld [vmem:[%s6797_s0 + $0xb88] sm:$0xff] }
 0x1e2   :  { %v1507_v40 = vsel %vm399_vm0, %v384_v36, 0.0 }
 0x1e3   :  { %v2833_v43 = vsel %vm2028_vm8, %v2832_v38, %v2828_v33  ;;  %1124 = vadd.xlane.f32.xlu1 %v1123_v37  ;;  %1121 = vadd.xlane.f32.xlu0 %v1120_v11  ;;  %v257_v33 = vld [vmem:[%s6797_s0 + $0x790] sm:$0xff] }
 0x1e4   :  { %v915_v48 = vpop.xlane.xlu1 %914  ;;  %v2838_v49 = vsel %vm2035_vm9, %v2837_v58, %v2833_v43  ;;  %v912_v50 = vpop.xlane.xlu0 %911  ;;  %v1126_v39 = vsel %vm399_vm0, %v257_v33, 0.0 }
 0x1e5   :  { %v2847_v53 = vrot.slane %v915_v48, %v4558_v23  ;;  %v2842_v6 = vrot.slane %v912_v50, %v4570_v31 }
 0x1e7   :  { %v2843_v15 = vsel %vm6819_vm10, %v2842_v6, %v2838_v49  ;;  %1226 = vadd.xlane.f32.xlu1 %v1225_v51  ;;  %1175 = vadd.xlane.f32.xlu0 %v1174_v52  ;;  %vm3904_vm10 = vcmask 1045509   ;;  %v291_v49 = vld [vmem:[%s6797_s0 + $0x8a0] sm:$0xff] }
 0x1e8   :  { %v921_v62 = vpop.xlane.xlu1 %920  ;;  %v2848_v63 = vsel %vm2049_vm11, %v2847_v53, %v2843_v15  ;;  %v918_v0 = vpop.xlane.xlu0 %917  ;;  %v1228_v6 = vsel %vm399_vm0, %v291_v49, 0.0 }
 0x1e9   :  { %v2857_v25 = vrot.slane %v921_v62, %v4578_v41  ;;  %v2852_v2 = vrot.slane %v918_v0, %v4584_v45  ;;  %v323_v62 = vld [vmem:[%s6797_s0 + $0x9a0] sm:$0xff] }
 0x1eb   :  { %v2853_v5 = vsel %vm6818_vm12, %v2852_v2, %v2848_v63  ;;  %1322 = vadd.xlane.f32.xlu1 %v1321_v1  ;;  %1271 = vadd.xlane.f32.xlu0 %v1270_v22  ;;  %v306_v63 = vld [vmem:[%s6797_s0 + $0x918] sm:$0xff]  ;;  %v1324_v2 = vsel %vm399_vm0, %v323_v62, 0.0  ;;  %vm6820_vm12 = vcmask 720512  }
 0x1ec   :  { %v927_v8 = vpop.xlane.xlu1 %926  ;;  %v2858_v9 = vsel %vm2063_vm13, %v2857_v25, %v2853_v5  ;;  %v924_v10 = vpop.xlane.xlu0 %923  ;;  %v1273_v3 = vsel %vm399_vm0, %v306_v63, 0.0 }
 0x1ed   :  { %v2867_v16 = vrot.slane %v927_v8, %v4598_v59  ;;  %v2862_v17 = vrot.slane %v924_v10, %v4603_v61  ;;  %v354_v8 = vld [vmem:[%s6797_s0 + $0xa98] sm:$0xff] }
 0x1ef   :  { %v2863_v19 = vsel %vm2070_vm14, %v2862_v17, %v2858_v9  ;;  %1364 = vadd.xlane.f32.xlu1 %v1363_v12  ;;  %1361 = vadd.xlane.f32.xlu0 %v1360_v14  ;;  %v337_v9 = vld [vmem:[%s6797_s0 + $0xa10] sm:$0xff]  ;;  %v1417_v17 = vsel %vm399_vm0, %v354_v8, 0.0 }
 0x1f0   :  { %v933_v20 = vpop.xlane.xlu1 %932  ;;  %v930_v21 = vpop.xlane.xlu0 %929  ;;  %v2868_v27 = vsel %vm2077_vm15, %v2867_v16, %v2863_v19  ;;  %v1366_v42 = vsel %vm399_vm0, %v337_v9, 0.0 }
 0x1f1   :  { %v2876_v30 = vrot.slane %v933_v20, %v4476_v29  ;;  %v2872_v32 = vrot.slane %v930_v21, %v4473_v28  ;;  %v5623_v37 = vsel %vm3904_vm10, %v2868_v27, %v5425_v4  ;;  %v274_v4 = vld [vmem:[%s6797_s0 + $0x818] sm:$0xff]  ;;  %v368_v20 = vld [vmem:[%s6797_s0 + $0xb08] sm:$0xff]  ;;  %v367_v21 = vld [vmem:[%s6797_s0 + $0xb00] sm:$0xff] }
 0x1f2   :  { %v1177_v55 = vsel %vm399_vm0, %v274_v4, 0.0  ;;  %v1456_v33 = vsel %vm399_vm0, %v367_v21, 0.0 }
 0x1f3   :  { %v2877_v11 = vsel %vm1979_vm1, %v2876_v30, %v2872_v32  ;;  %1505 = vadd.xlane.f32.xlu1 %v1504_v24  ;;  %1415 = vadd.xlane.f32.xlu0 %v1414_v26  ;;  %v1459_v32 = vsel %vm399_vm0, %v368_v20, 0.0 }
 0x1f4   :  { %v939_v58 = vpop.xlane.xlu1 %938  ;;  %v936_v38 = vpop.xlane.xlu0 %935 }
 0x1f5   :  { %v2886_v43 = vrot.slane %v939_v58, %v4490_v35  ;;  %v2881_v48 = vrot.slane %v936_v38, %v4487_v34  ;;  %v258_v58 = vld [vmem:[%s6797_s0 + $0x798] sm:$0xff]  ;;  %v385_v38 = vld [vmem:[%s6797_s0 + $0xb90] sm:$0xff] }
 0x1f6   :  { %v1129_v49 = vsel %vm399_vm0, %v258_v58, 0.0  ;;  %v1510_v4 = vsel %vm399_vm0, %v385_v38, 0.0 }
 0x1f7   :  { %v2882_v50 = vsel %vm1986_vm2, %v2881_v48, %v2877_v11  ;;  %1127 = vadd.xlane.f32.xlu1 %v1126_v39  ;;  %1508 = vadd.xlane.f32.xlu0 %v1507_v40 }
 0x1f8   :  { %v945_v51 = vpop.xlane.xlu1 %944  ;;  %v2887_v52 = vsel %vm1993_vm3, %v2886_v43, %v2882_v50  ;;  %v942_v53 = vpop.xlane.xlu0 %941 }
 0x1f9   :  { %v2896_v60 = vrot.slane %v945_v51, %v4505_v46  ;;  %v2891_v15 = vrot.slane %v942_v53, %v4508_v47  ;;  %v275_v53 = vld [vmem:[%s6797_s0 + $0x820] sm:$0xff] }
 0x1fa   :  { %v1180_v63 = vsel %vm399_vm0, %v275_v53, 0.0 }
 0x1fb   :  { %v2892_v0 = vsel %vm2000_vm4, %v2891_v15, %v2887_v52  ;;  %1229 = vadd.xlane.f32.xlu1 %v1228_v6  ;;  %1178 = vadd.xlane.f32.xlu0 %v1177_v55  ;;  %v292_v52 = vld [vmem:[%s6797_s0 + $0x8a8] sm:$0xff] }
 0x1fc   :  { %v951_v1 = vpop.xlane.xlu1 %950  ;;  %v2897_v22 = vsel %vm2007_vm5, %v2896_v60, %v2892_v0  ;;  %v948_v25 = vpop.xlane.xlu0 %947  ;;  %v1231_v62 = vsel %vm399_vm0, %v292_v52, 0.0 }
 0x1fd   :  { %v2906_v18 = vrot.slane %v951_v1, %v4517_v56  ;;  %v2901_v5 = vrot.slane %v948_v25, %v4520_v57  ;;  %v307_v25 = vld [vmem:[%s6797_s0 + $0x920] sm:$0xff] }
 0x1fe   :  { %v1276_v8 = vsel %vm399_vm0, %v307_v25, 0.0 }
 0x1ff   :  { %v2902_v10 = vsel %vm2014_vm6, %v2901_v5, %v2897_v22  ;;  %1325 = vadd.xlane.f32.xlu1 %v1324_v2  ;;  %1274 = vadd.xlane.f32.xlu0 %v1273_v3  ;;  %v324_v22 = vld [vmem:[%s6797_s0 + $0x9a8] sm:$0xff] }
 0x200   :  { %v957_v12 = vpop.xlane.xlu1 %956  ;;  %v2907_v14 = vsel %vm2021_vm7, %v2906_v18, %v2902_v10  ;;  %v954_v16 = vpop.xlane.xlu0 %953  ;;  %v1327_v5 = vsel %vm399_vm0, %v324_v22, 0.0 }
 0x201   :  { %v2916_v44 = vrot.slane %v957_v12, %v4538_v7  ;;  %v2911_v19 = vrot.slane %v954_v16, %v4550_v13  ;;  %v338_v16 = vld [vmem:[%s6797_s0 + $0xa18] sm:$0xff] }
 0x202   :  { %v1369_v21 = vsel %vm399_vm0, %v338_v16, 0.0 }
 0x203   :  { %v2912_v24 = vsel %vm2028_vm8, %v2911_v19, %v2907_v14  ;;  %1418 = vadd.xlane.f32.xlu1 %v1417_v17  ;;  %1367 = vadd.xlane.f32.xlu0 %v1366_v42  ;;  %v355_v14 = vld [vmem:[%s6797_s0 + $0xaa0] sm:$0xff] }
 0x204   :  { %v963_v26 = vpop.xlane.xlu1 %962  ;;  %v2917_v27 = vsel %vm2035_vm9, %v2916_v44, %v2912_v24  ;;  %v960_v30 = vpop.xlane.xlu0 %959  ;;  %v1420_v20 = vsel %vm399_vm0, %v355_v14, 0.0 }
 0x205   :  { %v2926_v36 = vrot.slane %v963_v26, %v4558_v23  ;;  %v2921_v11 = vrot.slane %v960_v30, %v4570_v31 }
 0x207   :  { %v2922_v39 = vsel %vm6820_vm12, %v2921_v11, %v2917_v27  ;;  %1460 = vadd.xlane.f32.xlu1 %v1459_v32  ;;  %1457 = vadd.xlane.f32.xlu0 %v1456_v33  ;;  %vm6821_vm12 = vcmask 851712   ;;  %v386_v27 = vld [vmem:[%s6797_s0 + $0xb98] sm:$0xff] }
 0x208   :  { %v969_v40 = vpop.xlane.xlu1 %968  ;;  %v2927_v43 = vsel %vm2049_vm11, %v2926_v36, %v2922_v39  ;;  %v966_v48 = vpop.xlane.xlu0 %965  ;;  %v1513_v11 = vsel %vm399_vm0, %v386_v27, 0.0 }
 0x209   :  { %v2936_v50 = vrot.slane %v969_v40, %v4578_v41  ;;  %v2931_v51 = vrot.slane %v966_v48, %v4584_v45  ;;  %v276_v40 = vld [vmem:[%s6797_s0 + $0x828] sm:$0xff] }
 0x20b   :  { %v2932_v6 = vsel %vm6821_vm12, %v2931_v51, %v2927_v43  ;;  %1130 = vadd.xlane.f32.xlu1 %v1129_v49  ;;  %1511 = vadd.xlane.f32.xlu0 %v1510_v4  ;;  %v259_v43 = vld [vmem:[%s6797_s0 + $0x7a0] sm:$0xff]  ;;  %v1183_v51 = vsel %vm399_vm0, %v276_v40, 0.0 }
 0x20c   :  { %v975_v55 = vpop.xlane.xlu1 %974  ;;  %v2937_v60 = vsel %vm2063_vm13, %v2936_v50, %v2932_v6  ;;  %v972_v15 = vpop.xlane.xlu0 %971  ;;  %v1132_v52 = vsel %vm399_vm0, %v259_v43, 0.0 }
 0x20d   :  { %v2946_v0 = vrot.slane %v975_v55, %v4598_v59  ;;  %v2941_v1 = vrot.slane %v972_v15, %v4603_v61  ;;  %v308_v55 = vld [vmem:[%s6797_s0 + $0x928] sm:$0xff] }
 0x20f   :  { %v2942_v2 = vsel %vm2070_vm14, %v2941_v1, %v2937_v60  ;;  %1232 = vadd.xlane.f32.xlu1 %v1231_v62  ;;  %1181 = vadd.xlane.f32.xlu0 %v1180_v63  ;;  %v293_v60 = vld [vmem:[%s6797_s0 + $0x8b0] sm:$0xff]  ;;  %v1279_v1 = vsel %vm399_vm0, %v308_v55, 0.0 }
 0x210   :  { %v981_v3 = vpop.xlane.xlu1 %980  ;;  %v978_v18 = vpop.xlane.xlu0 %977  ;;  %v2947_v9 = vsel %vm2077_vm15, %v2946_v0, %v2942_v2  ;;  %v1234_v22 = vsel %vm399_vm0, %v293_v60, 0.0 }
 0x211   :  { %v2955_v10 = vrot.slane %v981_v3, %v4476_v29  ;;  %v2951_v12 = vrot.slane %v978_v18, %v4473_v28  ;;  %v5722_v17 = vsel %vm3904_vm10, %v2947_v9, %v5524_v54  ;;  %v369_v54 = vld [vmem:[%s6797_s0 + $0xb10] sm:$0xff]  ;;  %v339_v3 = vld [vmem:[%s6797_s0 + $0xa20] sm:$0xff]  ;;  %vm6822_vm10 = vcmask 720512  }
 0x212   :  { %v1462_v58 = vsel %vm399_vm0, %v369_v54, 0.0  ;;  %v325_v18 = vld [vmem:[%s6797_s0 + $0x9b0] sm:$0xff] }
 0x213   :  { %v2956_v42 = vsel %vm1979_vm1, %v2955_v10, %v2951_v12  ;;  %1328 = vadd.xlane.f32.xlu1 %v1327_v5  ;;  %1277 = vadd.xlane.f32.xlu0 %v1276_v8  ;;  %v1372_v12 = vsel %vm399_vm0, %v339_v3, 0.0  ;;  %v1330_v14 = vsel %vm399_vm0, %v325_v18, 0.0 }
 0x214   :  { %v987_v44 = vpop.xlane.xlu1 %986  ;;  %v984_v19 = vpop.xlane.xlu0 %983 }
 0x215   :  { %v2965_v24 = vrot.slane %v987_v44, %v4490_v35  ;;  %v2960_v26 = vrot.slane %v984_v19, %v4487_v34  ;;  %v370_v44 = vld [vmem:[%s6797_s0 + $0xb18] sm:$0xff]  ;;  %v356_v19 = vld [vmem:[%s6797_s0 + $0xaa8] sm:$0xff] }
 0x216   :  { %v1465_v27 = vsel %vm399_vm0, %v370_v44, 0.0  ;;  %v1423_v54 = vsel %vm399_vm0, %v356_v19, 0.0 }
 0x217   :  { %v2961_v30 = vsel %vm1986_vm2, %v2960_v26, %v2956_v42  ;;  %1421 = vadd.xlane.f32.xlu1 %v1420_v20  ;;  %1370 = vadd.xlane.f32.xlu0 %v1369_v21 }
 0x218   :  { %v993_v32 = vpop.xlane.xlu1 %992  ;;  %v2966_v33 = vsel %vm1993_vm3, %v2965_v24, %v2961_v30  ;;  %v990_v36 = vpop.xlane.xlu0 %989 }
 0x219   :  { %v2975_v38 = vrot.slane %v993_v32, %v4505_v46  ;;  %v2970_v39 = vrot.slane %v990_v36, %v4508_v47  ;;  %v387_v36 = vld [vmem:[%s6797_s0 + $0xba0] sm:$0xff] }
 0x21a   :  { %v1516_v43 = vsel %vm399_vm0, %v387_v36, 0.0 }
 0x21b   :  { %v2971_v48 = vsel %vm2000_vm4, %v2970_v39, %v2966_v33  ;;  %1514 = vadd.xlane.f32.xlu1 %v1513_v11  ;;  %1463 = vadd.xlane.f32.xlu0 %v1462_v58  ;;  %v243_v33 = vld [vmem:[%s6797_s0 + $0x720] sm:$0xff] }
 0x21c   :  { %v999_v49 = vpop.xlane.xlu1 %998  ;;  %v2976_v4 = vsel %vm2007_vm5, %v2975_v38, %v2971_v48  ;;  %v996_v50 = vpop.xlane.xlu0 %995  ;;  %v1084_v40 = vsel %vm399_vm0, %v243_v33, 0.0 }
 0x21d   :  { %v2985_v53 = vrot.slane %v999_v49, %v4517_v56  ;;  %v2980_v6 = vrot.slane %v996_v50, %v4520_v57  ;;  %v260_v50 = vld [vmem:[%s6797_s0 + $0x7a8] sm:$0xff] }
 0x21e   :  { %v1135_v55 = vsel %vm399_vm0, %v260_v50, 0.0 }
 0x21f   :  { %v2981_v15 = vsel %vm2014_vm6, %v2980_v6, %v2976_v4  ;;  %1184 = vadd.xlane.f32.xlu1 %v1183_v51  ;;  %1133 = vadd.xlane.f32.xlu0 %v1132_v52  ;;  %v277_v4 = vld [vmem:[%s6797_s0 + $0x830] sm:$0xff] }
 0x220   :  { %v1005_v62 = vpop.xlane.xlu1 %1004  ;;  %v2986_v63 = vsel %vm2021_vm7, %v2985_v53, %v2981_v15  ;;  %v1002_v0 = vpop.xlane.xlu0 %1001  ;;  %v1186_v6 = vsel %vm399_vm0, %v277_v4, 0.0 }
 0x221   :  { %v2995_v25 = vrot.slane %v1005_v62, %v4538_v7  ;;  %v2990_v2 = vrot.slane %v1002_v0, %v4550_v13  ;;  %v294_v0 = vld [vmem:[%s6797_s0 + $0x8b8] sm:$0xff] }
 0x222   :  { %v1237_v18 = vsel %vm399_vm0, %v294_v0, 0.0 }
 0x223   :  { %v2991_v5 = vsel %vm2028_vm8, %v2990_v2, %v2986_v63  ;;  %1280 = vadd.xlane.f32.xlu1 %v1279_v1  ;;  %1235 = vadd.xlane.f32.xlu0 %v1234_v22  ;;  %v309_v63 = vld [vmem:[%s6797_s0 + $0x930] sm:$0xff] }
 0x224   :  { %v1011_v8 = vpop.xlane.xlu1 %1010  ;;  %v2996_v9 = vsel %vm2035_vm9, %v2995_v25, %v2991_v5  ;;  %v1008_v10 = vpop.xlane.xlu0 %1007  ;;  %v1282_v3 = vsel %vm399_vm0, %v309_v63, 0.0 }
 0x225   :  { %v3005_v16 = vrot.slane %v1011_v8, %v4558_v23  ;;  %v3000_v42 = vrot.slane %v1008_v10, %v4570_v31 }
 0x227   :  { %v3001_v20 = vsel %vm6822_vm10, %v3000_v42, %v2996_v9  ;;  %1373 = vadd.xlane.f32.xlu1 %v1372_v12  ;;  %1331 = vadd.xlane.f32.xlu0 %v1330_v14  ;;  %vm3906_vm10 = vcmask 1046534   ;;  %v340_v9 = vld [vmem:[%s6797_s0 + $0xa28] sm:$0xff] }
 0x228   :  { %v1017_v21 = vpop.xlane.xlu1 %1016  ;;  %v3006_v24 = vsel %vm2049_vm11, %v3005_v16, %v3001_v20  ;;  %v1014_v26 = vpop.xlane.xlu0 %1013  ;;  %v1375_v42 = vsel %vm399_vm0, %v340_v9, 0.0 }
 0x229   :  { %v3015_v30 = vrot.slane %v1017_v21, %v4578_v41  ;;  %v3010_v32 = vrot.slane %v1014_v26, %v4584_v45  ;;  %v371_v21 = vld [vmem:[%s6797_s0 + $0xb20] sm:$0xff] }
 0x22b   :  { %v3011_v11 = vsel %vm6821_vm12, %v3010_v32, %v3006_v24  ;;  %1466 = vadd.xlane.f32.xlu1 %v1465_v27  ;;  %1424 = vadd.xlane.f32.xlu0 %v1423_v54  ;;  %v357_v24 = vld [vmem:[%s6797_s0 + $0xab0] sm:$0xff]  ;;  %v1468_v32 = vsel %vm399_vm0, %v371_v21, 0.0  ;;  %vm6823_vm12 = vcmask 720512  }
 0x22c   :  { %v1023_v58 = vpop.xlane.xlu1 %1022  ;;  %v3016_v38 = vsel %vm2063_vm13, %v3015_v30, %v3011_v11  ;;  %v1020_v39 = vpop.xlane.xlu0 %1019  ;;  %v1426_v33 = vsel %vm399_vm0, %v357_v24, 0.0 }
 0x22d   :  { %v3025_v48 = vrot.slane %v1023_v58, %v4598_v59  ;;  %v3020_v49 = vrot.slane %v1020_v39, %v4603_v61  ;;  %v244_v58 = vld [vmem:[%s6797_s0 + $0x728] sm:$0xff] }
 0x22f   :  { %v3021_v51 = vsel %vm2070_vm14, %v3020_v49, %v3016_v38  ;;  %1085 = vadd.xlane.f32.xlu1 %v1084_v40  ;;  %1517 = vadd.xlane.f32.xlu0 %v1516_v43  ;;  %v388_v38 = vld [vmem:[%s6797_s0 + $0xba8] sm:$0xff]  ;;  %v1087_v49 = vsel %vm399_vm0, %v244_v58, 0.0 }
 0x230   :  { %v1029_v52 = vpop.xlane.xlu1 %1028  ;;  %v1026_v53 = vpop.xlane.xlu0 %1025  ;;  %v3026_v60 = vsel %vm2077_vm15, %v3025_v48, %v3021_v51  ;;  %v1519_v4 = vsel %vm399_vm0, %v388_v38, 0.0 }
 0x231   :  { %v3034_v15 = vrot.slane %v1029_v52, %v4476_v29  ;;  %v3030_v62 = vrot.slane %v1026_v53, %v4473_v28  ;;  %v5821_v1 = vsel %vm3906_vm10, %v3026_v60, %v5623_v37  ;;  %v326_v37 = vld [vmem:[%s6797_s0 + $0x9b8] sm:$0xff]  ;;  %v261_v53 = vld [vmem:[%s6797_s0 + $0x7b0] sm:$0xff] }
 0x232   :  { %v1333_v44 = vsel %vm399_vm0, %v326_v37, 0.0  ;;  %v278_v52 = vld [vmem:[%s6797_s0 + $0x838] sm:$0xff]  ;;  %v1138_v63 = vsel %vm399_vm0, %v261_v53, 0.0 }
 0x233   :  { %v3035_v22 = vsel %vm1979_vm1, %v3034_v15, %v3030_v62  ;;  %1187 = vadd.xlane.f32.xlu1 %v1186_v6  ;;  %1136 = vadd.xlane.f32.xlu0 %v1135_v55  ;;  %v1189_v62 = vsel %vm399_vm0, %v278_v52, 0.0 }
 0x234   :  { %v1035_v25 = vpop.xlane.xlu1 %1034  ;;  %v1032_v2 = vpop.xlane.xlu0 %1031 }
 0x235   :  { %v3044_v5 = vrot.slane %v1035_v25, %v4490_v35  ;;  %v3039_v8 = vrot.slane %v1032_v2, %v4487_v34  ;;  %v310_v25 = vld [vmem:[%s6797_s0 + $0x938] sm:$0xff]  ;;  %v295_v2 = vld [vmem:[%s6797_s0 + $0x8c0] sm:$0xff] }
 0x236   :  { %v1285_v9 = vsel %vm399_vm0, %v310_v25, 0.0  ;;  %v1240_v37 = vsel %vm399_vm0, %v295_v2, 0.0 }
 0x237   :  { %v3040_v10 = vsel %vm1986_vm2, %v3039_v8, %v3035_v22  ;;  %1283 = vadd.xlane.f32.xlu1 %v1282_v3  ;;  %1238 = vadd.xlane.f32.xlu0 %v1237_v18 }
 0x238   :  { %v1041_v12 = vpop.xlane.xlu1 %1040  ;;  %v3045_v14 = vsel %vm1993_vm3, %v3044_v5, %v3040_v10  ;;  %v1038_v16 = vpop.xlane.xlu0 %1037 }
 0x239   :  { %v3054_v19 = vrot.slane %v1041_v12, %v4505_v46  ;;  %v3049_v20 = vrot.slane %v1038_v16, %v4508_v47  ;;  %v327_v16 = vld [vmem:[%s6797_s0 + $0x9c0] sm:$0xff] }
 0x23a   :  { %v1336_v24 = vsel %vm399_vm0, %v327_v16, 0.0 }
 0x23b   :  { %v3050_v26 = vsel %vm2000_vm4, %v3049_v20, %v3045_v14  ;;  %1376 = vadd.xlane.f32.xlu1 %v1375_v42  ;;  %1334 = vadd.xlane.f32.xlu0 %v1333_v44  ;;  %v341_v14 = vld [vmem:[%s6797_s0 + $0xa30] sm:$0xff] }
 0x23c   :  { %v1047_v27 = vpop.xlane.xlu1 %1046  ;;  %v3055_v54 = vsel %vm2007_vm5, %v3054_v19, %v3050_v26  ;;  %v1044_v30 = vpop.xlane.xlu0 %1043  ;;  %v1378_v21 = vsel %vm399_vm0, %v341_v14, 0.0 }
 0x23d   :  { %v3064_v36 = vrot.slane %v1047_v27, %v4517_v56  ;;  %v3059_v11 = vrot.slane %v1044_v30, %v4520_v57  ;;  %v358_v30 = vld [vmem:[%s6797_s0 + $0xab8] sm:$0xff] }
 0x23e   :  { %v1429_v58 = vsel %vm399_vm0, %v358_v30, 0.0  ;;  %v373_v30 = vld [vmem:[%s6797_s0 + $0xb30] sm:$0xff] }
 0x23f   :  { %v3060_v39 = vsel %vm2014_vm6, %v3059_v11, %v3055_v54  ;;  %1469 = vadd.xlane.f32.xlu1 %v1468_v32  ;;  %1427 = vadd.xlane.f32.xlu0 %v1426_v33  ;;  %v372_v54 = vld [vmem:[%s6797_s0 + $0xb28] sm:$0xff] }
 0x240   :  { %v1053_v40 = vpop.xlane.xlu1 %1052  ;;  %v3065_v43 = vsel %vm2021_vm7, %v3064_v36, %v3060_v39  ;;  %v1050_v48 = vpop.xlane.xlu0 %1049  ;;  %v1471_v11 = vsel %vm399_vm0, %v372_v54, 0.0 }
 0x241   :  { %v3074_v50 = vrot.slane %v1053_v40, %v4538_v7  ;;  %v3069_v51 = vrot.slane %v1050_v48, %v4550_v13  ;;  %v389_v48 = vld [vmem:[%s6797_s0 + $0xbb0] sm:$0xff] }
 0x242   :  { %v1522_v53 = vsel %vm399_vm0, %v389_v48, 0.0 }
 0x243   :  { %v3070_v6 = vsel %vm2028_vm8, %v3069_v51, %v3065_v43  ;;  %1088 = vadd.xlane.f32.xlu1 %v1087_v49  ;;  %1520 = vadd.xlane.f32.xlu0 %v1519_v4  ;;  %v245_v43 = vld [vmem:[%s6797_s0 + $0x730] sm:$0xff] }
 0x244   :  { %v1059_v55 = vpop.xlane.xlu1 %1058  ;;  %v3075_v60 = vsel %vm2035_vm9, %v3074_v50, %v3070_v6  ;;  %v1056_v15 = vpop.xlane.xlu0 %1055  ;;  %v1090_v52 = vsel %vm399_vm0, %v245_v43, 0.0  ;;  %v390_v43 = vld [vmem:[%s6797_s0 + $0xbb8] sm:$0xff] }
 0x245   :  { %v3084_v0 = vrot.slane %v1059_v55, %v4558_v23  ;;  %v3079_v22 = vrot.slane %v1056_v15, %v4570_v31 }
 0x247   :  { %v3080_v3 = vsel %vm6823_vm12, %v3079_v22, %v3075_v60  ;;  %1190 = vadd.xlane.f32.xlu1 %v1189_v62  ;;  %1139 = vadd.xlane.f32.xlu0 %v1138_v63  ;;  %vm6824_vm12 = vcmask 851712   ;;  %v279_v60 = vld [vmem:[%s6797_s0 + $0x840] sm:$0xff] }
 0x248   :  { %v1065_v18 = vpop.xlane.xlu1 %1064  ;;  %v3085_v5 = vsel %vm2049_vm11, %v3084_v0, %v3080_v3  ;;  %v1062_v8 = vpop.xlane.xlu0 %1061  ;;  %v1192_v0 = vsel %vm399_vm0, %v279_v60, 0.0  ;;  %v280_v60 = vld [vmem:[%s6797_s0 + $0x848] sm:$0xff] }
 0x249   :  { %v3094_v10 = vrot.slane %v1065_v18, %v4578_v41  ;;  %v3089_v12 = vrot.slane %v1062_v8, %v4584_v45  ;;  %v311_v18 = vld [vmem:[%s6797_s0 + $0x940] sm:$0xff] }
 0x24b   :  { %v3090_v42 = vsel %vm6824_vm12, %v3089_v12, %v3085_v5  ;;  %1286 = vadd.xlane.f32.xlu1 %v1285_v9  ;;  %1241 = vadd.xlane.f32.xlu0 %v1240_v37  ;;  %v296_v5 = vld [vmem:[%s6797_s0 + $0x8c8] sm:$0xff] }
 0x24c   :  { %v1071_v44 = vpop.xlane.xlu1 %1070  ;;  %v3095_v19 = vsel %vm2063_vm13, %v3094_v10, %v3090_v42  ;;  %v1068_v20 = vpop.xlane.xlu0 %1067  ;;  %v1288_v10 = vsel %vm399_vm0, %v311_v18, 0.0  ;;  %v1243_v12 = vsel %vm399_vm0, %v296_v5, 0.0  ;;  %v342_v42 = vld [vmem:[%s6797_s0 + $0xa38] sm:$0xff]  ;;  %v312_v5 = vld [vmem:[%s6797_s0 + $0x948] sm:$0xff] }
 0x24d   :  { %v3104_v26 = vrot.slane %v1071_v44, %v4598_v59  ;;  %v3099_v27 = vrot.slane %v1068_v20, %v4603_v61  ;;  %v328_v44 = vld [vmem:[%s6797_s0 + $0x9c8] sm:$0xff] }
 0x24f   :  { %v3100_v32 = vsel %vm2070_vm14, %v3099_v27, %v3095_v19  ;;  %1379 = vadd.xlane.f32.xlu1 %v1378_v21  ;;  %1337 = vadd.xlane.f32.xlu0 %v1336_v24  ;;  %v1381_v24 = vsel %vm399_vm0, %v342_v42, 0.0 }
 0x250   :  { %v1077_v33 = vpop.xlane.xlu1 %1076  ;;  %v1074_v36 = vpop.xlane.xlu0 %1073  ;;  %v3105_v38 = vsel %vm2077_vm15, %v3104_v26, %v3100_v32  ;;  %v1339_v26 = vsel %vm399_vm0, %v328_v44, 0.0  ;;  %v359_v32 = vld [vmem:[%s6797_s0 + $0xac0] sm:$0xff] }
 0x251   :  { %v3113_v39 = vrot.slane %v1077_v33, %v4476_v29  ;;  %v3109_v40 = vrot.slane %v1074_v36, %v4473_v28  ;;  %v5920_v49 = vsel %vm3906_vm10, %v3105_v38, %v5722_v17  ;;  %v262_v17 = vld [vmem:[%s6797_s0 + $0x7b8] sm:$0xff]  ;;  %v1432_v38 = vsel %vm399_vm0, %v359_v32, 0.0  ;;  %v343_v44 = vld [vmem:[%s6797_s0 + $0xa40] sm:$0xff] }
 0x252   :  { %v1141_v22 = vsel %vm399_vm0, %v262_v17, 0.0  ;;  %v263_v17 = vld [vmem:[%s6797_s0 + $0x7c0] sm:$0xff]  ;;  %v374_v32 = vld [vmem:[%s6797_s0 + $0xb38] sm:$0xff] }
 0x253   :  { %v3114_v4 = vsel %vm1979_vm1, %v3113_v39, %v3109_v40  ;;  %1472 = vadd.xlane.f32.xlu1 %v1471_v11  ;;  %1430 = vadd.xlane.f32.xlu0 %v1429_v58  ;;  %v1474_v58 = vsel %vm399_vm0, %v373_v30, 0.0  ;;  %v246_v40 = vld [vmem:[%s6797_s0 + $0x738] sm:$0xff] }
 0x254   :  { %v1083_v50 = vpop.xlane.xlu1 %1082  ;;  %v1080_v51 = vpop.xlane.xlu0 %1079 }
 0x255   :  { %v3123_v6 = vrot.slane %v1083_v50, %v4490_v35  ;;  %v3118_v55 = vrot.slane %v1080_v51, %v4487_v34  ;;  %v1093_v51 = vsel %vm399_vm0, %v246_v40, 0.0  ;;  %v1477_v40 = vsel %vm399_vm0, %v374_v32, 0.0 }
 0x257   :  { %v3119_v15 = vsel %vm1986_vm2, %v3118_v55, %v3114_v4  ;;  %1091 = vadd.xlane.f32.xlu1 %v1090_v52  ;;  %1523 = vadd.xlane.f32.xlu0 %v1522_v53  ;;  %v1525_v52 = vsel %vm399_vm0, %v390_v43, 0.0 }
 0x258   :  { %v1221_v62 = vpop.xlane.xlu1 %1220  ;;  %v1218_v63 = vpop.xlane.xlu0 %1217  ;;  %v5937_v25 = vsel %vm1993_vm3, %v3123_v6, %v3119_v15 }
 0x259   :  { %v3350_v2 = vrot.slane %v1221_v62, %v4476_v29  ;;  %v3346_v3 = vrot.slane %v1218_v63, %v4473_v28 }
 0x25b   :  { %v3351_v8 = vsel %vm1979_vm1, %v3350_v2, %v3346_v3  ;;  %1193 = vadd.xlane.f32.xlu1 %v1192_v0  ;;  %1142 = vadd.xlane.f32.xlu0 %v1141_v22  ;;  %v1195_v22 = vsel %vm399_vm0, %v280_v60, 0.0  ;;  %v1144_v2 = vsel %vm399_vm0, %v263_v17, 0.0 }
 0x25c   :  { %v1317_v9 = vpop.xlane.xlu1 %1316  ;;  %v1314_v37 = vpop.xlane.xlu0 %1313 }
 0x25d   :  { %v3508_v14 = vrot.slane %v1317_v9, %v4476_v29  ;;  %v3504_v16 = vrot.slane %v1314_v37, %v4473_v28 }
 0x25f   :  { %v3509_v19 = vsel %vm1979_vm1, %v3508_v14, %v3504_v16  ;;  %1289 = vadd.xlane.f32.xlu1 %v1288_v10  ;;  %1244 = vadd.xlane.f32.xlu0 %v1243_v12  ;;  %v1291_v12 = vsel %vm399_vm0, %v312_v5, 0.0 }
 0x260   :  { %v1173_v20 = vpop.xlane.xlu1 %1172  ;;  %v1170_v21 = vpop.xlane.xlu0 %1169 }
 0x261   :  { %v3271_v27 = vrot.slane %v1173_v20, %v4476_v29  ;;  %v3267_v54 = vrot.slane %v1170_v21, %v4473_v28 }
 0x263   :  { %v3272_v33 = vsel %vm1979_vm1, %v3271_v27, %v3267_v54  ;;  %1382 = vadd.xlane.f32.xlu1 %v1381_v24  ;;  %1340 = vadd.xlane.f32.xlu0 %v1339_v26  ;;  %v1384_v26 = vsel %vm399_vm0, %v343_v44, 0.0 }
 0x264   :  { %v1266_v36 = vpop.xlane.xlu1 %1265  ;;  %v1224_v11 = vpop.xlane.xlu0 %1223 }
 0x265   :  { %v3355_v39 = vrot.slane %v1224_v11, %v4487_v34  ;;  %v3425_v53 = vrot.slane %v1266_v36, %v4473_v28  ;;  %v360_v36 = vld [vmem:[%s6797_s0 + $0xac8] sm:$0xff] }
 0x266   :  { %v1435_v43 = vsel %vm399_vm0, %v360_v36, 0.0 }
 0x267   :  { %v3356_v48 = vsel %vm1986_vm2, %v3355_v39, %v3351_v8  ;;  %1475 = vadd.xlane.f32.xlu1 %v1474_v58  ;;  %1433 = vadd.xlane.f32.xlu0 %v1432_v38  ;;  %v297_v8 = vld [vmem:[%s6797_s0 + $0x8d0] sm:$0xff] }
 0x268   :  { %v1320_v4 = vpop.xlane.xlu1 %1319  ;;  %v1269_v50 = vpop.xlane.xlu0 %1268  ;;  %v1246_v14 = vsel %vm399_vm0, %v297_v8, 0.0  ;;  %v313_v8 = vld [vmem:[%s6797_s0 + $0x950] sm:$0xff] }
 0x269   :  { %v3513_v6 = vrot.slane %v1320_v4, %v4487_v34  ;;  %v3429_v55 = vrot.slane %v1269_v50, %v4476_v29 }
 0x26b   :  { %v3514_v15 = vsel %vm1986_vm2, %v3513_v6, %v3509_v19  ;;  %v3430_v62 = vsel %vm1979_vm1, %v3429_v55, %v3425_v53  ;;  %1094 = vadd.xlane.f32.xlu1 %v1093_v51  ;;  %1526 = vadd.xlane.f32.xlu0 %v1525_v52  ;;  %v329_v19 = vld [vmem:[%s6797_s0 + $0x9d0] sm:$0xff]  ;;  %v247_v51 = vld [vmem:[%s6797_s0 + $0x740] sm:$0xff] }
 0x26c   :  { %v1413_v63 = vpop.xlane.xlu1 %1412  ;;  %v1410_v0 = vpop.xlane.xlu0 %1409  ;;  %v1342_v27 = vsel %vm399_vm0, %v329_v19, 0.0  ;;  %v1096_v55 = vsel %vm399_vm0, %v247_v51, 0.0 }
 0x26d   :  { %v3666_v3 = vrot.slane %v1413_v63, %v4476_v29  ;;  %v3662_v18 = vrot.slane %v1410_v0, %v4473_v28  ;;  %v281_v0 = vld [vmem:[%s6797_s0 + $0x850] sm:$0xff] }
 0x26f   :  { %v3667_v9 = vsel %vm1979_vm1, %v3666_v3, %v3662_v18  ;;  %1196 = vadd.xlane.f32.xlu1 %v1195_v22  ;;  %1145 = vadd.xlane.f32.xlu0 %v1144_v2  ;;  %v1198_v3 = vsel %vm399_vm0, %v281_v0, 0.0 }
 0x270   :  { %v1125_v37 = vpop.xlane.xlu1 %1124  ;;  %v1122_v10 = vpop.xlane.xlu0 %1121 }
 0x271   :  { %v3192_v16 = vrot.slane %v1125_v37, %v4476_v29  ;;  %v3188_v42 = vrot.slane %v1122_v10, %v4473_v28  ;;  %v298_v37 = vld [vmem:[%s6797_s0 + $0x8d8] sm:$0xff] }
 0x273   :  { %v3193_v20 = vsel %vm1979_vm1, %v3192_v16, %v3188_v42  ;;  %1292 = vadd.xlane.f32.xlu1 %v1291_v12  ;;  %1247 = vadd.xlane.f32.xlu0 %v1246_v14  ;;  %v1294_v16 = vsel %vm399_vm0, %v313_v8, 0.0  ;;  %v1249_v42 = vsel %vm399_vm0, %v298_v37, 0.0 }
 0x274   :  { %v1227_v21 = vpop.xlane.xlu1 %1226  ;;  %v1176_v24 = vpop.xlane.xlu0 %1175 }
 0x275   :  { %v3360_v54 = vrot.slane %v1227_v21, %v4490_v35  ;;  %v3276_v30 = vrot.slane %v1176_v24, %v4487_v34  ;;  %v344_v24 = vld [vmem:[%s6797_s0 + $0xa48] sm:$0xff] }
 0x276   :  { %v1387_v32 = vsel %vm399_vm0, %v344_v24, 0.0 }
 0x277   :  { %v3361_v11 = vsel %vm1993_vm3, %v3360_v54, %v3356_v48  ;;  %v3277_v58 = vsel %vm1986_vm2, %v3276_v30, %v3272_v33  ;;  %1385 = vadd.xlane.f32.xlu1 %v1384_v26  ;;  %1343 = vadd.xlane.f32.xlu0 %v1342_v27  ;;  %v391_v33 = vld [vmem:[%s6797_s0 + $0xbc0] sm:$0xff] }
 0x278   :  { %v1323_v38 = vpop.xlane.xlu1 %1322  ;;  %v1272_v39 = vpop.xlane.xlu0 %1271  ;;  %v1528_v60 = vsel %vm399_vm0, %v391_v33, 0.0 }
 0x279   :  { %v3518_v4 = vrot.slane %v1323_v38, %v4490_v35  ;;  %v3434_v50 = vrot.slane %v1272_v39, %v4487_v34 }
 0x27b   :  { %v3519_v48 = vsel %vm1993_vm3, %v3518_v4, %v3514_v15  ;;  %v3435_v52 = vsel %vm1986_vm2, %v3434_v50, %v3430_v62  ;;  %1478 = vadd.xlane.f32.xlu1 %v1477_v40  ;;  %1436 = vadd.xlane.f32.xlu0 %v1435_v43  ;;  %v264_v15 = vld [vmem:[%s6797_s0 + $0x7c8] sm:$0xff]  ;;  %v375_v40 = vld [vmem:[%s6797_s0 + $0xb40] sm:$0xff] }
 0x27c   :  { %v1365_v53 = vpop.xlane.xlu1 %1364  ;;  %v1362_v6 = vpop.xlane.xlu0 %1361  ;;  %v1147_v18 = vsel %vm399_vm0, %v264_v15, 0.0  ;;  %v1480_v33 = vsel %vm399_vm0, %v375_v40, 0.0 }
 0x27d   :  { %v3587_v17 = vrot.slane %v1365_v53, %v4476_v29  ;;  %v3583_v63 = vrot.slane %v1362_v6, %v4473_v28 }
 0x27f   :  { %v3588_v62 = vsel %vm1979_vm1, %v3587_v17, %v3583_v63  ;;  %1097 = vadd.xlane.f32.xlu1 %v1096_v55  ;;  %1529 = vadd.xlane.f32.xlu0 %v1528_v60  ;;  %v248_v60 = vld [vmem:[%s6797_s0 + $0x748] sm:$0xff] }
 0x280   :  { %v1506_v22 = vpop.xlane.xlu1 %1505  ;;  %v1416_v2 = vpop.xlane.xlu0 %1415  ;;  %v1099_v15 = vsel %vm399_vm0, %v248_v60, 0.0 }
 0x281   :  { %v3671_v5 = vrot.slane %v1416_v2, %v4487_v34  ;;  %v3820_v44 = vrot.slane %v1506_v22, %v4473_v28 }
 0x283   :  { %v3672_v10 = vsel %vm1986_vm2, %v3671_v5, %v3667_v9  ;;  %1199 = vadd.xlane.f32.xlu1 %v1198_v3  ;;  %1148 = vadd.xlane.f32.xlu0 %v1147_v18  ;;  %v330_v9 = vld [vmem:[%s6797_s0 + $0x9d8] sm:$0xff] }
 0x284   :  { %v1128_v12 = vpop.xlane.xlu1 %1127  ;;  %v1509_v14 = vpop.xlane.xlu0 %1508  ;;  %v1345_v36 = vsel %vm399_vm0, %v330_v9, 0.0  ;;  %v282_v18 = vld [vmem:[%s6797_s0 + $0x858] sm:$0xff] }
 0x285   :  { %v3197_v19 = vrot.slane %v1128_v12, %v4487_v34  ;;  %v3824_v21 = vrot.slane %v1509_v14, %v4476_v29  ;;  %v1201_v12 = vsel %vm399_vm0, %v282_v18, 0.0 }
 0x287   :  { %v3198_v26 = vsel %vm1986_vm2, %v3197_v19, %v3193_v20  ;;  %v3825_v27 = vsel %vm1979_vm1, %v3824_v21, %v3820_v44  ;;  %1295 = vadd.xlane.f32.xlu1 %v1294_v16  ;;  %1250 = vadd.xlane.f32.xlu0 %v1249_v42  ;;  %v361_v20 = vld [vmem:[%s6797_s0 + $0xad0] sm:$0xff]  ;;  %v314_v44 = vld [vmem:[%s6797_s0 + $0x958] sm:$0xff] }
 0x288   :  { %v1230_v54 = vpop.xlane.xlu1 %1229  ;;  %v1179_v30 = vpop.xlane.xlu0 %1178  ;;  %v1438_v53 = vsel %vm399_vm0, %v361_v20, 0.0  ;;  %v1297_v24 = vsel %vm399_vm0, %v314_v44, 0.0 }
 0x289   :  { %v3365_v38 = vrot.slane %v1230_v54, %v4508_v47  ;;  %v3281_v39 = vrot.slane %v1179_v30, %v4490_v35  ;;  %v345_v54 = vld [vmem:[%s6797_s0 + $0xa50] sm:$0xff]  ;;  %v331_v30 = vld [vmem:[%s6797_s0 + $0x9e0] sm:$0xff] }
 0x28a   :  { %v1390_v40 = vsel %vm399_vm0, %v345_v54, 0.0  ;;  %v1348_v20 = vsel %vm399_vm0, %v331_v30, 0.0 }
 0x28b   :  { %v3366_v43 = vsel %vm2000_vm4, %v3365_v38, %v3361_v11  ;;  %v3282_v4 = vsel %vm1993_vm3, %v3281_v39, %v3277_v58  ;;  %1388 = vadd.xlane.f32.xlu1 %v1387_v32  ;;  %1346 = vadd.xlane.f32.xlu0 %v1345_v36  ;;  %v392_v11 = vld [vmem:[%s6797_s0 + $0xbc8] sm:$0xff] }
 0x28c   :  { %v1326_v50 = vpop.xlane.xlu1 %1325  ;;  %v1275_v51 = vpop.xlane.xlu0 %1274  ;;  %v1531_v22 = vsel %vm399_vm0, %v392_v11, 0.0 }
 0x28d   :  { %v3523_v6 = vrot.slane %v1326_v50, %v4508_v47  ;;  %v3439_v55 = vrot.slane %v1275_v51, %v4490_v35 }
 0x28f   :  { %v3524_v58 = vsel %vm2000_vm4, %v3523_v6, %v3519_v48  ;;  %v3440_v17 = vsel %vm1993_vm3, %v3439_v55, %v3435_v52  ;;  %1481 = vadd.xlane.f32.xlu1 %v1480_v33  ;;  %1439 = vadd.xlane.f32.xlu0 %v1438_v53  ;;  %v265_v48 = vld [vmem:[%s6797_s0 + $0x7d0] sm:$0xff]  ;;  %v376_v33 = vld [vmem:[%s6797_s0 + $0xb48] sm:$0xff] }
 0x290   :  { %v1419_v63 = vpop.xlane.xlu1 %1418  ;;  %v1368_v0 = vpop.xlane.xlu0 %1367  ;;  %v1150_v14 = vsel %vm399_vm0, %v265_v48, 0.0  ;;  %v1483_v60 = vsel %vm399_vm0, %v376_v33, 0.0 }
 0x291   :  { %v3676_v2 = vrot.slane %v1419_v63, %v4490_v35  ;;  %v3592_v3 = vrot.slane %v1368_v0, %v4487_v34 }
 0x293   :  { %v3677_v52 = vsel %vm1993_vm3, %v3676_v2, %v3672_v10  ;;  %v3593_v5 = vsel %vm1986_vm2, %v3592_v3, %v3588_v62  ;;  %1100 = vadd.xlane.f32.xlu1 %v1099_v15  ;;  %1532 = vadd.xlane.f32.xlu0 %v1531_v22  ;;  %v299_v62 = vld [vmem:[%s6797_s0 + $0x8e0] sm:$0xff]  ;;  %v249_v15 = vld [vmem:[%s6797_s0 + $0x750] sm:$0xff] }
 0x294   :  { %v1461_v8 = vpop.xlane.xlu1 %1460  ;;  %v1458_v37 = vpop.xlane.xlu0 %1457  ;;  %v1102_v18 = vsel %vm399_vm0, %v249_v15, 0.0 }
 0x295   :  { %v3745_v16 = vrot.slane %v1461_v8, %v4476_v29  ;;  %v3741_v42 = vrot.slane %v1458_v37, %v4473_v28  ;;  %v1252_v29 = vsel %vm399_vm0, %v299_v62, 0.0 }
 0x297   :  { %v3746_v10 = vsel %vm1979_vm1, %v3745_v16, %v3741_v42  ;;  %1202 = vadd.xlane.f32.xlu1 %v1201_v12  ;;  %1151 = vadd.xlane.f32.xlu0 %v1150_v14  ;;  %v283_v12 = vld [vmem:[%s6797_s0 + $0x860] sm:$0xff] }
 0x298   :  { %v1131_v19 = vpop.xlane.xlu1 %1130  ;;  %v1512_v21 = vpop.xlane.xlu0 %1511  ;;  %v1204_v44 = vsel %vm399_vm0, %v283_v12, 0.0 }
 0x299   :  { %v3202_v28 = vrot.slane %v1131_v19, %v4490_v35  ;;  %v3829_v9 = vrot.slane %v1512_v21, %v4487_v34 }
 0x29b   :  { %v3203_v32 = vsel %vm1993_vm3, %v3202_v28, %v3198_v26  ;;  %v3830_v36 = vsel %vm1986_vm2, %v3829_v9, %v3825_v27  ;;  %1298 = vadd.xlane.f32.xlu1 %v1297_v24  ;;  %1253 = vadd.xlane.f32.xlu0 %v1252_v29  ;;  %v362_v26 = vld [vmem:[%s6797_s0 + $0xad8] sm:$0xff]  ;;  %v315_v24 = vld [vmem:[%s6797_s0 + $0x960] sm:$0xff] }
 0x29c   :  { %v1233_v38 = vpop.xlane.xlu1 %1232  ;;  %v1182_v39 = vpop.xlane.xlu0 %1181  ;;  %v1441_v11 = vsel %vm399_vm0, %v362_v26, 0.0  ;;  %v1300_v54 = vsel %vm399_vm0, %v315_v24, 0.0 }
 0x29d   :  { %v3370_v50 = vrot.slane %v1233_v38, %v4505_v46  ;;  %v3286_v51 = vrot.slane %v1182_v39, %v4508_v47  ;;  %v346_v39 = vld [vmem:[%s6797_s0 + $0xa58] sm:$0xff] }
 0x29f   :  { %v3371_v27 = vsel %vm2007_vm5, %v3370_v50, %v3366_v43  ;;  %v3287_v53 = vsel %vm2000_vm4, %v3286_v51, %v3282_v4  ;;  %1391 = vadd.xlane.f32.xlu1 %v1390_v40  ;;  %1349 = vadd.xlane.f32.xlu0 %v1348_v20  ;;  %v393_v43 = vld [vmem:[%s6797_s0 + $0xbd0] sm:$0xff]  ;;  %v1393_v51 = vsel %vm399_vm0, %v346_v39, 0.0 }
 0x2a0   :  { %v1329_v6 = vpop.xlane.xlu1 %1328  ;;  %v1278_v55 = vpop.xlane.xlu0 %1277  ;;  %v1534_v48 = vsel %vm399_vm0, %v393_v43, 0.0 }
 0x2a1   :  { %v3528_v63 = vrot.slane %v1329_v6, %v4505_v46  ;;  %v3444_v0 = vrot.slane %v1278_v55, %v4508_v47  ;;  %v377_v55 = vld [vmem:[%s6797_s0 + $0xb50] sm:$0xff] }
 0x2a3   :  { %v3529_v4 = vsel %vm2007_vm5, %v3528_v63, %v3524_v58  ;;  %v3445_v22 = vsel %vm2000_vm4, %v3444_v0, %v3440_v17  ;;  %1484 = vadd.xlane.f32.xlu1 %v1483_v60  ;;  %1442 = vadd.xlane.f32.xlu0 %v1441_v11  ;;  %v266_v58 = vld [vmem:[%s6797_s0 + $0x7d8] sm:$0xff]  ;;  %v1486_v0 = vsel %vm399_vm0, %v377_v55, 0.0 }
 0x2a4   :  { %v1422_v2 = vpop.xlane.xlu1 %1421  ;;  %v1371_v3 = vpop.xlane.xlu0 %1370  ;;  %v1153_v62 = vsel %vm399_vm0, %v266_v58, 0.0 }
 0x2a5   :  { %v3681_v8 = vrot.slane %v1422_v2, %v4508_v47  ;;  %v3597_v37 = vrot.slane %v1371_v3, %v4490_v35  ;;  %v250_v3 = vld [vmem:[%s6797_s0 + $0x758] sm:$0xff] }
 0x2a7   :  { %v3682_v17 = vsel %vm2000_vm4, %v3681_v8, %v3677_v52  ;;  %v3598_v14 = vsel %vm1993_vm3, %v3597_v37, %v3593_v5  ;;  %1103 = vadd.xlane.f32.xlu1 %v1102_v18  ;;  %1535 = vadd.xlane.f32.xlu0 %v1534_v48  ;;  %v300_v52 = vld [vmem:[%s6797_s0 + $0x8e8] sm:$0xff]  ;;  %v1105_v37 = vsel %vm399_vm0, %v250_v3, 0.0 }
 0x2a8   :  { %v1515_v16 = vpop.xlane.xlu1 %1514  ;;  %v1464_v42 = vpop.xlane.xlu0 %1463 }
 0x2a9   :  { %v3834_v19 = vrot.slane %v1515_v16, %v4490_v35  ;;  %v3750_v21 = vrot.slane %v1464_v42, %v4487_v34  ;;  %v1255_v34 = vsel %vm399_vm0, %v300_v52, 0.0  ;;  %v284_v42 = vld [vmem:[%s6797_s0 + $0x868] sm:$0xff] }
 0x2ab   :  { %v3835_v5 = vsel %vm1993_vm3, %v3834_v19, %v3830_v36  ;;  %v3751_v29 = vsel %vm1986_vm2, %v3750_v21, %v3746_v10  ;;  %1205 = vadd.xlane.f32.xlu1 %v1204_v44  ;;  %1154 = vadd.xlane.f32.xlu0 %v1153_v62  ;;  %v332_v10 = vld [vmem:[%s6797_s0 + $0x9e8] sm:$0xff] }
 0x2ac   :  { %v1185_v28 = vpop.xlane.xlu1 %1184  ;;  %v1134_v9 = vpop.xlane.xlu0 %1133  ;;  %v1351_v33 = vsel %vm399_vm0, %v332_v10, 0.0 }
 0x2ad   :  { %v3291_v30 = vrot.slane %v1185_v28, %v4505_v46  ;;  %v3207_v38 = vrot.slane %v1134_v9, %v4508_v47  ;;  %v316_v28 = vld [vmem:[%s6797_s0 + $0x968] sm:$0xff] }
 0x2af   :  { %v3292_v36 = vsel %vm2007_vm5, %v3291_v30, %v3287_v53  ;;  %v3208_v40 = vsel %vm2000_vm4, %v3207_v38, %v3203_v32  ;;  %1301 = vadd.xlane.f32.xlu1 %v1300_v54  ;;  %1256 = vadd.xlane.f32.xlu0 %v1255_v34  ;;  %v363_v32 = vld [vmem:[%s6797_s0 + $0xae0] sm:$0xff]  ;;  %v1303_v30 = vsel %vm399_vm0, %v316_v28, 0.0 }
 0x2b0   :  { %v1281_v20 = vpop.xlane.xlu1 %1280  ;;  %v1236_v50 = vpop.xlane.xlu0 %1235  ;;  %v1444_v15 = vsel %vm399_vm0, %v363_v32, 0.0 }
 0x2b1   :  { %v3449_v26 = vrot.slane %v1281_v20, %v4505_v46  ;;  %v3375_v6 = vrot.slane %v1236_v50, %v4520_v57  ;;  %v347_v20 = vld [vmem:[%s6797_s0 + $0xa60] sm:$0xff] }
 0x2b3   :  { %v3450_v53 = vsel %vm2007_vm5, %v3449_v26, %v3445_v22  ;;  %v3376_v60 = vsel %vm2014_vm6, %v3375_v6, %v3371_v27  ;;  %1394 = vadd.xlane.f32.xlu1 %v1393_v51  ;;  %1352 = vadd.xlane.f32.xlu0 %v1351_v33  ;;  %v394_v27 = vld [vmem:[%s6797_s0 + $0xbd8] sm:$0xff]  ;;  %v1396_v26 = vsel %vm399_vm0, %v347_v20, 0.0 }
 0x2b4   :  { %v1374_v11 = vpop.xlane.xlu1 %1373  ;;  %v1332_v63 = vpop.xlane.xlu0 %1331  ;;  %v1537_v12 = vsel %vm399_vm0, %v394_v27, 0.0 }
 0x2b5   :  { %v3602_v43 = vrot.slane %v1374_v11, %v4508_v47  ;;  %v3533_v2 = vrot.slane %v1332_v63, %v4520_v57  ;;  %v378_v11 = vld [vmem:[%s6797_s0 + $0xb58] sm:$0xff] }
 0x2b7   :  { %v3603_v22 = vsel %vm2000_vm4, %v3602_v43, %v3598_v14  ;;  %v3534_v18 = vsel %vm2014_vm6, %v3533_v2, %v3529_v4  ;;  %1487 = vadd.xlane.f32.xlu1 %v1486_v0  ;;  %1445 = vadd.xlane.f32.xlu0 %v1444_v15  ;;  %v267_v4 = vld [vmem:[%s6797_s0 + $0x7e0] sm:$0xff]  ;;  %v1489_v43 = vsel %vm399_vm0, %v378_v11, 0.0 }
 0x2b8   :  { %v1467_v48 = vpop.xlane.xlu1 %1466  ;;  %v1425_v8 = vpop.xlane.xlu0 %1424  ;;  %v1156_v21 = vsel %vm399_vm0, %v267_v4, 0.0 }
 0x2b9   :  { %v3755_v58 = vrot.slane %v1467_v48, %v4490_v35  ;;  %v3686_v16 = vrot.slane %v1425_v8, %v4505_v46  ;;  %v1207_v35 = vsel %vm399_vm0, %v284_v42, 0.0  ;;  %v251_v48 = vld [vmem:[%s6797_s0 + $0x760] sm:$0xff] }
 0x2bb   :  { %v3756_v14 = vsel %vm1993_vm3, %v3755_v58, %v3751_v29  ;;  %v3687_v44 = vsel %vm2007_vm5, %v3686_v16, %v3682_v17  ;;  %1106 = vadd.xlane.f32.xlu1 %v1105_v37  ;;  %1538 = vadd.xlane.f32.xlu0 %v1537_v12  ;;  %v301_v17 = vld [vmem:[%s6797_s0 + $0x8f0] sm:$0xff]  ;;  %v1108_v58 = vsel %vm399_vm0, %v251_v48, 0.0 }
 0x2bc   :  { %v1086_v62 = vpop.xlane.xlu1 %1085  ;;  %v1518_v19 = vpop.xlane.xlu0 %1517  ;;  %v1258_v38 = vsel %vm399_vm0, %v301_v17, 0.0  ;;  %v317_v17 = vld [vmem:[%s6797_s0 + $0x970] sm:$0xff] }
 0x2bd   :  { %v3128_v24 = vrot.slane %v1086_v62, %v4508_v47  ;;  %v3839_v52 = vrot.slane %v1518_v19, %v4508_v47  ;;  %v285_v62 = vld [vmem:[%s6797_s0 + $0x870] sm:$0xff] }
 0x2bf   :  { %v3129_v29 = vsel %vm2000_vm4, %v3128_v24, %v5937_v25  ;;  %v3840_v9 = vsel %vm2000_vm4, %v3839_v52, %v3835_v5  ;;  %1208 = vadd.xlane.f32.xlu1 %v1207_v35  ;;  %1157 = vadd.xlane.f32.xlu0 %v1156_v21  ;;  %v333_v25 = vld [vmem:[%s6797_s0 + $0x9f0] sm:$0xff] }
 0x2c0   :  { %v1188_v54 = vpop.xlane.xlu1 %1187  ;;  %v1137_v34 = vpop.xlane.xlu0 %1136  ;;  %v1354_v6 = vsel %vm399_vm0, %v333_v25, 0.0  ;;  %v348_v25 = vld [vmem:[%s6797_s0 + $0xa68] sm:$0xff] }
 0x2c1   :  { %v3296_v39 = vrot.slane %v1188_v54, %v4520_v57  ;;  %v3212_v10 = vrot.slane %v1137_v34, %v4505_v46 }
 0x2c3   :  { %v3297_v5 = vsel %vm2014_vm6, %v3296_v39, %v3292_v36  ;;  %v3213_v50 = vsel %vm2007_vm5, %v3212_v10, %v3208_v40  ;;  %1304 = vadd.xlane.f32.xlu1 %v1303_v30  ;;  %1259 = vadd.xlane.f32.xlu0 %v1258_v38  ;;  %v364_v36 = vld [vmem:[%s6797_s0 + $0xae8] sm:$0xff]  ;;  %v1306_v38 = vsel %vm399_vm0, %v317_v17, 0.0 }
 0x2c4   :  { %v1284_v51 = vpop.xlane.xlu1 %1283  ;;  %v1239_v33 = vpop.xlane.xlu0 %1238  ;;  %v1447_v2 = vsel %vm399_vm0, %v364_v36, 0.0  ;;  %v379_v36 = vld [vmem:[%s6797_s0 + $0xb60] sm:$0xff] }
 0x2c5   :  { %v3454_v55 = vrot.slane %v1284_v51, %v4520_v57  ;;  %v3380_v32 = vrot.slane %v1239_v33, %v4517_v56 }
 0x2c7   :  { %v3455_v40 = vsel %vm2014_vm6, %v3454_v55, %v3450_v53  ;;  %v3381_v63 = vsel %vm2021_vm7, %v3380_v32, %v3376_v60  ;;  %1397 = vadd.xlane.f32.xlu1 %v1396_v26  ;;  %1355 = vadd.xlane.f32.xlu0 %v1354_v6  ;;  %v395_v53 = vld [vmem:[%s6797_s0 + $0xbe0] sm:$0xff]  ;;  %v1399_v6 = vsel %vm399_vm0, %v348_v25, 0.0 }
 0x2c8   :  { %v1377_v0 = vpop.xlane.xlu1 %1376  ;;  %v1335_v15 = vpop.xlane.xlu0 %1334  ;;  %v1540_v16 = vsel %vm399_vm0, %v395_v53, 0.0 }
 0x2c9   :  { %v3607_v3 = vrot.slane %v1377_v0, %v4505_v46  ;;  %v3538_v27 = vrot.slane %v1335_v15, %v4517_v56 }
 0x2cb   :  { %v3608_v60 = vsel %vm2007_vm5, %v3607_v3, %v3603_v22  ;;  %v3539_v8 = vsel %vm2021_vm7, %v3538_v27, %v3534_v18  ;;  %1490 = vadd.xlane.f32.xlu1 %v1489_v43  ;;  %1448 = vadd.xlane.f32.xlu0 %v1447_v2  ;;  %v268_v22 = vld [vmem:[%s6797_s0 + $0x7e8] sm:$0xff]  ;;  %v1492_v2 = vsel %vm399_vm0, %v379_v36, 0.0  ;;  %v1568_v36 = vld [vmem:[%s6798_s1 + $0x80] sm:$0xff] }
 0x2cc   :  { %v1470_v37 = vpop.xlane.xlu1 %1469  ;;  %v1428_v12 = vpop.xlane.xlu0 %1427  ;;  %v1159_v24 = vsel %vm399_vm0, %v268_v22, 0.0 }
 0x2cd   :  { %v3760_v42 = vrot.slane %v1470_v37, %v4508_v47  ;;  %v3691_v4 = vrot.slane %v1428_v12, %v4520_v57  ;;  %v1210_v47 = vsel %vm399_vm0, %v285_v62, 0.0 }
 0x2cf   :  { %v3761_v18 = vsel %vm2000_vm4, %v3760_v42, %v3756_v14  ;;  %v3692_v19 = vsel %vm2014_vm6, %v3691_v4, %v3687_v44  ;;  %1109 = vadd.xlane.f32.xlu1 %v1108_v58  ;;  %1541 = vadd.xlane.f32.xlu0 %v1540_v16  ;;  %v302_v14 = vld [vmem:[%s6797_s0 + $0x8f8] sm:$0xff] }
 0x2d0   :  { %v1089_v35 = vpop.xlane.xlu1 %1088  ;;  %v1521_v21 = vpop.xlane.xlu0 %1520  ;;  %v1261_v39 = vsel %vm399_vm0, %v302_v14, 0.0 }
 0x2d1   :  { %v3133_v52 = vrot.slane %v1089_v35, %v4505_v46  ;;  %v3844_v28 = vrot.slane %v1521_v21, %v4505_v46 }
 0x2d3   :  { %v3134_v44 = vsel %vm2007_vm5, %v3133_v52, %v3129_v29  ;;  %v3845_v54 = vsel %vm2007_vm5, %v3844_v28, %v3840_v9  ;;  %1211 = vadd.xlane.f32.xlu1 %v1210_v47  ;;  %1160 = vadd.xlane.f32.xlu0 %v1159_v24  ;;  %v334_v29 = vld [vmem:[%s6797_s0 + $0x9f8] sm:$0xff] }
 0x2d4   :  { %v1191_v34 = vpop.xlane.xlu1 %1190  ;;  %v1140_v30 = vpop.xlane.xlu0 %1139  ;;  %v1357_v55 = vsel %vm399_vm0, %v334_v29, 0.0 }
 0x2d5   :  { %v3301_v10 = vrot.slane %v1191_v34, %v4517_v56  ;;  %v3217_v20 = vrot.slane %v1140_v30, %v4520_v57 }
 0x2d7   :  { %v3302_v9 = vsel %vm2021_vm7, %v3301_v10, %v3297_v5  ;;  %v3218_v51 = vsel %vm2014_vm6, %v3217_v20, %v3213_v50  ;;  %1307 = vadd.xlane.f32.xlu1 %v1306_v38  ;;  %1262 = vadd.xlane.f32.xlu0 %v1261_v39  ;;  %v365_v5 = vld [vmem:[%s6797_s0 + $0xaf0] sm:$0xff] }
 0x2d8   :  { %v1287_v33 = vpop.xlane.xlu1 %1286  ;;  %v1242_v26 = vpop.xlane.xlu0 %1241  ;;  %v1450_v3 = vsel %vm399_vm0, %v365_v5, 0.0  ;;  %v1569_v5 = vld [vmem:[%s6798_s1 + $0x88] sm:$0xff] }
 0x2d9   :  { %v3459_v32 = vrot.slane %v1287_v33, %v4517_v56  ;;  %v3385_v11 = vrot.slane %v1242_v26, %v4550_v13 }
 0x2db   :  { %v6324_v50 = vsel %vm2021_vm7, %v3459_v32, %v3455_v40  ;;  %v6327_v0 = vsel %vm2028_vm8, %v3385_v11, %v3381_v63  ;;  %1400 = vadd.xlane.f32.xlu1 %v1399_v6  ;;  %1358 = vadd.xlane.f32.xlu0 %v1357_v55  ;;  %v252_v40 = vld [vmem:[%s6797_s0 + $0x768] sm:$0xff] }
 0x2dc   :  { %v1380_v15 = vpop.xlane.xlu1 %1379  ;;  %v1338_v43 = vpop.xlane.xlu0 %1337  ;;  %v396_v63 = vld [vmem:[%s6797_s0 + $0xbe8] sm:$0xff]  ;;  %v1111_v16 = vsel %vm399_vm0, %v252_v40, 0.0 }
 0x2dd   :  { %v3612_v27 = vrot.slane %v1380_v15, %v4520_v57  ;;  %v3543_v48 = vrot.slane %v1338_v43, %v4550_v13  ;;  %v1543_v42 = vsel %vm399_vm0, %v396_v63, 0.0 }
 0x2df   :  { %v6340_v53 = vsel %vm2014_vm6, %v3612_v27, %v3608_v60  ;;  %v6343_v37 = vsel %vm2028_vm8, %v3543_v48, %v3539_v8  ;;  %1493 = vadd.xlane.f32.xlu1 %v1492_v2  ;;  %1451 = vadd.xlane.f32.xlu0 %v1450_v3  ;;  %v286_v60 = vld [vmem:[%s6797_s0 + $0x878] sm:$0xff]  ;;  %v269_v8 = vld [vmem:[%s6797_s0 + $0x7f0] sm:$0xff]  ;;  %v4070_v2 = vpack.c.bf16 %v1569_v5, %v1568_v36  ;;  %v1552_v3 = vld [vmem:[%s6798_s1] sm:$0xff] }
 0x2e0   :  { %v1473_v12 = vpop.xlane.xlu1 %1472  ;;  %v1431_v58 = vpop.xlane.xlu0 %1430  ;;  %v1213_v47 = vsel %vm399_vm0, %v286_v60, 0.0  ;;  %v1162_v24 = vsel %vm399_vm0, %v269_v8, 0.0  ;;  %v1553_v27 = vld [vmem:[%s6798_s1 + $0x8] sm:$0xff]  ;;  %v1575_v36 = vld [vmem:[%s6798_s1 + $0xb8] sm:$0xff] }
 0x2e1   :  { %v3765_v4 = vrot.slane %v1473_v12, %v4505_v46  ;;  %v3696_v62 = vrot.slane %v1431_v58, %v4517_v56  ;;  %v4072_v12 = vpack.c.bf16 %v1553_v27, %v1552_v3  ;;  %4071 = vmatprep.subr.bf16.mxu0 %v4070_v2  ;;  %4102 = vmatprep.subr.bf16.mxu1 %v4070_v2  ;;  %v1558_v27 = vld [vmem:[%s6798_s1 + $0x30] sm:$0xff] }
 0x2e3   :  { %v6356_v22 = vsel %vm2007_vm5, %v3765_v4, %v3761_v18  ;;  %v6359_v35 = vsel %vm2021_vm7, %v3696_v62, %v3692_v19  ;;  %1112 = vadd.xlane.f32.xlu1 %v1111_v16  ;;  %1544 = vadd.xlane.f32.xlu0 %v1543_v42  ;;  %v349_v18 = vld [vmem:[%s6797_s0 + $0xa70] sm:$0xff]  ;;  %v318_v19 = vld [vmem:[%s6797_s0 + $0x978] sm:$0xff] }
 0x2e4   :  { %v1092_v21 = vpop.xlane.xlu1 %1091  ;;  %v1524_v46 = vpop.xlane.xlu0 %1523  ;;  %v1402_v38 = vsel %vm399_vm0, %v349_v18, 0.0  ;;  %v1309_v39 = vsel %vm399_vm0, %v318_v19, 0.0  ;;  %v350_v16 = vld [vmem:[%s6797_s0 + $0xa78] sm:$0xff]  ;;  %4073 = vmatpush3.bf16.msra.mxu0 %v4072_v12  ;;  %4110 = vmatpush3.bf16.msra.mxu1 %v4072_v12  ;;  %v1570_v4 = vld [vmem:[%s6798_s1 + $0x90] sm:$0xff] }
 0x2e5   :  { %v3138_v52 = vrot.slane %v1092_v21, %v4520_v57  ;;  %v3849_v28 = vrot.slane %v1524_v46, %v4520_v57  ;;  %v270_v42 = vld [vmem:[%s6797_s0 + $0x7f8] sm:$0xff]  ;;  %v1554_v46 = vld [vmem:[%s6798_s1 + $0x10] sm:$0xff] }
 0x2e6   :  { %v1571_v62 = vld [vmem:[%s6798_s1 + $0x98] sm:$0xff] }
 0x2e7   :  { %v6372_v17 = vsel %vm2014_vm6, %v3138_v52, %v3134_v44  ;;  %v6375_v14 = vsel %vm2014_vm6, %v3849_v28, %v3845_v54  ;;  %1214 = vadd.xlane.f32.xlu1 %v1213_v47  ;;  %1163 = vadd.xlane.f32.xlu0 %v1162_v24  ;;  %v380_v44 = vld [vmem:[%s6797_s0 + $0xb68] sm:$0xff]  ;;  %v366_v54 = vld [vmem:[%s6797_s0 + $0xaf8] sm:$0xff]  ;;  %v4074_v21 = vpack.c.bf16 %v1571_v62, %v1570_v4  ;;  %v1165_v28 = vsel %vm399_vm0, %v270_v42, 0.0 }
 0x2e8   :  { %v1194_v34 = vpop.xlane.xlu1 %1193  ;;  %v1143_v30 = vpop.xlane.xlu0 %1142  ;;  %v1495_v6 = vsel %vm399_vm0, %v380_v44, 0.0  ;;  %v1453_v55 = vsel %vm399_vm0, %v366_v54, 0.0  ;;  %v1555_v47 = vld [vmem:[%s6798_s1 + $0x18] sm:$0xff]  ;;  %v1556_v44 = vld [vmem:[%s6798_s1 + $0x20] sm:$0xff]  ;;  %v1557_v54 = vld [vmem:[%s6798_s1 + $0x28] sm:$0xff] }
 0x2e9   :  { %v3306_v10 = vrot.slane %v1194_v34, %v4550_v13  ;;  %v3222_v20 = vrot.slane %v1143_v30, %v4517_v56  ;;  %v4076_v18 = vpack.c.bf16 %v1555_v47, %v1554_v46  ;;  %v398_v34 = vld [vmem:[%s6797_s0 + $0xbf8] sm:$0xff]  ;;  %v381_v30 = vld [vmem:[%s6797_s0 + $0xb70] sm:$0xff]  ;;  %4075 = vmatprep.subr.bf16.mxu0 %v4074_v21  ;;  %4103 = vmatprep.subr.bf16.mxu1 %v4074_v21  ;;  %v1560_v21 = vld [vmem:[%s6798_s1 + $0x40] sm:$0xff] }
 0x2ea   :  { %v1561_v46 = vld [vmem:[%s6798_s1 + $0x48] sm:$0xff] }
 0x2eb   :  { %v6388_v25 = vsel %vm2028_vm8, %v3306_v10, %v3302_v9  ;;  %v6391_v29 = vsel %vm2021_vm7, %v3222_v20, %v3218_v51  ;;  %1403 = vadd.xlane.f32.xlu1 %v1402_v38  ;;  %1310 = vadd.xlane.f32.xlu0 %v1309_v39  ;;  %v253_v9 = vld [vmem:[%s6797_s0 + $0x770] sm:$0xff]  ;;  %v1572_v38 = vld [vmem:[%s6798_s1 + $0xa0] sm:$0xff] }
 0x2ec   :  { %v1290_v33 = vpop.xlane.xlu1 %1289  ;;  %v1245_v26 = vpop.xlane.xlu0 %1244  ;;  %v397_v51 = vld [vmem:[%s6797_s0 + $0xbf0] sm:$0xff]  ;;  %4077 = vmatpush3.bf16.msra.mxu0 %v4076_v18  ;;  %4111 = vmatpush3.bf16.msra.mxu1 %v4076_v18 }
 0x2ed   :  { %v3464_v32 = vrot.slane %v1290_v33, %v4550_v13  ;;  %v3390_v11 = vrot.slane %v1245_v26, %v4538_v7  ;;  %v1546_v63 = vsel %vm399_vm0, %v397_v51, 0.0  ;;  %v1574_v51 = vld [vmem:[%s6798_s1 + $0xb0] sm:$0xff] }
 0x2ee   :  { %v4082_v3 = vpack.c.bf16 %v1575_v36, %v1574_v51 }
 0x2ef   :  { %v6411_v15 = vsel %vm2028_vm8, %v3464_v32, %v6324_v50  ;;  %v6415_v43 = vsel %vm2035_vm9, %v3390_v11, %v6327_v0  ;;  %1496 = vadd.xlane.f32.xlu1 %v1495_v6  ;;  %1454 = vadd.xlane.f32.xlu0 %v1453_v55  ;;  %v1114_v50 = vsel %vm399_vm0, %v253_v9, 0.0  ;;  %v1498_v6 = vsel %vm399_vm0, %v381_v30, 0.0  ;;  %v382_v11 = vld [vmem:[%s6797_s0 + $0xb78] sm:$0xff] }
 0x2f0   :  { %v1383_v48 = vpop.xlane.xlu1 %1382  ;;  %v1341_v40 = vpop.xlane.xlu0 %1340  ;;  %v4080_v55 = vpack.c.bf16 %v1557_v54, %v1556_v44  ;;  %v254_v9 = vld [vmem:[%s6797_s0 + $0x778] sm:$0xff] }
 0x2f1   :  { %v3617_v0 = vrot.slane %v1383_v48, %v4517_v56  ;;  %v3548_v58 = vrot.slane %v1341_v40, %v4538_v7  ;;  %v1559_v48 = vld [vmem:[%s6798_s1 + $0x38] sm:$0xff] }
 0x2f2   :  { %v4084_v12 = vpack.c.bf16 %v1559_v48, %v1558_v27  ;;  %v1563_v30 = vld [vmem:[%s6798_s1 + $0x58] sm:$0xff]  ;;  %v1566_v27 = vld [vmem:[%s6798_s1 + $0x70] sm:$0xff] }
 0x2f3   :  { %v6441_v60 = vsel %vm2021_vm7, %v3617_v0, %v6340_v53  ;;  %v6445_v8 = vsel %vm2035_vm9, %v3548_v58, %v6343_v37  ;;  %1115 = vadd.xlane.f32.xlu1 %v1114_v50  ;;  %1547 = vadd.xlane.f32.xlu0 %v1546_v63  ;;  %v1405_v53 = vsel %vm399_vm0, %v350_v16, 0.0  ;;  %v1117_v63 = vsel %vm399_vm0, %v254_v9, 0.0  ;;  %v1576_v58 = vld [vmem:[%s6798_s1 + $0xc0] sm:$0xff]  ;;  %v1577_v16 = vld [vmem:[%s6798_s1 + $0xc8] sm:$0xff]  ;;  %v1567_v48 = vld [vmem:[%s6798_s1 + $0x78] sm:$0xff] }
 0x2f4   :  { %v1476_v24 = vpop.xlane.xlu1 %1475  ;;  %v1434_v52 = vpop.xlane.xlu0 %1433  ;;  %v4086_v62 = vpack.c.bf16 %v1577_v16, %v1576_v58 }
 0x2f5   :  { %v3770_v37 = vrot.slane %v1476_v24, %v4520_v57  ;;  %v3701_v19 = vrot.slane %v1434_v52, %v4550_v13  ;;  %v1573_v57 = vld [vmem:[%s6798_s1 + $0xa8] sm:$0xff]  ;;  %v4088_v52 = vpack.c.bf16 %v1561_v46, %v1560_v21 }
 0x2f6   :  { %v4078_v20 = vpack.c.bf16 %v1573_v57, %v1572_v38 }
 0x2f7   :  { %v6471_v39 = vsel %vm2014_vm6, %v3770_v37, %v6356_v22  ;;  %v6475_v10 = vsel %vm2028_vm8, %v3701_v19, %v6359_v35  ;;  %1406 = vadd.xlane.f32.xlu1 %v1405_v53  ;;  %1166 = vadd.xlane.f32.xlu0 %v1165_v28  ;;  %v1549_v22 = vsel %vm399_vm0, %v398_v34, 0.0  ;;  %v1579_v28 = vld [vmem:[%s6798_s1 + $0xd8] sm:$0xff]  ;;  %v1562_v34 = vld [vmem:[%s6798_s1 + $0x50] sm:$0xff]  ;;  %vm6831_vm6 = vmmov %vm6824_vm12 }
 0x2f8   :  { %v1095_v33 = vpop.xlane.xlu1 %1094  ;;  %v1527_v26 = vpop.xlane.xlu0 %1526  ;;  %4079 = vmatprep.subr.bf16.mxu0 %v4078_v20  ;;  %4104 = vmatprep.subr.bf16.mxu1 %v4078_v20  ;;  %v4092_v20 = vpack.c.bf16 %v1563_v30, %v1562_v34 }
 0x2f9   :  { %v3143_v35 = vrot.slane %v1095_v33, %v4517_v56  ;;  %v3854_v32 = vrot.slane %v1527_v26, %v4517_v56  ;;  %4081 = vmatpush3.bf16.msra.mxu0 %v4080_v55  ;;  %4112 = vmatpush3.bf16.msra.mxu1 %v4080_v55  ;;  %v1565_v55 = vld [vmem:[%s6798_s1 + $0x68] sm:$0xff] }
 0x2fa   :  { %4083 = vmatprep.subr.bf16.mxu0 %v4082_v3  ;;  %4105 = vmatprep.subr.bf16.mxu1 %v4082_v3 }
 0x2fb   :  { %v6501_v5 = vsel %vm2021_vm7, %v3143_v35, %v6372_v17  ;;  %v6505_v2 = vsel %vm2021_vm7, %v3854_v32, %v6375_v14  ;;  %1550 = vadd.xlane.f32.xlu1 %v1549_v22  ;;  %1499 = vadd.xlane.f32.xlu0 %v1498_v6  ;;  %v1501_v17 = vsel %vm399_vm0, %v382_v11, 0.0  ;;  %vm6825_vm0 = vcmask 720512   ;;  %v1564_v6 = vld [vmem:[%s6798_s1 + $0x60] sm:$0xff] }
 0x2fc   :  { %v1197_v40 = vpop.xlane.xlu1 %1196  ;;  %v1146_v50 = vpop.xlane.xlu0 %1145  ;;  %vm6826_vm1 = vmmov %vm6825_vm0  ;;  %v4096_v11 = vpack.c.bf16 %v1565_v55, %v1564_v6 }
 0x2fd   :  { %v3311_v14 = vrot.slane %v1197_v40, %v4538_v7  ;;  %v3227_v0 = vrot.slane %v1146_v50, %v4550_v13  ;;  %4085 = vmatpush3.bf16.msra.mxu0 %v4084_v12  ;;  %4113 = vmatpush3.bf16.msra.mxu1 %v4084_v12  ;;  %vm6827_vm2 = vmmov %vm6825_vm0 }
 0x2fe   :  { %4087 = vmatprep.subr.bf16.mxu0 %v4086_v62  ;;  %4106 = vmatprep.subr.bf16.mxu1 %v4086_v62  ;;  %vm6828_vm3 = vmmov %vm6825_vm0 }
 0x2ff   :  { %v6525_v42 = vsel %vm2035_vm9, %v3311_v14, %v6388_v25  ;;  %v6529_v4 = vsel %vm2028_vm8, %v3227_v0, %v6391_v29  ;;  %1502 = vadd.xlane.f32.xlu1 %v1501_v17  ;;  %1118 = vadd.xlane.f32.xlu0 %v1117_v63  ;;  %v1578_v29 = vld [vmem:[%s6798_s1 + $0xd0] sm:$0xff]  ;;  %v4100_v17 = vpack.c.bf16 %v1567_v48, %v1566_v27  ;;  %vm6829_vm4 = vmmov %vm6825_vm0 }
 0x300   :  { %v1293_v47 = vpop.xlane.xlu1 %1292  ;;  %v1248_v24 = vpop.xlane.xlu0 %1247  ;;  %v4090_v19 = vpack.c.bf16 %v1579_v28, %v1578_v29  ;;  %vm6830_vm5 = vmmov %vm6825_vm0 }
 0x301   :  { %v3469_v25 = vrot.slane %v1293_v47, %v4538_v7  ;;  %v3395_v53 = vrot.slane %v1248_v24, %v4570_v31  ;;  %4089 = vmatpush3.bf16.msra.mxu0 %v4088_v52  ;;  %4114 = vmatpush3.bf16.msra.mxu1 %v4088_v52  ;;  %vm6834_vm10 = vmmov %vm6825_vm0 }
 0x302   :  { %4091 = vmatprep.subr.bf16.mxu0 %v4090_v19  ;;  %4107 = vmatprep.subr.bf16.mxu1 %v4090_v19  ;;  %vm6835_vm12 = vmmov %vm6825_vm0 }
 0x303   :  { %v3470_v18 = vsel %vm2035_vm9, %v3469_v25, %v6411_v15  ;;  %v3396_v37 = vsel %vm6825_vm0, %v3395_v53, %v6415_v43  ;;  %v1580_v15 = vld [vmem:[%s6798_s1 + $0xe0] sm:$0xff]  ;;  %v1581_v43 = vld [vmem:[%s6798_s1 + $0xe8] sm:$0xff] }
 0x304   :  { %v1386_v38 = vpop.xlane.xlu1 %1385  ;;  %v1344_v57 = vpop.xlane.xlu0 %1343  ;;  %v4094_v22 = vpack.c.bf16 %v1581_v43, %v1580_v15 }
 0x305   :  { %v3622_v44 = vrot.slane %v1386_v38, %v4550_v13  ;;  %v3553_v54 = vrot.slane %v1344_v57, %v4570_v31  ;;  %4093 = vmatpush3.bf16.msra.mxu0 %v4092_v20  ;;  %4115 = vmatpush3.bf16.msra.mxu1 %v4092_v20 }
 0x306   :  { %4095 = vmatprep.subr.bf16.mxu0 %v4094_v22  ;;  %4108 = vmatprep.subr.bf16.mxu1 %v4094_v22 }
 0x307   :  { %v3623_v33 = vsel %vm2028_vm8, %v3622_v44, %v6441_v60  ;;  %v3554_v26 = vsel %vm6826_vm1, %v3553_v54, %v6445_v8  ;;  %v1582_v60 = vld [vmem:[%s6798_s1 + $0xf0] sm:$0xff]  ;;  %v1583_v8 = vld [vmem:[%s6798_s1 + $0xf8] sm:$0xff]  ;;  %s4145_s1 = smov [#allocation2]  }
 0x308   :  { %v1479_v35 = vpop.xlane.xlu1 %1478  ;;  %v1437_v32 = vpop.xlane.xlu0 %1436  ;;  %v4098_v3 = vpack.c.bf16 %v1583_v8, %v1582_v60  ;;  %s4020_s5 = sshll.u32 %s4145_s1, 4  ;;  %s4021_s5 = int_to_ptr.vmem [resolvable:$true] %s4020_s5 }
 0x309   :  { %v3775_v9 = vrot.slane %v1479_v35, %v4517_v56  ;;  %v3706_v51 = vrot.slane %v1437_v32, %v4538_v7  ;;  %4097 = vmatpush3.bf16.msra.mxu0 %v4096_v11  ;;  %4116 = vmatpush3.bf16.msra.mxu1 %v4096_v11  ;;  %s4121_s8 = scalar_lea.vmem %s4021_s5, 256  ;;  %p4126_p1 = scmp.lt.s32.totalorder %s4021_s5, %s4021_s5 }
 0x30a   :  { %4099 = vmatprep.subr.bf16.mxu0 %v4098_v3  ;;  %4109 = vmatprep.subr.bf16.mxu1 %v4098_v3  ;;  %p4122_p0 = scmp.ne.s32.totalorder %s4021_s5, %s4121_s8  ;;  %p4127_p2 = scmp.lt.s32.totalorder %s4121_s8, %s4121_s8 }
 0x30b   :  { %v3776_v36 = vsel %vm2021_vm7, %v3775_v9, %v6471_v39  ;;  %v3707_v56 = vsel %vm2035_vm9, %v3706_v51, %v6475_v10  ;;  %vm6832_vm7 = vmmov %vm6825_vm0 }
 0x30c   :  { %v1098_v40 = vpop.xlane.xlu1 %1097  ;;  %v1530_v50 = vpop.xlane.xlu0 %1529  ;;  %vm6837_vm0 = vmmov %vm6831_vm6  ;;  %p4128_p3 = por %p4127_p2, %p4126_p1 }
 0x30d   :  { %v3148_v63 = vrot.slane %v1098_v40, %v4550_v13  ;;  %v3859_v12 = vrot.slane %v1530_v50, %v4550_v13  ;;  %4101 = vmatpush3.bf16.msra.mxu0 %v4100_v17  ;;  %4117 = vmatpush3.bf16.msra.mxu1 %v4100_v17 }
 0x30e   :  { %p4129_p4 = pnand %p4128_p3, %p4122_p0 }
 0x30f   :  { %v3149_v39 = vsel %vm2028_vm8, %v3148_v63, %v6501_v5  ;;  %v3860_v10 = vsel %vm2028_vm8, %v3859_v12, %v6505_v2 }
 0x310   :  { %v1200_v14 = vpop.xlane.xlu1 %1199  ;;  %v1149_v0 = vpop.xlane.xlu0 %1148 }
 0x311   :  { %v3316_v58 = vrot.slane %v1200_v14, %v4570_v31  ;;  %v3232_v16 = vrot.slane %v1149_v0, %v4538_v7 }
 0x313   :  { %v3317_v62 = vsel %vm6827_vm2, %v3316_v58, %v6525_v42  ;;  %v3233_v21 = vsel %vm2035_vm9, %v3232_v16, %v6529_v4  ;;  %vm6838_vm2 = vmmov %vm6837_vm0 }
 0x314   :  { %v1296_v46 = vpop.xlane.xlu1 %1295  ;;  %v1251_v47 = vpop.xlane.xlu0 %1250 }
 0x315   :  { %v3474_v24 = vrot.slane %v1296_v46, %v4570_v31  ;;  %v3400_v5 = vrot.slane %v1251_v47, %v4558_v23 }
 0x317   :  { %v3475_v2 = vsel %vm6828_vm3, %v3474_v24, %v3470_v18  ;;  %v3401_v52 = vsel %vm2049_vm11, %v3400_v5, %v3396_v37  ;;  %vm6839_vm3 = vcmask 1041409  }
 0x318   :  { %v1389_v25 = vpop.xlane.xlu1 %1388  ;;  %v1347_v53 = vpop.xlane.xlu0 %1346 }
 0x319   :  { %v3627_v29 = vrot.slane %v1389_v25, %v4538_v7  ;;  %v3558_v28 = vrot.slane %v1347_v53, %v4558_v23 }
 0x31b   :  { %v3628_v42 = vsel %vm2035_vm9, %v3627_v29, %v3623_v33  ;;  %v3559_v4 = vsel %vm2049_vm11, %v3558_v28, %v3554_v26 }
 0x31c   :  { %v1482_v19 = vpop.xlane.xlu1 %1481  ;;  %v1440_v34 = vpop.xlane.xlu0 %1439 }
 0x31d   :  { %v3780_v30 = vrot.slane %v1482_v19, %v4550_v13  ;;  %v3711_v38 = vrot.slane %v1440_v34, %v4570_v31 }
 0x31f   :  { %v3781_v18 = vsel %vm2028_vm8, %v3780_v30, %v3776_v36  ;;  %v3712_v37 = vsel %vm6829_vm4, %v3711_v38, %v3707_v56  ;;  %vm6833_vm8 = vmmov %vm6831_vm6 }
 0x320   :  { %v1101_v57 = vpop.xlane.xlu1 %1100  ;;  %v1533_v20 = vpop.xlane.xlu0 %1532  ;;  %vm6840_vm4 = vmmov %vm6839_vm3 }
 0x321   :  { %v3153_v44 = vrot.slane %v1101_v57, %v4538_v7  ;;  %v3864_v54 = vrot.slane %v1533_v20, %v4538_v7 }
 0x323   :  { %v3154_v15 = vsel %vm2035_vm9, %v3153_v44, %v3149_v39  ;;  %v3865_v43 = vsel %vm2035_vm9, %v3864_v54, %v3860_v10 }
 0x324   :  { %v1203_v33 = vpop.xlane.xlu1 %1202  ;;  %v1152_v26 = vpop.xlane.xlu0 %1151 }
 0x325   :  { %v3321_v13 = vrot.slane %v1203_v33, %v4558_v23  ;;  %v3237_v22 = vrot.slane %v1152_v26, %v4570_v31 }
 0x327   :  { %v3322_v6 = vsel %vm2049_vm11, %v3321_v13, %v3317_v62  ;;  %v3238_v55 = vsel %vm6830_vm5, %v3237_v22, %v3233_v21  ;;  %vm6841_vm5 = vcmask 1042434  }
 0x328   :  { %v1299_v35 = vpop.xlane.xlu1 %1298  ;;  %v1254_v32 = vpop.xlane.xlu0 %1253 }
 0x329   :  { %v3479_v11 = vrot.slane %v1299_v35, %v4558_v23  ;;  %v3405_v9 = vrot.slane %v1254_v32, %v4584_v45 }
 0x32b   :  { %v3480_v51 = vsel %vm2049_vm11, %v3479_v11, %v3475_v2  ;;  %v3406_v60 = vsel %vm6831_vm6, %v3405_v9, %v3401_v52 }
 0x32c   :  { %v1392_v8 = vpop.xlane.xlu1 %1391  ;;  %v1350_v36 = vpop.xlane.xlu0 %1349 }
 0x32d   :  { %v3632_v56 = vrot.slane %v1392_v8, %v4570_v31  ;;  %v3563_v3 = vrot.slane %v1350_v36, %v4584_v45 }
 0x32f   :  { %v3633_v27 = vsel %vm6832_vm7, %v3632_v56, %v3628_v42  ;;  %v3564_v48 = vsel %vm6833_vm8, %v3563_v3, %v3559_v4  ;;  %vm6843_vm7 = vmmov %vm6837_vm0  ;;  %vm3908_vm8 = vcmask 1047559  }
 0x330   :  { %v1485_v40 = vpop.xlane.xlu1 %1484  ;;  %v1443_v50 = vpop.xlane.xlu0 %1442 }
 0x331   :  { %v3785_v17 = vrot.slane %v1485_v40, %v4538_v7  ;;  %v3716_v63 = vrot.slane %v1443_v50, %v4558_v23 }
 0x333   :  { %v3786_v12 = vsel %vm2035_vm9, %v3785_v17, %v3781_v18  ;;  %v3717_v39 = vsel %vm2049_vm11, %v3716_v63, %v3712_v37  ;;  %vm6836_vm9 = vmmov %vm6831_vm6 }
 0x334   :  { %v1104_v10 = vpop.xlane.xlu1 %1103  ;;  %v1536_v14 = vpop.xlane.xlu0 %1535  ;;  %vm6842_vm6 = vmmov %vm6837_vm0 }
 0x335   :  { %v3158_v0 = vrot.slane %v1104_v10, %v4570_v31  ;;  %v3869_v58 = vrot.slane %v1536_v14, %v4570_v31 }
 0x337   :  { %v3159_v16 = vsel %vm6834_vm10, %v3158_v0, %v3154_v15  ;;  %v6639_v62 = vsel %vm6835_vm12, %v3869_v58, %v3865_v43  ;;  %vm6844_vm10 = vmmov %vm6837_vm0 }
 0x338   :  { %v1206_v21 = vpop.xlane.xlu1 %1205  ;;  %v1155_v46 = vpop.xlane.xlu0 %1154  ;;  %vm6845_vm12 = vmmov %vm6841_vm5 }
 0x339   :  { %v3326_v7 = vrot.slane %v1206_v21, %v4584_v45  ;;  %v3242_v47 = vrot.slane %v1155_v46, %v4558_v23 }
 0x33b   :  { %v6644_v24 = vsel %vm6836_vm9, %v3326_v7, %v3322_v6  ;;  %v6647_v5 = vsel %vm2049_vm11, %v3242_v47, %v3238_v55  ;;  %vm6846_vm9 = vmmov %vm6837_vm0 }
 0x33c   :  { %v1302_v2 = vpop.xlane.xlu1 %1301  ;;  %v1257_v52 = vpop.xlane.xlu0 %1256 }
 0x33d   :  { %v3484_v25 = vrot.slane %v1302_v2, %v4584_v45  ;;  %v3410_v53 = vrot.slane %v1257_v52, %v4578_v41 }
 0x33f   :  { %v3485_v29 = vsel %vm6837_vm0, %v3484_v25, %v3480_v51  ;;  %v3411_v28 = vsel %vm2063_vm13, %v3410_v53, %v3406_v60 }
 0x340   :  { %v1395_v42 = vpop.xlane.xlu1 %1394  ;;  %v1353_v4 = vpop.xlane.xlu0 %1352 }
 0x341   :  { %v3637_v19 = vrot.slane %v1395_v42, %v4558_v23  ;;  %v3568_v34 = vrot.slane %v1353_v4, %v4578_v41 }
 0x343   :  { %v6656_v30 = vsel %vm2049_vm11, %v3637_v19, %v3633_v27  ;;  %v3569_v38 = vsel %vm2063_vm13, %v3568_v34, %v3564_v48 }
 0x344   :  { %v1488_v18 = vpop.xlane.xlu1 %1487  ;;  %v1446_v37 = vpop.xlane.xlu0 %1445 }
 0x345   :  { %v3790_v57 = vrot.slane %v1488_v18, %v4570_v31  ;;  %v3721_v20 = vrot.slane %v1446_v37, %v4584_v45 }
 0x347   :  { %v6662_v44 = vsel %vm6826_vm1, %v3790_v57, %v3786_v12  ;;  %v3722_v54 = vsel %vm6838_vm2, %v3721_v20, %v3717_v39  ;;  %vm6847_vm1 = vcmask 1043459  }
 0x348   :  { %v1107_v15 = vpop.xlane.xlu1 %1106  ;;  %v6665_v43 = vpop.xlane.xlu0 %1538 }
 0x349   :  { %v3163_v33 = vrot.slane %v1107_v15, %v4558_v23 }
 0x34b   :  { %v6669_v26 = vsel %vm2049_vm11, %v3163_v33, %v3159_v16 }
 0x34c   :  { %v1209_v13 = vpop.xlane.xlu1 %1208  ;;  %v6671_v22 = vpop.xlane.xlu0 %1157 }
 0x34d   :  { %v3331_v47 = vrot.slane %v1209_v13, %v4578_v41 }
 0x34f   :  { %v3332_v4 = vsel %vm2063_vm13, %v3331_v47, %v6644_v24 }
 0x350   :  { %v1305_v6 = vpop.xlane.xlu1 %1304  ;;  %v1260_v31 = vpop.xlane.xlu0 %1259 }
 0x351   :  { %v3415_v3 = vrot.slane %v1260_v31, %v4603_v61  ;;  %v3489_v2 = vrot.slane %v1305_v6, %v4578_v41 }
 0x353   :  { %v3416_v63 = vsel %vm2070_vm14, %v3415_v3, %v3411_v28  ;;  %v3490_v19 = vsel %vm2063_vm13, %v3489_v2, %v3485_v29 }
 0x354   :  { %v6673_v55 = vpop.xlane.xlu1 %1397  ;;  %v1356_v35 = vpop.xlane.xlu0 %1355 }
 0x355   :  { %v3573_v27 = vrot.slane %v1356_v35, %v4603_v61  ;;  %v3247_v35 = vrot.slane %v6671_v22, %v4584_v45 }
 0x357   :  { %v3574_v12 = vsel %vm2070_vm14, %v3573_v27, %v3569_v38 }
 0x358   :  { %v6675_v32 = vpop.xlane.xlu1 %1490  ;;  %v1449_v11 = vpop.xlane.xlu0 %1448 }
 0x359   :  { %v3726_v34 = vrot.slane %v1449_v11, %v4578_v41 }
 0x35b   :  { %v3727_v29 = vsel %vm2063_vm13, %v3726_v34, %v3722_v54 }
 0x35c   :  { %v6677_v9 = vpop.xlane.xlu1 %1109  ;;  %v6679_v51 = vpop.xlane.xlu0 %1541 }
 0x360   :  { %v1212_v60 = vpop.xlane.xlu1 %1211  ;;  %v1161_v8 = vpop.xlane.xlu0 %1160 }
 0x361   :  { %v3336_v52 = vrot.slane %v1212_v60, %v4603_v61  ;;  %v3642_v60 = vrot.slane %v6673_v55, %v4584_v45 }
 0x363   :  { %v3337_v18 = vsel %vm2070_vm14, %v3336_v52, %v3332_v4  ;;  %v3643_v55 = vsel %vm6843_vm7, %v3642_v60, %v6656_v30  ;;  %v4031_v60 = vld [vmem:[%s6799_s2] ss:$0 sm:$0xff] }
 0x364   :  { %v1308_v36 = vpop.xlane.xlu1 %1307  ;;  %v1263_v56 = vpop.xlane.xlu0 %1262 }
 0x365   :  { %v3420_v48 = vrot.slane %v1263_v56, %v4598_v59  ;;  %v3494_v25 = vrot.slane %v1308_v36, %v4603_v61  ;;  %v3252_v36 = vrot.slane %v1161_v8, %v4578_v41  ;;  %v3879_v8 = vrot.slane %v6679_v51, %v4584_v45 }
 0x367   :  { %v3421_v39 = vsel %vm2077_vm15, %v3420_v48, %v3416_v63  ;;  %v3495_v37 = vsel %vm2070_vm14, %v3494_v25, %v3490_v19  ;;  %v3874_v48 = vrot.slane %v6665_v43, %v4558_v23 }
 0x368   :  { %v1401_v40 = vpop.xlane.xlu1 %1400  ;;  %v1359_v50 = vpop.xlane.xlu0 %1358 }
 0x369   :  { %v3578_v17 = vrot.slane %v1359_v50, %v4598_v59  ;;  %v3647_v54 = vrot.slane %v1401_v40, %v4578_v41  ;;  %v3875_v30 = vsel %vm2049_vm11, %v3874_v48, %v6639_v62 }
 0x36a   :  { %v3880_v2 = vsel %vm6844_vm10, %v3879_v8, %v3875_v30 }
 0x36b   :  { %v3579_v10 = vsel %vm2077_vm15, %v3578_v17, %v3574_v12  ;;  %v3248_v17 = vsel %vm6842_vm6, %v3247_v35, %v6647_v5  ;;  %v3648_v43 = vsel %vm2063_vm13, %v3647_v54, %v3643_v55 }
 0x36c   :  { %v6689_v14 = vpop.xlane.xlu1 %1493  ;;  %v1452_v0 = vpop.xlane.xlu0 %1451  ;;  %v3920_v58 = vsel %vm6839_vm3, %v3579_v10, %v3421_v39  ;;  %v3253_v63 = vsel %vm2063_vm13, %v3252_v36, %v3248_v17 }
 0x36d   :  { %v3731_v57 = vrot.slane %v1452_v0, %v4603_v61  ;;  %v3800_v62 = vrot.slane %v6689_v14, %v4584_v45 }
 0x36f   :  { %v3732_v31 = vsel %vm2070_vm14, %v3731_v57, %v3727_v29 }
 0x370   :  { %v6692_v16 = vpop.xlane.xlu1 %1112  ;;  %v6694_v21 = vpop.xlane.xlu0 %1544 }
 0x371   :  { %v3884_v39 = vrot.slane %v6694_v21, %v4578_v41 }
 0x374   :  { %v1215_v46 = vpop.xlane.xlu1 %1214  ;;  %v1164_v7 = vpop.xlane.xlu0 %1163 }
 0x375   :  { %v3341_v53 = vrot.slane %v1215_v46, %v4598_v59  ;;  %v3257_v50 = vrot.slane %v1164_v7, %v4603_v61  ;;  %v3795_v46 = vrot.slane %v6675_v32, %v4558_v23  ;;  %v3168_v7 = vrot.slane %v6677_v9, %v4584_v45 }
 0x376   :  { %v3173_v23 = vrot.slane %v6692_v16, %v4578_v41  ;;  %v3885_v32 = vsel %vm2063_vm13, %v3884_v39, %v3880_v2 }
 0x377   :  { %v3342_v20 = vsel %vm2077_vm15, %v3341_v53, %v3337_v18  ;;  %v3169_v16 = vsel %vm6846_vm9, %v3168_v7, %v6669_v26 }
 0x378   :  { %v1404_v28 = vpop.xlane.xlu1 %1403  ;;  %v1311_v42 = vpop.xlane.xlu0 %1310 }
 0x379   :  { %v3499_v38 = vrot.slane %v1311_v42, %v4598_v59  ;;  %v3652_v22 = vrot.slane %v1404_v28, %v4603_v61 }
 0x37b   :  { %v3500_v15 = vsel %vm2077_vm15, %v3499_v38, %v3495_v37  ;;  %v3653_v0 = vsel %vm2070_vm14, %v3652_v22, %v3648_v43  ;;  %v3174_v37 = vsel %vm2063_vm13, %v3173_v23, %v3169_v16 }
 0x37c   :  { %v1497_v33 = vpop.xlane.xlu1 %1496  ;;  %v1455_v13 = vpop.xlane.xlu0 %1454  ;;  %v3917_v24 = vsel %vm6840_vm4, %v3500_v15, %v3342_v20 }
 0x37d   :  { %v3736_v6 = vrot.slane %v1455_v13, %v4598_v59  ;;  %v3805_v9 = vrot.slane %v1497_v33, %v4578_v41 }
 0x37f   :  { %v3737_v11 = vsel %vm2077_vm15, %v3736_v6, %v3732_v31 }
 0x380   :  { %v1116_v56 = vpop.xlane.xlu1 %1115  ;;  %v1548_v3 = vpop.xlane.xlu0 %1547  ;;  %v3921_v27 = vsel %vm6841_vm5, %v3737_v11, %v3920_v58  ;;  %v3258_v58 = vsel %vm2070_vm14, %v3257_v50, %v3253_v63 }
 0x381   :  { %v3889_v51 = vrot.slane %v1548_v3, %v4603_v61  ;;  %v3178_v4 = vrot.slane %v1116_v56, %v4603_v61 }
 0x383   :  { %v3890_v14 = vsel %vm2070_vm14, %v3889_v51, %v3885_v32 }
 0x384   :  { %v1407_v12 = vpop.xlane.xlu1 %1406  ;;  %v1167_v40 = vpop.xlane.xlu0 %1166 }
 0x385   :  { %v3657_v10 = vrot.slane %v1407_v12, %v4598_v59  ;;  %v3262_v5 = vrot.slane %v1167_v40, %v4598_v59 }
 0x387   :  { %v3658_v21 = vsel %vm2077_vm15, %v3657_v10, %v3653_v0  ;;  %v3263_v47 = vsel %vm2077_vm15, %v3262_v5, %v3258_v58 }
 0x388   :  { %v1551_v52 = vpop.xlane.xlu1 %1550  ;;  %v1500_v25 = vpop.xlane.xlu0 %1499  ;;  %v3916_v53 = vsel %vm3908_vm8, %v3263_v47, %v5920_v49  ;;  %v3918_v28 = vsel %vm6845_vm12, %v3658_v21, %v3917_v24  ;;  %v3796_v49 = vsel %vm2049_vm11, %v3795_v46, %v6662_v44  ;;  %v3179_v44 = vsel %vm2070_vm14, %v3178_v4, %v3174_v37  ;;  %vm6848_vm11 = vmmov %vm6847_vm1 }
 0x389   :  { %v3894_v42 = vrot.slane %v1551_v52, %v4598_v59  ;;  %3991 = vmatprep.mubr.f32.mxu0 %v3916_v53  ;;  %v3810_v45 = vrot.slane %v1500_v25, %v4603_v61  ;;  %v3801_v34 = vsel %vm6837_vm0, %v3800_v62, %v3796_v49 }
 0x38a   :  { %v3806_v61 = vsel %vm2063_vm13, %v3805_v9, %v3801_v34 }
 0x38b   :  { %v3895_v19 = vsel %vm2077_vm15, %v3894_v42, %v3890_v14  ;;  %v3811_v15 = vsel %vm2070_vm14, %v3810_v45, %v3806_v61 }
 0x38c   :  { %v1503_v41 = vpop.xlane.xlu1 %1502  ;;  %v1119_v38 = vpop.xlane.xlu0 %1118  ;;  %v3922_v18 = vsel %vm6847_vm1, %v3895_v19, %v3921_v27 }
 0x38d   :  { %v3815_v57 = vrot.slane %v1503_v41, %v4598_v59  ;;  %v3183_v20 = vrot.slane %v1119_v38, %v4598_v59  ;;  %3996 = vmatprep.mubr.f32.mxu1 %v3922_v18 }
 0x38f   :  { %v3184_v26 = vsel %vm2077_vm15, %v3183_v20, %v3179_v44  ;;  %v3816_v33 = vsel %vm2077_vm15, %v3815_v57, %v3811_v15 }
 0x390   :  { %v3909_v13 = vsel %vm3908_vm8, %v3184_v26, %v5821_v1  ;;  %v3919_v24 = vsel %vm6848_vm11, %v3816_v33, %v3918_v28 }
 0x391   :  { %3992 = vmatmul.mubr.f32.vlgmr.msra.gmra.mrb[0].mxu0 %v3909_v13  ;;  %3997 = vmatmul.mubr.f32.vlgmr.msra.gmra.mrb[0].mxu1 %v3919_v24 }
 0x464   :  { %v4064_v29 = vpop.f32.mrb[0].mxu0  ;;  %v4067_v6 = vpop.f32.mrb[0].mxu1 }
 0x465   :  { %v4065_v31 = vpop.f32.mrb[1].mxu0  ;;  %v4068_v59 = vpop.f32.mrb[1].mxu1 }
 0x466   :  { %v4066_v35 = vadd.f32 %v4065_v31, %v4064_v29  ;;  %v4069_v11 = vadd.f32 %v4068_v59, %v4067_v6 }
 0x468   :  { %v4002_v36 = vmul.f32 0.015625, %v4066_v35  ;;  %v4003_v56 = vmul.f32 0.015625, %v4069_v11 }
 0x46a   :  { %v4011_v1 = vadd.f32 %v4031_v60, %v4002_v36  ;;  %v4012_v3 = vadd.f32 %v4031_v60, %v4003_v56 }
 0x46c   :  { %4013 = vst [vmem:[#allocation2] sm:$0xff] %v4011_v1  ;;  %4014 = vst [vmem:[#allocation2 + $0x8] sm:$0xf] %v4012_v3 }
 0x46d   :  { %4132 = shalt.err (!%p4129_p4)
}
 0x46e   :  { %s4133_s11 = scalar_lea.hbm %s6800_s3, 256 }
 0x46f   :  { %p4134_p5 = scmp.ne.s32.totalorder %s6800_s3, %s4133_s11  ;;  %p4137_p6 = scmp.lt.u32.totalorder %s4133_s11, %s6800_s3 }
 0x471   :  { %p4139_p7 = pnand %p4137_p6, %p4134_p5 }
 0x473   :  { %4142 = shalt.err (!%p4139_p7)
}
 0x474   :  { %s4146_s15 = smov 128   ;;  %s4147_s16 = smov 8  }
 0x475   :  { %4026 = dma.vmem_to_hbm [thread:$0]  %s4021_s5, 256, %s6800_s3, [#allocation3], %s4146_s15, %s4146_s15, %s4147_s16  }
 0x476   :  { %4143 = dma.done.wait [#allocation3], 256  }
 0x477   :  { %4144 = vsyncadd [#allocation3], 4294967040 }
 0x478   :  { %4030 = vsyncpa [#allocation3], 1 }

</bundles_post_ra>
